<compile_context>
chip_gen: v6e
topology: v6e:2x2x1
jax: 0.10.0
libtpu: 0.0.40
codegen_flags: <defaults>
</compile_context>

<pallas_src>
import numpy as np

import jax
import jax.numpy as jnp
from jax import lax
from jax.experimental import pallas as pl
from jax.experimental.pallas import tpu as pltpu

LRELU_SLOPE = 0.2
LANES = 128            # uniform lane width for activations / packed weights

# (name, kind, stride, padding); kernel size comes from the weight shape.
LAYER_DEFS = [
    ("C1", "conv", 2, 1),
    ("C2", "conv", 2, 1),
    ("C3", "conv", 2, 1),
    ("C4", "conv", 2, 1),
    ("C5", "conv", 1, 1),
    ("C6", "convT", 1, 0),
    ("C7", "convT", 2, 1),
    ("C8", "convT", 2, 1),
    ("C9", "convT", 2, 1),
    ("C10", "convT", 2, 1),
]


def _round_up(x, m):
    return (x + m - 1) // m * m


# ----------------------------------------------------------------------------
# Fused whole-network Pallas kernel (built from static per-layer metadata)
# ----------------------------------------------------------------------------
def _make_kernel(meta, out_w):
    n_layers = len(meta)

    def kernel(img_ref, w_ref, b_ref, out_ref):
        # act : (N*H_l, 128) bf16, updated layer by layer, never leaves VMEM.
        act = img_ref[...].astype(jnp.bfloat16)
        for li, m in enumerate(meta):
            ohn, hinn = m["OHN"], m["HinN"]
            # k gather matmuls (0/1 row selection: vertical tap + stride + pad,
            # block-diagonal over the folded batch), lane-concatenated into one
            # (OHN, ntap*128) im2row block.  128-aligned concat -> cheap.
            blocks = []
            for off in m["s_offs"]:
                s_di = w_ref[off:off + ohn, 0:hinn]              # (OHN, HinN) bf16 0/1
                g = jnp.dot(s_di, act, preferred_element_type=jnp.float32)
                blocks.append(g.astype(jnp.bfloat16))            # exact (0/1 gather)
            r = jnp.concatenate(blocks, axis=1)                  # (OHN, ntap*128) bf16

            # Single K-fused Toeplitz weight matmul + bias (f32 accumulate).
            wcat = w_ref[m["w_off"]:m["w_off"] + m["w_rows"], :]  # (ntap*128, 128) bf16
            acc = b_ref[8 * li:8 * li + 1, :] + jnp.dot(
                r, wcat, preferred_element_type=jnp.float32)      # (OHN, 128) f32

            if li < n_layers - 1:
                # LeakyReLU(0.2) == max(x, 0.2*x); padded lanes stay exactly 0.
                act = jnp.maximum(acc, LRELU_SLOPE * acc).astype(jnp.bfloat16)
            else:
                out_ref[...] = jnp.tanh(acc[:, 0:out_w])          # final tanh

    return kernel


def build_forward(meta, N, H, W):
    kernel = _make_kernel(meta, W)
    rows = N * H

    @jax.jit
    def forward(w_slab, b_slab, image_nchw):
        x2d = image_nchw.reshape(rows, W).astype(jnp.float32)
        x2d = jnp.pad(x2d, ((0, 0), (0, LANES - W)))              # lane-dense input
        out2d = pl.pallas_call(
            kernel,
            grid=(1,),
            out_shape=jax.ShapeDtypeStruct((rows, W), jnp.float32),
            in_specs=[pl.BlockSpec((rows, LANES), lambda i: (0, 0)),
                      pl.BlockSpec(w_slab.shape, lambda i: (0, 0)),
                      pl.BlockSpec(b_slab.shape, lambda i: (0, 0))],
            out_specs=pl.BlockSpec((rows, W), lambda i: (0, 0)),
            compiler_params=pltpu.CompilerParams(
                dimension_semantics=("arbitrary",)),
        )(x2d, w_slab, b_slab)
        return out2d.reshape(N, 1, H, W)

    return forward


# ----------------------------------------------------------------------------
# One-time host-side parameter preparation (weight relayout + operand packing)
# ----------------------------------------------------------------------------
def prepare_operands(params, N, H0, W0):
    """Builds one bf16 slab holding all row-gather matrices S and K-stacked
    Toeplitz weight matrices, one f32 slab of bias rows, and static metadata."""
    layer_blocks = []
    n_layers = len(LAYER_DEFS)
    b_slab = np.zeros((8 * n_layers, LANES), np.float32)

    Hin, Win, Cin = H0, W0, 1
    for idx, (name, kind, stride, pad) in enumerate(LAYER_DEFS):
        w = np.asarray(params[name + "_w"], np.float32)
        b = np.asarray(params[name + "_b"], np.float32)
        if kind == "conv":
            Cout, Cin_w, k, _ = w.shape
            OH = (Hin + 2 * pad - k) // stride + 1
            OW = (Win + 2 * pad - k) // stride + 1
        else:  # ConvTranspose2d
            Cin_w, Cout, k, _ = w.shape
            OH = (Hin - 1) * stride - 2 * pad + k
            OW = (Win - 1) * stride - 2 * pad + k
        assert Cin_w == Cin, (name, Cin_w, Cin)
        assert Win * Cin <= LANES and OW * Cout <= LANES and N * Hin <= LANES

        def imap(o, d, size_in):
            # input index feeding output position o through tap d (None = padding)
            if kind == "conv":
                i = stride * o + d - pad
            else:
                t = o + pad - d
                if t % stride != 0:
                    return None
                i = t // stride
            return i if 0 <= i < size_in else None

        # Vertical taps that touch at least one valid input row (prune dead taps).
        taps = [d for d in range(k)
                if any(imap(oh, d, Hin) is not None for oh in range(OH))]

        # Per-tap 0/1 row-gather matrices, block-diagonal over the folded batch.
        s_list = []
        for d in taps:
            S = np.zeros((N * OH, N * Hin), np.float32)
            for n in range(N):
                for oh in range(OH):
                    ih = imap(oh, d, Hin)
                    if ih is not None:
                        S[n * OH + oh, n * Hin + ih] = 1.0
            s_list.append(S)

        # K-stacked Toeplitz weight: tap-block bi occupies rows [bi*128, bi*128+Win*Cin).
        Wcat = np.zeros((len(taps) * LANES, LANES), np.float32)
        for bi, di in enumerate(taps):
            for dj in range(k):
                tap = w[:, :, di, dj].T if kind == "conv" else w[:, :, di, dj]  # (Cin, Cout)
                for ow in range(OW):
                    iw = imap(ow, dj, Win)
                    if iw is not None:
                        r0 = bi * LANES + iw * Cin
                        Wcat[r0:r0 + Cin, ow * Cout:(ow + 1) * Cout] = tap

        b_slab[8 * idx, :OW * Cout] = np.tile(b, OW)
        layer_blocks.append((s_list, Wcat,
                             dict(OHN=N * OH, HinN=N * Hin)))
        Hin, Win, Cin = OH, OW, Cout

    assert Cin == 1

    # Pack everything into one bf16 slab; every block starts on a 16-row boundary
    # (bf16 sublane-packing granularity) so in-kernel slices never straddle tiles.
    total = 0
    for s_list, Wcat, _ in layer_blocks:
        total += sum(_round_up(S.shape[0], 16) for S in s_list)
        total += _round_up(Wcat.shape[0], 16)
    w_slab = np.zeros((total, LANES), np.float32)

    meta = []
    cur = 0
    for s_list, Wcat, m in layer_blocks:
        s_offs = []
        for S in s_list:
            w_slab[cur:cur + S.shape[0], :S.shape[1]] = S
            s_offs.append(cur)
            cur += _round_up(S.shape[0], 16)
        w_slab[cur:cur + Wcat.shape[0], :] = Wcat
        meta.append(dict(m, s_offs=tuple(s_offs),
                         w_off=cur, w_rows=Wcat.shape[0]))
        cur += _round_up(Wcat.shape[0], 16)

    return (jnp.asarray(w_slab, jnp.bfloat16),
            jnp.asarray(b_slab, jnp.float32),
            tuple(meta), (Hin, Win))


# ----------------------------------------------------------------------------
# Deterministic parameters (PyTorch weight layouts)
# ----------------------------------------------------------------------------
def init_params(key, hidden, bn_dim):
    h = hidden
    specs = {
        "C1": ("conv", h, 1, 4), "C2": ("conv", 2 * h, h, 4),
        "C3": ("conv", 4 * h, 2 * h, 4), "C4": ("conv", 8 * h, 4 * h, 4),
        "C5": ("conv", bn_dim, 8 * h, 6),
        "C6": ("convT", bn_dim, 8 * h, 4), "C7": ("convT", 8 * h, 4 * h, 4),
        "C8": ("convT", 4 * h, 2 * h, 4), "C9": ("convT", 2 * h, h, 4),
        "C10": ("convT", h, 1, 4),
    }
    params = {}
    keys = jax.random.split(key, 2 * len(specs))
    for i, (name, (kind, a, bdim, k)) in enumerate(specs.items()):
        if kind == "conv":
            cout, cin = a, bdim
            wshape = (cout, cin, k, k)       # Conv2d weight layout
        else:
            cin, cout = a, bdim
            wshape = (cin, cout, k, k)       # ConvTranspose2d weight layout
        fan_in = cin * k * k
        params[name + "_w"] = (jax.random.normal(keys[2 * i], wshape, jnp.float32)
                               * (2.0 / fan_in) ** 0.5)
        params[name + "_b"] = 0.01 * jax.random.normal(keys[2 * i + 1], (cout,),
                                                       jnp.float32)
    return params


# ----------------------------------------------------------------------------
# Pure-XLA reference (independent formulation) for correctness checking
# ----------------------------------------------------------------------------
def reference_forward(params, image_nchw, bf16=True):
    dn = ("NCHW", "OIHW", "NCHW")
    prec = None if bf16 else lax.Precision.HIGHEST

    def cast(a):
        return a.astype(jnp.bfloat16) if bf16 else a

    def conv(x, w, b, s, p):
        y = lax.conv_general_dilated(cast(x), cast(w), (s, s), [(p, p), (p, p)],
                                     dimension_numbers=dn, precision=prec,
                                     preferred_element_type=jnp.float32)
        return y + b.reshape(1, -1, 1, 1)

    def convT(x, w, b, s, p):
        k = w.shape[2]
        w_conv = jnp.transpose(jnp.flip(w, (2, 3)), (1, 0, 2, 3))
        y = lax.conv_general_dilated(cast(x), cast(w_conv), (1, 1),
                                     [(k - 1 - p, k - 1 - p)] * 2,
                                     lhs_dilation=(s, s), dimension_numbers=dn,
                                     precision=prec,
                                     preferred_element_type=jnp.float32)
        return y + b.reshape(1, -1, 1, 1)

    lrelu = lambda v: jnp.where(v > 0, v, LRELU_SLOPE * v)
    p = params
    x = lrelu(conv(image_nchw, p["C1_w"], p["C1_b"], 2, 1))
    x = lrelu(conv(x, p["C2_w"], p["C2_b"], 2, 1))
    x = lrelu(conv(x, p["C3_w"], p["C3_b"], 2, 1))
    x = lrelu(conv(x, p["C4_w"], p["C4_b"], 2, 1))
    x = lrelu(conv(x, p["C5_w"], p["C5_b"], 1, 1))
    x = lrelu(convT(x, p["C6_w"], p["C6_b"], 1, 0))
    x = lrelu(convT(x, p["C7_w"], p["C7_b"], 2, 1))
    x = lrelu(convT(x, p["C8_w"], p["C8_b"], 2, 1))
    x = lrelu(convT(x, p["C9_w"], p["C9_b"], 2, 1))
    x = jnp.tanh(convT(x, p["C10_w"], p["C10_b"], 2, 1))
    return x


# ----------------------------------------------------------------------------
if __name__ == "__main__":
    HIDDEN = 4      # small `hidden`
    BN_DIM = 8      # small `BN_dim`
    BATCH = 2
    H = W = 64      # architecture requires 64x64 inputs (C5 k=6 maps 6x6 -> 1x1)

    key = jax.random.PRNGKey(0)
    k_img, k_par = jax.random.split(key)
    image = jax.random.normal(k_img, (BATCH, 1, H, W), jnp.float32)
    params = init_params(k_par, HIDDEN, BN_DIM)

    # One-time host prep: block-diagonal gather matrices, K-stacked Toeplitz
    # weights and biases packed into two slabs (3 input DMAs total).
    w_slab, b_slab, meta, out_hw = prepare_operands(params, BATCH, H, W)
    assert out_hw == (H, W)

    fwd = build_forward(meta, BATCH, H, W)
    out = jax.block_until_ready(fwd(w_slab, b_slab, image))

    assert out.shape == (BATCH, 1, H, W), out.shape
    assert out.dtype == jnp.float32

    # Tight check vs an XLA reference using the same bf16-input / f32-accumulate math.
    ref_bf16 = jax.block_until_ready(reference_forward(params, image, bf16=True))
    err_bf16 = float(jnp.max(jnp.abs(out - ref_bf16)))
    assert err_bf16 < 1e-2, f"mismatch vs bf16 reference: {err_bf16}"

    # Loose structural sanity check vs a full-f32 HIGHEST-precision reference.
    ref_f32 = jax.block_until_ready(reference_forward(params, image, bf16=False))
    err_f32 = float(jnp.max(jnp.abs(out - ref_f32)))
    assert err_f32 < 0.15, f"mismatch vs f32 reference: {err_f32}"

    print("KERNEL_OK")
</pallas_src>

<mosaic_0001>
module attributes {stable_mosaic.version = 11 : i64} {
  func.func @kernel(%arg0: i32, %arg1: memref<128x128xf32, #tpu.memory_space<vmem>>, %arg2: memref<6720x128xbf16, #tpu.memory_space<vmem>>, %arg3: memref<80x128xf32, #tpu.memory_space<vmem>>, %arg4: memref<128x64xf32, #tpu.memory_space<vmem>>) attributes {dimension_semantics = [#tpu.dimension_semantics<arbitrary>], iteration_bounds = array<i64: 1>, scalar_prefetch = 0 : i64, scratch_operands = 0 : i64, tpu.core_type = #tpu.core_type<tc>, window_params = [{pipeline_mode = #tpu.pipeline_mode<synchronous>, transform_indices = @transform_0, window_bounds = array<i64: 128, 128>}, {pipeline_mode = #tpu.pipeline_mode<synchronous>, transform_indices = @transform_1, window_bounds = array<i64: 6720, 128>}, {pipeline_mode = #tpu.pipeline_mode<synchronous>, transform_indices = @transform_2, window_bounds = array<i64: 80, 128>}, {pipeline_mode = #tpu.pipeline_mode<synchronous>, transform_indices = @transform_3, window_bounds = array<i64: 128, 64>}]} {
    %c0 = arith.constant 0 : index
    %c0_0 = arith.constant 0 : index
    %0 = vector.load %arg1[%c0, %c0_0] : memref<128x128xf32, #tpu.memory_space<vmem>>, vector<128x128xf32>
    %1 = arith.truncf %0 : vector<128x128xf32> to vector<128x128xbf16>
    %c0_1 = arith.constant 0 : index
    %c0_2 = arith.constant 0 : index
    %2 = vector.load %arg2[%c0_1, %c0_2] : memref<6720x128xbf16, #tpu.memory_space<vmem>>, vector<64x128xbf16>
    %cst = arith.constant dense<0.000000e+00> : vector<64x128xf32>
    %3 = tpu.matmul %2, %1, %cst {dimension_numbers = #tpu.dot_dimension_numbers<[1], [0], [0], [1], [0, 0, 1, 1], [], []>} : vector<64x128xbf16>, vector<128x128xbf16>, vector<64x128xf32> -> vector<64x128xf32>
    %4 = arith.truncf %3 : vector<64x128xf32> to vector<64x128xbf16>
    %c64 = arith.constant 64 : index
    %c0_3 = arith.constant 0 : index
    %5 = vector.load %arg2[%c64, %c0_3] : memref<6720x128xbf16, #tpu.memory_space<vmem>>, vector<64x128xbf16>
    %cst_4 = arith.constant dense<0.000000e+00> : vector<64x128xf32>
    %6 = tpu.matmul %5, %1, %cst_4 {dimension_numbers = #tpu.dot_dimension_numbers<[1], [0], [0], [1], [0, 0, 1, 1], [], []>} : vector<64x128xbf16>, vector<128x128xbf16>, vector<64x128xf32> -> vector<64x128xf32>
    %7 = arith.truncf %6 : vector<64x128xf32> to vector<64x128xbf16>
    %c128 = arith.constant 128 : index
    %c0_5 = arith.constant 0 : index
    %8 = vector.load %arg2[%c128, %c0_5] : memref<6720x128xbf16, #tpu.memory_space<vmem>>, vector<64x128xbf16>
    %cst_6 = arith.constant dense<0.000000e+00> : vector<64x128xf32>
    %9 = tpu.matmul %8, %1, %cst_6 {dimension_numbers = #tpu.dot_dimension_numbers<[1], [0], [0], [1], [0, 0, 1, 1], [], []>} : vector<64x128xbf16>, vector<128x128xbf16>, vector<64x128xf32> -> vector<64x128xf32>
    %10 = arith.truncf %9 : vector<64x128xf32> to vector<64x128xbf16>
    %c192 = arith.constant 192 : index
    %c0_7 = arith.constant 0 : index
    %11 = vector.load %arg2[%c192, %c0_7] : memref<6720x128xbf16, #tpu.memory_space<vmem>>, vector<64x128xbf16>
    %cst_8 = arith.constant dense<0.000000e+00> : vector<64x128xf32>
    %12 = tpu.matmul %11, %1, %cst_8 {dimension_numbers = #tpu.dot_dimension_numbers<[1], [0], [0], [1], [0, 0, 1, 1], [], []>} : vector<64x128xbf16>, vector<128x128xbf16>, vector<64x128xf32> -> vector<64x128xf32>
    %13 = arith.truncf %12 : vector<64x128xf32> to vector<64x128xbf16>
    %14 = tpu.concatenate %4, %7, %10, %13 in 1 : vector<64x128xbf16>, vector<64x128xbf16>, vector<64x128xbf16>, vector<64x128xbf16> -> vector<64x512xbf16>
    %c256 = arith.constant 256 : index
    %c0_9 = arith.constant 0 : index
    %15 = vector.load %arg2[%c256, %c0_9] : memref<6720x128xbf16, #tpu.memory_space<vmem>>, vector<512x128xbf16>
    %c0_10 = arith.constant 0 : index
    %c0_11 = arith.constant 0 : index
    %16 = vector.load %arg3[%c0_10, %c0_11] : memref<80x128xf32, #tpu.memory_space<vmem>>, vector<1x128xf32>
    %cst_12 = arith.constant dense<0.000000e+00> : vector<64x128xf32>
    %17 = tpu.matmul %14, %15, %cst_12 {dimension_numbers = #tpu.dot_dimension_numbers<[1], [0], [0], [1], [0, 0, 1, 1], [], []>} : vector<64x512xbf16>, vector<512x128xbf16>, vector<64x128xf32> -> vector<64x128xf32>
    %18 = vector.broadcast %16 : vector<1x128xf32> to vector<64x128xf32>
    %19 = arith.addf %18, %17 : vector<64x128xf32>
    %cst_13 = arith.constant 2.000000e-01 : f32
    %20 = vector.broadcast %cst_13 : f32 to vector<64x128xf32>
    %21 = arith.mulf %20, %19 : vector<64x128xf32>
    %22 = arith.maximumf %19, %21 : vector<64x128xf32>
    %23 = arith.truncf %22 : vector<64x128xf32> to vector<64x128xbf16>
    %c768 = arith.constant 768 : index
    %c0_14 = arith.constant 0 : index
    %24 = vector.load %arg2[%c768, %c0_14] : memref<6720x128xbf16, #tpu.memory_space<vmem>>, vector<32x64xbf16>
    %cst_15 = arith.constant dense<0.000000e+00> : vector<32x128xf32>
    %25 = tpu.matmul %24, %23, %cst_15 {dimension_numbers = #tpu.dot_dimension_numbers<[1], [0], [0], [1], [0, 0, 1, 1], [], []>} : vector<32x64xbf16>, vector<64x128xbf16>, vector<32x128xf32> -> vector<32x128xf32>
    %26 = arith.truncf %25 : vector<32x128xf32> to vector<32x128xbf16>
    %c800 = arith.constant 800 : index
    %c0_16 = arith.constant 0 : index
    %27 = vector.load %arg2[%c800, %c0_16] : memref<6720x128xbf16, #tpu.memory_space<vmem>>, vector<32x64xbf16>
    %cst_17 = arith.constant dense<0.000000e+00> : vector<32x128xf32>
    %28 = tpu.matmul %27, %23, %cst_17 {dimension_numbers = #tpu.dot_dimension_numbers<[1], [0], [0], [1], [0, 0, 1, 1], [], []>} : vector<32x64xbf16>, vector<64x128xbf16>, vector<32x128xf32> -> vector<32x128xf32>
    %29 = arith.truncf %28 : vector<32x128xf32> to vector<32x128xbf16>
    %c832 = arith.constant 832 : index
    %c0_18 = arith.constant 0 : index
    %30 = vector.load %arg2[%c832, %c0_18] : memref<6720x128xbf16, #tpu.memory_space<vmem>>, vector<32x64xbf16>
    %cst_19 = arith.constant dense<0.000000e+00> : vector<32x128xf32>
    %31 = tpu.matmul %30, %23, %cst_19 {dimension_numbers = #tpu.dot_dimension_numbers<[1], [0], [0], [1], [0, 0, 1, 1], [], []>} : vector<32x64xbf16>, vector<64x128xbf16>, vector<32x128xf32> -> vector<32x128xf32>
    %32 = arith.truncf %31 : vector<32x128xf32> to vector<32x128xbf16>
    %c864 = arith.constant 864 : index
    %c0_20 = arith.constant 0 : index
    %33 = vector.load %arg2[%c864, %c0_20] : memref<6720x128xbf16, #tpu.memory_space<vmem>>, vector<32x64xbf16>
    %cst_21 = arith.constant dense<0.000000e+00> : vector<32x128xf32>
    %34 = tpu.matmul %33, %23, %cst_21 {dimension_numbers = #tpu.dot_dimension_numbers<[1], [0], [0], [1], [0, 0, 1, 1], [], []>} : vector<32x64xbf16>, vector<64x128xbf16>, vector<32x128xf32> -> vector<32x128xf32>
    %35 = arith.truncf %34 : vector<32x128xf32> to vector<32x128xbf16>
    %36 = tpu.concatenate %26, %29, %32, %35 in 1 : vector<32x128xbf16>, vector<32x128xbf16>, vector<32x128xbf16>, vector<32x128xbf16> -> vector<32x512xbf16>
    %c896 = arith.constant 896 : index
    %c0_22 = arith.constant 0 : index
    %37 = vector.load %arg2[%c896, %c0_22] : memref<6720x128xbf16, #tpu.memory_space<vmem>>, vector<512x128xbf16>
    %c8 = arith.constant 8 : index
    %c0_23 = arith.constant 0 : index
    %38 = vector.load %arg3[%c8, %c0_23] : memref<80x128xf32, #tpu.memory_space<vmem>>, vector<1x128xf32>
    %cst_24 = arith.constant dense<0.000000e+00> : vector<32x128xf32>
    %39 = tpu.matmul %36, %37, %cst_24 {dimension_numbers = #tpu.dot_dimension_numbers<[1], [0], [0], [1], [0, 0, 1, 1], [], []>} : vector<32x512xbf16>, vector<512x128xbf16>, vector<32x128xf32> -> vector<32x128xf32>
    %40 = vector.broadcast %38 : vector<1x128xf32> to vector<32x128xf32>
    %41 = arith.addf %40, %39 : vector<32x128xf32>
    %cst_25 = arith.constant 2.000000e-01 : f32
    %42 = vector.broadcast %cst_25 : f32 to vector<32x128xf32>
    %43 = arith.mulf %42, %41 : vector<32x128xf32>
    %44 = arith.maximumf %41, %43 : vector<32x128xf32>
    %45 = arith.truncf %44 : vector<32x128xf32> to vector<32x128xbf16>
    %c1408 = arith.constant 1408 : index
    %c0_26 = arith.constant 0 : index
    %46 = vector.load %arg2[%c1408, %c0_26] : memref<6720x128xbf16, #tpu.memory_space<vmem>>, vector<16x32xbf16>
    %cst_27 = arith.constant dense<0.000000e+00> : vector<16x128xf32>
    %47 = tpu.matmul %46, %45, %cst_27 {dimension_numbers = #tpu.dot_dimension_numbers<[1], [0], [0], [1], [0, 0, 1, 1], [], []>} : vector<16x32xbf16>, vector<32x128xbf16>, vector<16x128xf32> -> vector<16x128xf32>
    %48 = arith.truncf %47 : vector<16x128xf32> to vector<16x128xbf16>
    %c1424 = arith.constant 1424 : index
    %c0_28 = arith.constant 0 : index
    %49 = vector.load %arg2[%c1424, %c0_28] : memref<6720x128xbf16, #tpu.memory_space<vmem>>, vector<16x32xbf16>
    %cst_29 = arith.constant dense<0.000000e+00> : vector<16x128xf32>
    %50 = tpu.matmul %49, %45, %cst_29 {dimension_numbers = #tpu.dot_dimension_numbers<[1], [0], [0], [1], [0, 0, 1, 1], [], []>} : vector<16x32xbf16>, vector<32x128xbf16>, vector<16x128xf32> -> vector<16x128xf32>
    %51 = arith.truncf %50 : vector<16x128xf32> to vector<16x128xbf16>
    %c1440 = arith.constant 1440 : index
    %c0_30 = arith.constant 0 : index
    %52 = vector.load %arg2[%c1440, %c0_30] : memref<6720x128xbf16, #tpu.memory_space<vmem>>, vector<16x32xbf16>
    %cst_31 = arith.constant dense<0.000000e+00> : vector<16x128xf32>
    %53 = tpu.matmul %52, %45, %cst_31 {dimension_numbers = #tpu.dot_dimension_numbers<[1], [0], [0], [1], [0, 0, 1, 1], [], []>} : vector<16x32xbf16>, vector<32x128xbf16>, vector<16x128xf32> -> vector<16x128xf32>
    %54 = arith.truncf %53 : vector<16x128xf32> to vector<16x128xbf16>
    %c1456 = arith.constant 1456 : index
    %c0_32 = arith.constant 0 : index
    %55 = vector.load %arg2[%c1456, %c0_32] : memref<6720x128xbf16, #tpu.memory_space<vmem>>, vector<16x32xbf16>
    %cst_33 = arith.constant dense<0.000000e+00> : vector<16x128xf32>
    %56 = tpu.matmul %55, %45, %cst_33 {dimension_numbers = #tpu.dot_dimension_numbers<[1], [0], [0], [1], [0, 0, 1, 1], [], []>} : vector<16x32xbf16>, vector<32x128xbf16>, vector<16x128xf32> -> vector<16x128xf32>
    %57 = arith.truncf %56 : vector<16x128xf32> to vector<16x128xbf16>
    %58 = tpu.concatenate %48, %51, %54, %57 in 1 : vector<16x128xbf16>, vector<16x128xbf16>, vector<16x128xbf16>, vector<16x128xbf16> -> vector<16x512xbf16>
    %c1472 = arith.constant 1472 : index
    %c0_34 = arith.constant 0 : index
    %59 = vector.load %arg2[%c1472, %c0_34] : memref<6720x128xbf16, #tpu.memory_space<vmem>>, vector<512x128xbf16>
    %c16 = arith.constant 16 : index
    %c0_35 = arith.constant 0 : index
    %60 = vector.load %arg3[%c16, %c0_35] : memref<80x128xf32, #tpu.memory_space<vmem>>, vector<1x128xf32>
    %cst_36 = arith.constant dense<0.000000e+00> : vector<16x128xf32>
    %61 = tpu.matmul %58, %59, %cst_36 {dimension_numbers = #tpu.dot_dimension_numbers<[1], [0], [0], [1], [0, 0, 1, 1], [], []>} : vector<16x512xbf16>, vector<512x128xbf16>, vector<16x128xf32> -> vector<16x128xf32>
    %62 = vector.broadcast %60 : vector<1x128xf32> to vector<16x128xf32>
    %63 = arith.addf %62, %61 : vector<16x128xf32>
    %cst_37 = arith.constant 2.000000e-01 : f32
    %64 = vector.broadcast %cst_37 : f32 to vector<16x128xf32>
    %65 = arith.mulf %64, %63 : vector<16x128xf32>
    %66 = arith.maximumf %63, %65 : vector<16x128xf32>
    %67 = arith.truncf %66 : vector<16x128xf32> to vector<16x128xbf16>
    %c1984 = arith.constant 1984 : index
    %c0_38 = arith.constant 0 : index
    %68 = vector.load %arg2[%c1984, %c0_38] : memref<6720x128xbf16, #tpu.memory_space<vmem>>, vector<8x16xbf16>
    %cst_39 = arith.constant dense<0.000000e+00> : vector<8x128xf32>
    %69 = tpu.matmul %68, %67, %cst_39 {dimension_numbers = #tpu.dot_dimension_numbers<[1], [0], [0], [1], [0, 0, 1, 1], [], []>} : vector<8x16xbf16>, vector<16x128xbf16>, vector<8x128xf32> -> vector<8x128xf32>
    %70 = arith.truncf %69 : vector<8x128xf32> to vector<8x128xbf16>
    %c2000 = arith.constant 2000 : index
    %c0_40 = arith.constant 0 : index
    %71 = vector.load %arg2[%c2000, %c0_40] : memref<6720x128xbf16, #tpu.memory_space<vmem>>, vector<8x16xbf16>
    %cst_41 = arith.constant dense<0.000000e+00> : vector<8x128xf32>
    %72 = tpu.matmul %71, %67, %cst_41 {dimension_numbers = #tpu.dot_dimension_numbers<[1], [0], [0], [1], [0, 0, 1, 1], [], []>} : vector<8x16xbf16>, vector<16x128xbf16>, vector<8x128xf32> -> vector<8x128xf32>
    %73 = arith.truncf %72 : vector<8x128xf32> to vector<8x128xbf16>
    %c2016 = arith.constant 2016 : index
    %c0_42 = arith.constant 0 : index
    %74 = vector.load %arg2[%c2016, %c0_42] : memref<6720x128xbf16, #tpu.memory_space<vmem>>, vector<8x16xbf16>
    %cst_43 = arith.constant dense<0.000000e+00> : vector<8x128xf32>
    %75 = tpu.matmul %74, %67, %cst_43 {dimension_numbers = #tpu.dot_dimension_numbers<[1], [0], [0], [1], [0, 0, 1, 1], [], []>} : vector<8x16xbf16>, vector<16x128xbf16>, vector<8x128xf32> -> vector<8x128xf32>
    %76 = arith.truncf %75 : vector<8x128xf32> to vector<8x128xbf16>
    %c2032 = arith.constant 2032 : index
    %c0_44 = arith.constant 0 : index
    %77 = vector.load %arg2[%c2032, %c0_44] : memref<6720x128xbf16, #tpu.memory_space<vmem>>, vector<8x16xbf16>
    %cst_45 = arith.constant dense<0.000000e+00> : vector<8x128xf32>
    %78 = tpu.matmul %77, %67, %cst_45 {dimension_numbers = #tpu.dot_dimension_numbers<[1], [0], [0], [1], [0, 0, 1, 1], [], []>} : vector<8x16xbf16>, vector<16x128xbf16>, vector<8x128xf32> -> vector<8x128xf32>
    %79 = arith.truncf %78 : vector<8x128xf32> to vector<8x128xbf16>
    %80 = tpu.concatenate %70, %73, %76, %79 in 1 : vector<8x128xbf16>, vector<8x128xbf16>, vector<8x128xbf16>, vector<8x128xbf16> -> vector<8x512xbf16>
    %c2048 = arith.constant 2048 : index
    %c0_46 = arith.constant 0 : index
    %81 = vector.load %arg2[%c2048, %c0_46] : memref<6720x128xbf16, #tpu.memory_space<vmem>>, vector<512x128xbf16>
    %c24 = arith.constant 24 : index
    %c0_47 = arith.constant 0 : index
    %82 = vector.load %arg3[%c24, %c0_47] : memref<80x128xf32, #tpu.memory_space<vmem>>, vector<1x128xf32>
    %cst_48 = arith.constant dense<0.000000e+00> : vector<8x128xf32>
    %83 = tpu.matmul %80, %81, %cst_48 {dimension_numbers = #tpu.dot_dimension_numbers<[1], [0], [0], [1], [0, 0, 1, 1], [], []>} : vector<8x512xbf16>, vector<512x128xbf16>, vector<8x128xf32> -> vector<8x128xf32>
    %84 = vector.broadcast %82 : vector<1x128xf32> to vector<8x128xf32>
    %85 = arith.addf %84, %83 : vector<8x128xf32>
    %cst_49 = arith.constant 2.000000e-01 : f32
    %86 = vector.broadcast %cst_49 : f32 to vector<8x128xf32>
    %87 = arith.mulf %86, %85 : vector<8x128xf32>
    %88 = arith.maximumf %85, %87 : vector<8x128xf32>
    %89 = arith.truncf %88 : vector<8x128xf32> to vector<8x128xbf16>
    %c2560 = arith.constant 2560 : index
    %c0_50 = arith.constant 0 : index
    %90 = vector.load %arg2[%c2560, %c0_50] : memref<6720x128xbf16, #tpu.memory_space<vmem>>, vector<2x8xbf16>
    %cst_51 = arith.constant dense<0.000000e+00> : vector<2x128xf32>
    %91 = tpu.matmul %90, %89, %cst_51 {dimension_numbers = #tpu.dot_dimension_numbers<[1], [0], [0], [1], [0, 0, 1, 1], [], []>} : vector<2x8xbf16>, vector<8x128xbf16>, vector<2x128xf32> -> vector<2x128xf32>
    %92 = arith.truncf %91 : vector<2x128xf32> to vector<2x128xbf16>
    %c2576 = arith.constant 2576 : index
    %c0_52 = arith.constant 0 : index
    %93 = vector.load %arg2[%c2576, %c0_52] : memref<6720x128xbf16, #tpu.memory_space<vmem>>, vector<2x8xbf16>
    %cst_53 = arith.constant dense<0.000000e+00> : vector<2x128xf32>
    %94 = tpu.matmul %93, %89, %cst_53 {dimension_numbers = #tpu.dot_dimension_numbers<[1], [0], [0], [1], [0, 0, 1, 1], [], []>} : vector<2x8xbf16>, vector<8x128xbf16>, vector<2x128xf32> -> vector<2x128xf32>
    %95 = arith.truncf %94 : vector<2x128xf32> to vector<2x128xbf16>
    %c2592 = arith.constant 2592 : index
    %c0_54 = arith.constant 0 : index
    %96 = vector.load %arg2[%c2592, %c0_54] : memref<6720x128xbf16, #tpu.memory_space<vmem>>, vector<2x8xbf16>
    %cst_55 = arith.constant dense<0.000000e+00> : vector<2x128xf32>
    %97 = tpu.matmul %96, %89, %cst_55 {dimension_numbers = #tpu.dot_dimension_numbers<[1], [0], [0], [1], [0, 0, 1, 1], [], []>} : vector<2x8xbf16>, vector<8x128xbf16>, vector<2x128xf32> -> vector<2x128xf32>
    %98 = arith.truncf %97 : vector<2x128xf32> to vector<2x128xbf16>
    %c2608 = arith.constant 2608 : index
    %c0_56 = arith.constant 0 : index
    %99 = vector.load %arg2[%c2608, %c0_56] : memref<6720x128xbf16, #tpu.memory_space<vmem>>, vector<2x8xbf16>
    %cst_57 = arith.constant dense<0.000000e+00> : vector<2x128xf32>
    %100 = tpu.matmul %99, %89, %cst_57 {dimension_numbers = #tpu.dot_dimension_numbers<[1], [0], [0], [1], [0, 0, 1, 1], [], []>} : vector<2x8xbf16>, vector<8x128xbf16>, vector<2x128xf32> -> vector<2x128xf32>
    %101 = arith.truncf %100 : vector<2x128xf32> to vector<2x128xbf16>
    %102 = tpu.concatenate %92, %95, %98, %101 in 1 : vector<2x128xbf16>, vector<2x128xbf16>, vector<2x128xbf16>, vector<2x128xbf16> -> vector<2x512xbf16>
    %c2624 = arith.constant 2624 : index
    %c0_58 = arith.constant 0 : index
    %103 = vector.load %arg2[%c2624, %c0_58] : memref<6720x128xbf16, #tpu.memory_space<vmem>>, vector<512x128xbf16>
    %c32 = arith.constant 32 : index
    %c0_59 = arith.constant 0 : index
    %104 = vector.load %arg3[%c32, %c0_59] : memref<80x128xf32, #tpu.memory_space<vmem>>, vector<1x128xf32>
    %cst_60 = arith.constant dense<0.000000e+00> : vector<2x128xf32>
    %105 = tpu.matmul %102, %103, %cst_60 {dimension_numbers = #tpu.dot_dimension_numbers<[1], [0], [0], [1], [0, 0, 1, 1], [], []>} : vector<2x512xbf16>, vector<512x128xbf16>, vector<2x128xf32> -> vector<2x128xf32>
    %106 = vector.broadcast %104 : vector<1x128xf32> to vector<2x128xf32>
    %107 = arith.addf %106, %105 : vector<2x128xf32>
    %cst_61 = arith.constant 2.000000e-01 : f32
    %108 = vector.broadcast %cst_61 : f32 to vector<2x128xf32>
    %109 = arith.mulf %108, %107 : vector<2x128xf32>
    %110 = arith.maximumf %107, %109 : vector<2x128xf32>
    %111 = arith.truncf %110 : vector<2x128xf32> to vector<2x128xbf16>
    %c3136 = arith.constant 3136 : index
    %c0_62 = arith.constant 0 : index
    %112 = vector.load %arg2[%c3136, %c0_62] : memref<6720x128xbf16, #tpu.memory_space<vmem>>, vector<8x2xbf16>
    %cst_63 = arith.constant dense<0.000000e+00> : vector<8x128xf32>
    %113 = tpu.matmul %112, %111, %cst_63 {dimension_numbers = #tpu.dot_dimension_numbers<[1], [0], [0], [1], [0, 0, 1, 1], [], []>} : vector<8x2xbf16>, vector<2x128xbf16>, vector<8x128xf32> -> vector<8x128xf32>
    %114 = arith.truncf %113 : vector<8x128xf32> to vector<8x128xbf16>
    %c3152 = arith.constant 3152 : index
    %c0_64 = arith.constant 0 : index
    %115 = vector.load %arg2[%c3152, %c0_64] : memref<6720x128xbf16, #tpu.memory_space<vmem>>, vector<8x2xbf16>
    %cst_65 = arith.constant dense<0.000000e+00> : vector<8x128xf32>
    %116 = tpu.matmul %115, %111, %cst_65 {dimension_numbers = #tpu.dot_dimension_numbers<[1], [0], [0], [1], [0, 0, 1, 1], [], []>} : vector<8x2xbf16>, vector<2x128xbf16>, vector<8x128xf32> -> vector<8x128xf32>
    %117 = arith.truncf %116 : vector<8x128xf32> to vector<8x128xbf16>
    %c3168 = arith.constant 3168 : index
    %c0_66 = arith.constant 0 : index
    %118 = vector.load %arg2[%c3168, %c0_66] : memref<6720x128xbf16, #tpu.memory_space<vmem>>, vector<8x2xbf16>
    %cst_67 = arith.constant dense<0.000000e+00> : vector<8x128xf32>
    %119 = tpu.matmul %118, %111, %cst_67 {dimension_numbers = #tpu.dot_dimension_numbers<[1], [0], [0], [1], [0, 0, 1, 1], [], []>} : vector<8x2xbf16>, vector<2x128xbf16>, vector<8x128xf32> -> vector<8x128xf32>
    %120 = arith.truncf %119 : vector<8x128xf32> to vector<8x128xbf16>
    %c3184 = arith.constant 3184 : index
    %c0_68 = arith.constant 0 : index
    %121 = vector.load %arg2[%c3184, %c0_68] : memref<6720x128xbf16, #tpu.memory_space<vmem>>, vector<8x2xbf16>
    %cst_69 = arith.constant dense<0.000000e+00> : vector<8x128xf32>
    %122 = tpu.matmul %121, %111, %cst_69 {dimension_numbers = #tpu.dot_dimension_numbers<[1], [0], [0], [1], [0, 0, 1, 1], [], []>} : vector<8x2xbf16>, vector<2x128xbf16>, vector<8x128xf32> -> vector<8x128xf32>
    %123 = arith.truncf %122 : vector<8x128xf32> to vector<8x128xbf16>
    %124 = tpu.concatenate %114, %117, %120, %123 in 1 : vector<8x128xbf16>, vector<8x128xbf16>, vector<8x128xbf16>, vector<8x128xbf16> -> vector<8x512xbf16>
    %c3200 = arith.constant 3200 : index
    %c0_70 = arith.constant 0 : index
    %125 = vector.load %arg2[%c3200, %c0_70] : memref<6720x128xbf16, #tpu.memory_space<vmem>>, vector<512x128xbf16>
    %c40 = arith.constant 40 : index
    %c0_71 = arith.constant 0 : index
    %126 = vector.load %arg3[%c40, %c0_71] : memref<80x128xf32, #tpu.memory_space<vmem>>, vector<1x128xf32>
    %cst_72 = arith.constant dense<0.000000e+00> : vector<8x128xf32>
    %127 = tpu.matmul %124, %125, %cst_72 {dimension_numbers = #tpu.dot_dimension_numbers<[1], [0], [0], [1], [0, 0, 1, 1], [], []>} : vector<8x512xbf16>, vector<512x128xbf16>, vector<8x128xf32> -> vector<8x128xf32>
    %128 = vector.broadcast %126 : vector<1x128xf32> to vector<8x128xf32>
    %129 = arith.addf %128, %127 : vector<8x128xf32>
    %cst_73 = arith.constant 2.000000e-01 : f32
    %130 = vector.broadcast %cst_73 : f32 to vector<8x128xf32>
    %131 = arith.mulf %130, %129 : vector<8x128xf32>
    %132 = arith.maximumf %129, %131 : vector<8x128xf32>
    %133 = arith.truncf %132 : vector<8x128xf32> to vector<8x128xbf16>
    %c3712 = arith.constant 3712 : index
    %c0_74 = arith.constant 0 : index
    %134 = vector.load %arg2[%c3712, %c0_74] : memref<6720x128xbf16, #tpu.memory_space<vmem>>, vector<16x8xbf16>
    %cst_75 = arith.constant dense<0.000000e+00> : vector<16x128xf32>
    %135 = tpu.matmul %134, %133, %cst_75 {dimension_numbers = #tpu.dot_dimension_numbers<[1], [0], [0], [1], [0, 0, 1, 1], [], []>} : vector<16x8xbf16>, vector<8x128xbf16>, vector<16x128xf32> -> vector<16x128xf32>
    %136 = arith.truncf %135 : vector<16x128xf32> to vector<16x128xbf16>
    %c3728 = arith.constant 3728 : index
    %c0_76 = arith.constant 0 : index
    %137 = vector.load %arg2[%c3728, %c0_76] : memref<6720x128xbf16, #tpu.memory_space<vmem>>, vector<16x8xbf16>
    %cst_77 = arith.constant dense<0.000000e+00> : vector<16x128xf32>
    %138 = tpu.matmul %137, %133, %cst_77 {dimension_numbers = #tpu.dot_dimension_numbers<[1], [0], [0], [1], [0, 0, 1, 1], [], []>} : vector<16x8xbf16>, vector<8x128xbf16>, vector<16x128xf32> -> vector<16x128xf32>
    %139 = arith.truncf %138 : vector<16x128xf32> to vector<16x128xbf16>
    %c3744 = arith.constant 3744 : index
    %c0_78 = arith.constant 0 : index
    %140 = vector.load %arg2[%c3744, %c0_78] : memref<6720x128xbf16, #tpu.memory_space<vmem>>, vector<16x8xbf16>
    %cst_79 = arith.constant dense<0.000000e+00> : vector<16x128xf32>
    %141 = tpu.matmul %140, %133, %cst_79 {dimension_numbers = #tpu.dot_dimension_numbers<[1], [0], [0], [1], [0, 0, 1, 1], [], []>} : vector<16x8xbf16>, vector<8x128xbf16>, vector<16x128xf32> -> vector<16x128xf32>
    %142 = arith.truncf %141 : vector<16x128xf32> to vector<16x128xbf16>
    %c3760 = arith.constant 3760 : index
    %c0_80 = arith.constant 0 : index
    %143 = vector.load %arg2[%c3760, %c0_80] : memref<6720x128xbf16, #tpu.memory_space<vmem>>, vector<16x8xbf16>
    %cst_81 = arith.constant dense<0.000000e+00> : vector<16x128xf32>
    %144 = tpu.matmul %143, %133, %cst_81 {dimension_numbers = #tpu.dot_dimension_numbers<[1], [0], [0], [1], [0, 0, 1, 1], [], []>} : vector<16x8xbf16>, vector<8x128xbf16>, vector<16x128xf32> -> vector<16x128xf32>
    %145 = arith.truncf %144 : vector<16x128xf32> to vector<16x128xbf16>
    %146 = tpu.concatenate %136, %139, %142, %145 in 1 : vector<16x128xbf16>, vector<16x128xbf16>, vector<16x128xbf16>, vector<16x128xbf16> -> vector<16x512xbf16>
    %c3776 = arith.constant 3776 : index
    %c0_82 = arith.constant 0 : index
    %147 = vector.load %arg2[%c3776, %c0_82] : memref<6720x128xbf16, #tpu.memory_space<vmem>>, vector<512x128xbf16>
    %c48 = arith.constant 48 : index
    %c0_83 = arith.constant 0 : index
    %148 = vector.load %arg3[%c48, %c0_83] : memref<80x128xf32, #tpu.memory_space<vmem>>, vector<1x128xf32>
    %cst_84 = arith.constant dense<0.000000e+00> : vector<16x128xf32>
    %149 = tpu.matmul %146, %147, %cst_84 {dimension_numbers = #tpu.dot_dimension_numbers<[1], [0], [0], [1], [0, 0, 1, 1], [], []>} : vector<16x512xbf16>, vector<512x128xbf16>, vector<16x128xf32> -> vector<16x128xf32>
    %150 = vector.broadcast %148 : vector<1x128xf32> to vector<16x128xf32>
    %151 = arith.addf %150, %149 : vector<16x128xf32>
    %cst_85 = arith.constant 2.000000e-01 : f32
    %152 = vector.broadcast %cst_85 : f32 to vector<16x128xf32>
    %153 = arith.mulf %152, %151 : vector<16x128xf32>
    %154 = arith.maximumf %151, %153 : vector<16x128xf32>
    %155 = arith.truncf %154 : vector<16x128xf32> to vector<16x128xbf16>
    %c4288 = arith.constant 4288 : index
    %c0_86 = arith.constant 0 : index
    %156 = vector.load %arg2[%c4288, %c0_86] : memref<6720x128xbf16, #tpu.memory_space<vmem>>, vector<32x16xbf16>
    %cst_87 = arith.constant dense<0.000000e+00> : vector<32x128xf32>
    %157 = tpu.matmul %156, %155, %cst_87 {dimension_numbers = #tpu.dot_dimension_numbers<[1], [0], [0], [1], [0, 0, 1, 1], [], []>} : vector<32x16xbf16>, vector<16x128xbf16>, vector<32x128xf32> -> vector<32x128xf32>
    %158 = arith.truncf %157 : vector<32x128xf32> to vector<32x128xbf16>
    %c4320 = arith.constant 4320 : index
    %c0_88 = arith.constant 0 : index
    %159 = vector.load %arg2[%c4320, %c0_88] : memref<6720x128xbf16, #tpu.memory_space<vmem>>, vector<32x16xbf16>
    %cst_89 = arith.constant dense<0.000000e+00> : vector<32x128xf32>
    %160 = tpu.matmul %159, %155, %cst_89 {dimension_numbers = #tpu.dot_dimension_numbers<[1], [0], [0], [1], [0, 0, 1, 1], [], []>} : vector<32x16xbf16>, vector<16x128xbf16>, vector<32x128xf32> -> vector<32x128xf32>
    %161 = arith.truncf %160 : vector<32x128xf32> to vector<32x128xbf16>
    %c4352 = arith.constant 4352 : index
    %c0_90 = arith.constant 0 : index
    %162 = vector.load %arg2[%c4352, %c0_90] : memref<6720x128xbf16, #tpu.memory_space<vmem>>, vector<32x16xbf16>
    %cst_91 = arith.constant dense<0.000000e+00> : vector<32x128xf32>
    %163 = tpu.matmul %162, %155, %cst_91 {dimension_numbers = #tpu.dot_dimension_numbers<[1], [0], [0], [1], [0, 0, 1, 1], [], []>} : vector<32x16xbf16>, vector<16x128xbf16>, vector<32x128xf32> -> vector<32x128xf32>
    %164 = arith.truncf %163 : vector<32x128xf32> to vector<32x128xbf16>
    %c4384 = arith.constant 4384 : index
    %c0_92 = arith.constant 0 : index
    %165 = vector.load %arg2[%c4384, %c0_92] : memref<6720x128xbf16, #tpu.memory_space<vmem>>, vector<32x16xbf16>
    %cst_93 = arith.constant dense<0.000000e+00> : vector<32x128xf32>
    %166 = tpu.matmul %165, %155, %cst_93 {dimension_numbers = #tpu.dot_dimension_numbers<[1], [0], [0], [1], [0, 0, 1, 1], [], []>} : vector<32x16xbf16>, vector<16x128xbf16>, vector<32x128xf32> -> vector<32x128xf32>
    %167 = arith.truncf %166 : vector<32x128xf32> to vector<32x128xbf16>
    %168 = tpu.concatenate %158, %161, %164, %167 in 1 : vector<32x128xbf16>, vector<32x128xbf16>, vector<32x128xbf16>, vector<32x128xbf16> -> vector<32x512xbf16>
    %c4416 = arith.constant 4416 : index
    %c0_94 = arith.constant 0 : index
    %169 = vector.load %arg2[%c4416, %c0_94] : memref<6720x128xbf16, #tpu.memory_space<vmem>>, vector<512x128xbf16>
    %c56 = arith.constant 56 : index
    %c0_95 = arith.constant 0 : index
    %170 = vector.load %arg3[%c56, %c0_95] : memref<80x128xf32, #tpu.memory_space<vmem>>, vector<1x128xf32>
    %cst_96 = arith.constant dense<0.000000e+00> : vector<32x128xf32>
    %171 = tpu.matmul %168, %169, %cst_96 {dimension_numbers = #tpu.dot_dimension_numbers<[1], [0], [0], [1], [0, 0, 1, 1], [], []>} : vector<32x512xbf16>, vector<512x128xbf16>, vector<32x128xf32> -> vector<32x128xf32>
    %172 = vector.broadcast %170 : vector<1x128xf32> to vector<32x128xf32>
    %173 = arith.addf %172, %171 : vector<32x128xf32>
    %cst_97 = arith.constant 2.000000e-01 : f32
    %174 = vector.broadcast %cst_97 : f32 to vector<32x128xf32>
    %175 = arith.mulf %174, %173 : vector<32x128xf32>
    %176 = arith.maximumf %173, %175 : vector<32x128xf32>
    %177 = arith.truncf %176 : vector<32x128xf32> to vector<32x128xbf16>
    %c4928 = arith.constant 4928 : index
    %c0_98 = arith.constant 0 : index
    %178 = vector.load %arg2[%c4928, %c0_98] : memref<6720x128xbf16, #tpu.memory_space<vmem>>, vector<64x32xbf16>
    %cst_99 = arith.constant dense<0.000000e+00> : vector<64x128xf32>
    %179 = tpu.matmul %178, %177, %cst_99 {dimension_numbers = #tpu.dot_dimension_numbers<[1], [0], [0], [1], [0, 0, 1, 1], [], []>} : vector<64x32xbf16>, vector<32x128xbf16>, vector<64x128xf32> -> vector<64x128xf32>
    %180 = arith.truncf %179 : vector<64x128xf32> to vector<64x128xbf16>
    %c4992 = arith.constant 4992 : index
    %c0_100 = arith.constant 0 : index
    %181 = vector.load %arg2[%c4992, %c0_100] : memref<6720x128xbf16, #tpu.memory_space<vmem>>, vector<64x32xbf16>
    %cst_101 = arith.constant dense<0.000000e+00> : vector<64x128xf32>
    %182 = tpu.matmul %181, %177, %cst_101 {dimension_numbers = #tpu.dot_dimension_numbers<[1], [0], [0], [1], [0, 0, 1, 1], [], []>} : vector<64x32xbf16>, vector<32x128xbf16>, vector<64x128xf32> -> vector<64x128xf32>
    %183 = arith.truncf %182 : vector<64x128xf32> to vector<64x128xbf16>
    %c5056 = arith.constant 5056 : index
    %c0_102 = arith.constant 0 : index
    %184 = vector.load %arg2[%c5056, %c0_102] : memref<6720x128xbf16, #tpu.memory_space<vmem>>, vector<64x32xbf16>
    %cst_103 = arith.constant dense<0.000000e+00> : vector<64x128xf32>
    %185 = tpu.matmul %184, %177, %cst_103 {dimension_numbers = #tpu.dot_dimension_numbers<[1], [0], [0], [1], [0, 0, 1, 1], [], []>} : vector<64x32xbf16>, vector<32x128xbf16>, vector<64x128xf32> -> vector<64x128xf32>
    %186 = arith.truncf %185 : vector<64x128xf32> to vector<64x128xbf16>
    %c5120 = arith.constant 5120 : index
    %c0_104 = arith.constant 0 : index
    %187 = vector.load %arg2[%c5120, %c0_104] : memref<6720x128xbf16, #tpu.memory_space<vmem>>, vector<64x32xbf16>
    %cst_105 = arith.constant dense<0.000000e+00> : vector<64x128xf32>
    %188 = tpu.matmul %187, %177, %cst_105 {dimension_numbers = #tpu.dot_dimension_numbers<[1], [0], [0], [1], [0, 0, 1, 1], [], []>} : vector<64x32xbf16>, vector<32x128xbf16>, vector<64x128xf32> -> vector<64x128xf32>
    %189 = arith.truncf %188 : vector<64x128xf32> to vector<64x128xbf16>
    %190 = tpu.concatenate %180, %183, %186, %189 in 1 : vector<64x128xbf16>, vector<64x128xbf16>, vector<64x128xbf16>, vector<64x128xbf16> -> vector<64x512xbf16>
    %c5184 = arith.constant 5184 : index
    %c0_106 = arith.constant 0 : index
    %191 = vector.load %arg2[%c5184, %c0_106] : memref<6720x128xbf16, #tpu.memory_space<vmem>>, vector<512x128xbf16>
    %c64_107 = arith.constant 64 : index
    %c0_108 = arith.constant 0 : index
    %192 = vector.load %arg3[%c64_107, %c0_108] : memref<80x128xf32, #tpu.memory_space<vmem>>, vector<1x128xf32>
    %cst_109 = arith.constant dense<0.000000e+00> : vector<64x128xf32>
    %193 = tpu.matmul %190, %191, %cst_109 {dimension_numbers = #tpu.dot_dimension_numbers<[1], [0], [0], [1], [0, 0, 1, 1], [], []>} : vector<64x512xbf16>, vector<512x128xbf16>, vector<64x128xf32> -> vector<64x128xf32>
    %194 = vector.broadcast %192 : vector<1x128xf32> to vector<64x128xf32>
    %195 = arith.addf %194, %193 : vector<64x128xf32>
    %cst_110 = arith.constant 2.000000e-01 : f32
    %196 = vector.broadcast %cst_110 : f32 to vector<64x128xf32>
    %197 = arith.mulf %196, %195 : vector<64x128xf32>
    %198 = arith.maximumf %195, %197 : vector<64x128xf32>
    %199 = arith.truncf %198 : vector<64x128xf32> to vector<64x128xbf16>
    %c5696 = arith.constant 5696 : index
    %c0_111 = arith.constant 0 : index
    %200 = vector.load %arg2[%c5696, %c0_111] : memref<6720x128xbf16, #tpu.memory_space<vmem>>, vector<128x64xbf16>
    %cst_112 = arith.constant dense<0.000000e+00> : vector<128x128xf32>
    %201 = tpu.matmul %200, %199, %cst_112 {dimension_numbers = #tpu.dot_dimension_numbers<[1], [0], [0], [1], [0, 0, 1, 1], [], []>} : vector<128x64xbf16>, vector<64x128xbf16>, vector<128x128xf32> -> vector<128x128xf32>
    %202 = arith.truncf %201 : vector<128x128xf32> to vector<128x128xbf16>
    %c5824 = arith.constant 5824 : index
    %c0_113 = arith.constant 0 : index
    %203 = vector.load %arg2[%c5824, %c0_113] : memref<6720x128xbf16, #tpu.memory_space<vmem>>, vector<128x64xbf16>
    %cst_114 = arith.constant dense<0.000000e+00> : vector<128x128xf32>
    %204 = tpu.matmul %203, %199, %cst_114 {dimension_numbers = #tpu.dot_dimension_numbers<[1], [0], [0], [1], [0, 0, 1, 1], [], []>} : vector<128x64xbf16>, vector<64x128xbf16>, vector<128x128xf32> -> vector<128x128xf32>
    %205 = arith.truncf %204 : vector<128x128xf32> to vector<128x128xbf16>
    %c5952 = arith.constant 5952 : index
    %c0_115 = arith.constant 0 : index
    %206 = vector.load %arg2[%c5952, %c0_115] : memref<6720x128xbf16, #tpu.memory_space<vmem>>, vector<128x64xbf16>
    %cst_116 = arith.constant dense<0.000000e+00> : vector<128x128xf32>
    %207 = tpu.matmul %206, %199, %cst_116 {dimension_numbers = #tpu.dot_dimension_numbers<[1], [0], [0], [1], [0, 0, 1, 1], [], []>} : vector<128x64xbf16>, vector<64x128xbf16>, vector<128x128xf32> -> vector<128x128xf32>
    %208 = arith.truncf %207 : vector<128x128xf32> to vector<128x128xbf16>
    %c6080 = arith.constant 6080 : index
    %c0_117 = arith.constant 0 : index
    %209 = vector.load %arg2[%c6080, %c0_117] : memref<6720x128xbf16, #tpu.memory_space<vmem>>, vector<128x64xbf16>
    %cst_118 = arith.constant dense<0.000000e+00> : vector<128x128xf32>
    %210 = tpu.matmul %209, %199, %cst_118 {dimension_numbers = #tpu.dot_dimension_numbers<[1], [0], [0], [1], [0, 0, 1, 1], [], []>} : vector<128x64xbf16>, vector<64x128xbf16>, vector<128x128xf32> -> vector<128x128xf32>
    %211 = arith.truncf %210 : vector<128x128xf32> to vector<128x128xbf16>
    %212 = tpu.concatenate %202, %205, %208, %211 in 1 : vector<128x128xbf16>, vector<128x128xbf16>, vector<128x128xbf16>, vector<128x128xbf16> -> vector<128x512xbf16>
    %c6208 = arith.constant 6208 : index
    %c0_119 = arith.constant 0 : index
    %213 = vector.load %arg2[%c6208, %c0_119] : memref<6720x128xbf16, #tpu.memory_space<vmem>>, vector<512x128xbf16>
    %c72 = arith.constant 72 : index
    %c0_120 = arith.constant 0 : index
    %214 = vector.load %arg3[%c72, %c0_120] : memref<80x128xf32, #tpu.memory_space<vmem>>, vector<1x128xf32>
    %cst_121 = arith.constant dense<0.000000e+00> : vector<128x128xf32>
    %215 = tpu.matmul %212, %213, %cst_121 {dimension_numbers = #tpu.dot_dimension_numbers<[1], [0], [0], [1], [0, 0, 1, 1], [], []>} : vector<128x512xbf16>, vector<512x128xbf16>, vector<128x128xf32> -> vector<128x128xf32>
    %216 = vector.broadcast %214 : vector<1x128xf32> to vector<128x128xf32>
    %217 = arith.addf %216, %215 : vector<128x128xf32>
    %218 = vector.extract_strided_slice %217 {offsets = [0, 0], sizes = [128, 64], strides = [1, 1]} : vector<128x128xf32> to vector<128x64xf32>
    %219 = math.tanh %218 : vector<128x64xf32>
    %c0_122 = arith.constant 0 : index
    %c0_123 = arith.constant 0 : index
    %220 = vector.load %arg4[%c0_122, %c0_123] : memref<128x64xf32, #tpu.memory_space<vmem>>, vector<128x64xf32>
    tpu.vector_store %arg4[%c0_122, %c0_123], %219 {strides = array<i32>} : memref<128x64xf32, #tpu.memory_space<vmem>>, vector<128x64xf32>,
    return
  }
  func.func @transform_0(%arg0: i32) -> (i32, i32) {
    %c0_i32 = arith.constant 0 : i32
    %c0_i32_0 = arith.constant 0 : i32
    %c0_i32_1 = arith.constant 0 : i32
    return %c0_i32, %c0_i32_0 : i32, i32
  }
  func.func @transform_1(%arg0: i32) -> (i32, i32) {
    %c0_i32 = arith.constant 0 : i32
    %c0_i32_0 = arith.constant 0 : i32
    %c0_i32_1 = arith.constant 0 : i32
    return %c0_i32, %c0_i32_0 : i32, i32
  }
  func.func @transform_2(%arg0: i32) -> (i32, i32) {
    %c0_i32 = arith.constant 0 : i32
    %c0_i32_0 = arith.constant 0 : i32
    %c0_i32_1 = arith.constant 0 : i32
    return %c0_i32, %c0_i32_0 : i32, i32
  }
  func.func @transform_3(%arg0: i32) -> (i32, i32) {
    %c0_i32 = arith.constant 0 : i32
    %c0_i32_0 = arith.constant 0 : i32
    %c0_i32_1 = arith.constant 0 : i32
    return %c0_i32, %c0_i32_0 : i32, i32
  }
}

</mosaic_0001>

<bundles_post_ra>
// kernel: forward.1
= control target key start
LH: loop header
LB: loop body
LE: loop exit
PB: predicated region body
PF: predicated region fallthrough
CT: control target
= control target key end

     0   :  { %8 = vsyncpa [#allocation3], 0  ;;  %s9642_s0 = inlined_call_operand.vmem [shape: f32[128,128], index: 0, kind: input, shape index: {}]   ;;  %s9643_s1 = inlined_call_operand.hbm [shape: bf16[6720,128], index: 1, kind: input, shape index: {}]   ;;  %s9644_s2 = inlined_call_operand.hbm [shape: f32[80,128], index: 2, kind: input, shape index: {}]   ;;  %s9645_s3 = inlined_call_operand.hbm [shape: f32[128,64], index: 3, kind: output, shape index: {}]  }
   0x1   :  { %9 = vsyncpa [#allocation6], 0 }
   0x2   :  { %10 = vsyncpa [#allocation4], 0  ;;  %s9305_s12 = smov [#allocation2]  }
   0x3   :  { %s18_s13 = sshll.u32 %s9305_s12, 4  ;;  %s19_s13 = int_to_ptr.vmem [resolvable:$true] %s18_s13 }
   0x4   :  { %s9247_s14 = scalar_lea.vmem %s19_s13, 53760  ;;  %p9252_p1 = scmp.lt.s32.totalorder %s19_s13, %s19_s13 }
   0x5   :  { %p9248_p0 = scmp.ne.s32.totalorder %s19_s13, %s9247_s14  ;;  %p9253_p2 = scmp.lt.s32.totalorder %s9247_s14, %s9247_s14 }
   0x7   :  { %p9254_p3 = por %p9253_p2, %p9252_p1 }
   0x9   :  { %p9255_p4 = pnand %p9254_p3, %p9248_p0 }
   0xb   :  { %9258 = shalt.err (!%p9255_p4)
}
   0xc   :  { %s9306_s15 = smov 64   ;;  %s9307_s16 = smov 4  }
   0xd   :  { %24 = dma.hbm_to_vmem [thread:$0]  %s9643_s1, 53760, %s19_s13, [#allocation3], %s9306_s15, %s9306_s15, %s9307_s16  }
   0xe   :  { %s9308_s19 = smov [#allocation5]  }
   0xf   :  { %s30_s20 = sshll.u32 %s9308_s19, 4  ;;  %s31_s20 = int_to_ptr.vmem [resolvable:$true] %s30_s20 }
  0x10   :  { %s9267_s21 = scalar_lea.vmem %s31_s20, 1280  ;;  %p9272_p6 = scmp.lt.s32.totalorder %s31_s20, %s31_s20 }
  0x11   :  { %p9268_p5 = scmp.ne.s32.totalorder %s31_s20, %s9267_s21  ;;  %p9273_p7 = scmp.lt.s32.totalorder %s9267_s21, %s9267_s21 }
  0x13   :  { %p9274_p8 = por %p9273_p7, %p9272_p6 }
  0x15   :  { %p9275_p9 = pnand %p9274_p8, %p9268_p5 }
  0x17   :  { %9278 = shalt.err (!%p9275_p9)
}
  0x18   :  { %s9309_s22 = smov 128   ;;  %s9310_s23 = smov 8  }
  0x19   :  { %36 = dma.hbm_to_vmem [thread:$0]  %s9644_s2, 1280, %s31_s20, [#allocation6], %s9309_s22, %s9309_s22, %s9310_s23  }
  0x1a   :  { %9299 = dma.done.wait [#allocation3], 53760  }
  0x1b   :  { %9300 = vsyncadd [#allocation3], 4294913536 }
  0x1c   :  { %9301 = dma.done.wait [#allocation6], 1280  }
  0x1d   :  { %9302 = vsyncadd [#allocation6], 4294966016  ;;  %v58_v0 = vld [vmem:[%s9642_s0 + $0x70] sm:$0xff]  ;;  %v59_v1 = vld [vmem:[%s9642_s0 + $0x78] sm:$0xff]  ;;  %vm905_vm0 = vcmask 523264   ;;  %vm9312_vm1 = vmmov 0  }
  0x1e   :  { %v56_v2 = vld [vmem:[%s9642_s0 + $0x60] sm:$0xff]  ;;  %v9352_v3 = vpack.c.bf16 %v59_v1, %v58_v0  ;;  %v57_v4 = vld [vmem:[%s9642_s0 + $0x68] sm:$0xff]  ;;  %v54_v6 = vld [vmem:[%s9642_s0 + $0x50] sm:$0xff]  ;;  %vm1556_vm2 = vcmask 261120   ;;  %vm2109_vm3 = vcmask 130048   ;;  %vm2639_vm4 = vcmask 1043456  }
  0x1f   :  { %v9357_v5 = vpack.c.bf16 %v57_v4, %v56_v2  ;;  %v55_v7 = vld [vmem:[%s9642_s0 + $0x58] sm:$0xff]  ;;  %v52_v8 = vld [vmem:[%s9642_s0 + $0x40] sm:$0xff]  ;;  %v53_v10 = vld [vmem:[%s9642_s0 + $0x48] sm:$0xff]  ;;  %vm2635_vm5 = vcmask 64512   ;;  %vm3169_vm6 = vcmask 1040384   ;;  %vm3165_vm7 = vcmask 15360  }
  0x20   :  { %8350 = vmatprep.subr.bf16.mxu0 %v9352_v3  ;;  %8374 = vmatprep.subr.bf16.mxu1 %v9352_v3  ;;  %v9374_v9 = vpack.c.bf16 %v55_v7, %v54_v6  ;;  %v8799_v11 = vld [vmem:[#allocation2] sm:$0xff]   ;;  %v9383_v13 = vpack.c.bf16 %v53_v10, %v52_v8  ;;  %v50_v14 = vld [vmem:[%s9642_s0 + $0x30] sm:$0xff]  ;;  %v51_v15 = vld [vmem:[%s9642_s0 + $0x38] sm:$0xff] }
  0x21   :  { %8351 = vmatpush3.bf16.msra.mxu0 %v9352_v3  ;;  %8375 = vmatpush3.bf16.msra.mxu1 %v9352_v3  ;;  %v8800_v12 = vld [vmem:[#allocation2 + $0x20] sm:$0xff]   ;;  %v63_v16 = vpack.c.bf16 %v51_v15, %v50_v14  ;;  %v49_v18 = vld [vmem:[%s9642_s0 + $0x28] sm:$0xff]  ;;  %v46_v20 = vld [vmem:[%s9642_s0 + $0x10] sm:$0xff] }
  0x22   :  { %8352 = vmatprep.subr.bf16.mxu0 %v9357_v5  ;;  %8376 = vmatprep.subr.bf16.mxu1 %v9357_v5  ;;  %v48_v17 = vld [vmem:[%s9642_s0 + $0x20] sm:$0xff]  ;;  %v47_v21 = vld [vmem:[%s9642_s0 + $0x18] sm:$0xff]  ;;  %v45_v24 = vld [vmem:[%s9642_s0 + $0x8] sm:$0xff] }
  0x23   :  { %8366 = vmatprep.mubr.bf16.mxu0 %v8799_v11  ;;  %8390 = vmatprep.mubr.bf16.mxu1 %v8800_v12  ;;  %v62_v19 = vpack.c.bf16 %v49_v18, %v48_v17  ;;  %v61_v22 = vpack.c.bf16 %v47_v21, %v46_v20  ;;  %v44_v23 = vld [vmem:[%s9642_s0] sm:$0xff]  ;;  %v8801_v26 = vld [vmem:[#allocation2 + $0x8] sm:$0xff]   ;;  %v8803_v28 = vld [vmem:[#allocation2 + $0x30] sm:$0xff]   ;;  %s9313_s0 = smov [#allocation7]  }
  0x24   :  { %v60_v25 = vpack.c.bf16 %v45_v24, %v44_v23  ;;  %v8802_v27 = vld [vmem:[#allocation2 + $0x28] sm:$0xff]   ;;  %v8804_v29 = vld [vmem:[#allocation2 + $0x10] sm:$0xff]   ;;  %v8805_v30 = vld [vmem:[#allocation2 + $0x38] sm:$0xff]   ;;  %s7015_s30 = sshll.u32 %s9313_s0, 4  ;;  %s7016_s30 = int_to_ptr.vmem [resolvable:$true] %s7015_s30 }
  0x25   :  { %8353 = vmatpush3.bf16.msra.mxu0 %v9357_v5  ;;  %8377 = vmatpush3.bf16.msra.mxu1 %v9357_v5  ;;  %v8806_v31 = vld [vmem:[#allocation2 + $0x18] sm:$0xff]   ;;  %v8807_v32 = vld [vmem:[#allocation2 + $0x40] sm:$0xff]   ;;  %v8809_v35 = vld [vmem:[#allocation2 + $0x48] sm:$0xff]   ;;  %s9279_s4 = scalar_lea.vmem %s7016_s30, 2048  ;;  %p9284_p11 = scmp.lt.s32.totalorder %s7016_s30, %s7016_s30 }
  0x26   :  { %8354 = vmatprep.subr.bf16.mxu0 %v9374_v9  ;;  %8378 = vmatprep.subr.bf16.mxu1 %v9374_v9  ;;  %v8808_v33 = vld [vmem:[#allocation2 + $0x60] sm:$0xff]   ;;  %v8815_v34 = vld [vmem:[#allocation2 + $0xf8] sm:$0xff]   ;;  %v8810_v36 = vld [vmem:[#allocation2 + $0x68] sm:$0xff]   ;;  %p9280_p10 = scmp.ne.s32.totalorder %s7016_s30, %s9279_s4  ;;  %p9285_p12 = scmp.lt.s32.totalorder %s9279_s4, %s9279_s4 }
  0x27   :  { %v8811_v37 = vld [vmem:[#allocation2 + $0x70] sm:$0xff]   ;;  %v8816_v39 = vld [vmem:[#allocation2 + $0xb8] sm:$0xff]   ;;  %v8819_v42 = vld [vmem:[#allocation2 + $0xe8] sm:$0xff]  }
  0x28   :  { %v8812_v38 = vld [vmem:[#allocation2 + $0x50] sm:$0xff]   ;;  %v8813_v43 = vld [vmem:[#allocation2 + $0x78] sm:$0xff]   ;;  %v8820_v45 = vld [vmem:[#allocation2 + $0xa8] sm:$0xff]   ;;  %p9286_p13 = por %p9285_p12, %p9284_p11 }
  0x29   :  { %8355 = vmatpush3.bf16.msra.mxu0 %v9374_v9  ;;  %8379 = vmatpush3.bf16.msra.mxu1 %v9374_v9  ;;  %v8817_v40 = vld [vmem:[#allocation2 + $0xf0] sm:$0xff]   ;;  %v8814_v44 = vld [vmem:[#allocation2 + $0x58] sm:$0xff]   ;;  %v8821_v46 = vld [vmem:[#allocation2 + $0xe0] sm:$0xff]  }
  0x2a   :  { %8356 = vmatprep.subr.bf16.mxu0 %v9383_v13  ;;  %8380 = vmatprep.subr.bf16.mxu1 %v9383_v13  ;;  %v8818_v41 = vld [vmem:[#allocation2 + $0xb0] sm:$0xff]   ;;  %v8822_v47 = vld [vmem:[#allocation2 + $0xa0] sm:$0xff]   ;;  %v8823_v48 = vld [vmem:[#allocation2 + $0xd8] sm:$0xff]   ;;  %p9287_p0 = pnand %p9286_p13, %p9280_p10 }
  0x2b   :  { %v8824_v49 = vld [vmem:[#allocation2 + $0x98] sm:$0xff]   ;;  %v8825_v50 = vld [vmem:[#allocation2 + $0xd0] sm:$0xff]   ;;  %v8827_v52 = vld [vmem:[#allocation2 + $0xc8] sm:$0xff]  }
  0x2c   :  { %v8826_v51 = vld [vmem:[#allocation2 + $0x90] sm:$0xff]   ;;  %v8828_v53 = vld [vmem:[#allocation2 + $0x88] sm:$0xff]   ;;  %v8829_v54 = vld [vmem:[#allocation2 + $0xc0] sm:$0xff]  }
  0x2d   :  { %8357 = vmatpush3.bf16.msra.mxu0 %v9383_v13  ;;  %8381 = vmatpush3.bf16.msra.mxu1 %v9383_v13  ;;  %v8830_v55 = vld [vmem:[#allocation2 + $0x80] sm:$0xff]   ;;  %v8831_v56 = vld [vmem:[#allocation2 + $0x178] sm:$0xff]   ;;  %v8833_v58 = vld [vmem:[#allocation2 + $0x170] sm:$0xff]  }
  0x2e   :  { %8358 = vmatprep.subr.bf16.mxu0 %v63_v16  ;;  %8382 = vmatprep.subr.bf16.mxu1 %v63_v16  ;;  %v8832_v57 = vld [vmem:[#allocation2 + $0x138] sm:$0xff]   ;;  %v8834_v59 = vld [vmem:[#allocation2 + $0x130] sm:$0xff]   ;;  %v8835_v60 = vld [vmem:[#allocation2 + $0x168] sm:$0xff]  }
  0x2f   :  { %v8836_v61 = vld [vmem:[#allocation2 + $0x128] sm:$0xff]   ;;  %v8837_v62 = vld [vmem:[#allocation2 + $0x160] sm:$0xff]   ;;  %v8839_v0 = vld [vmem:[#allocation2 + $0x158] sm:$0xff]  }
  0x30   :  { %v8838_v63 = vld [vmem:[#allocation2 + $0x120] sm:$0xff]   ;;  %v8840_v1 = vld [vmem:[#allocation2 + $0x118] sm:$0xff]   ;;  %v8841_v2 = vld [vmem:[#allocation2 + $0x150] sm:$0xff]  }
  0x31   :  { %8359 = vmatpush3.bf16.msra.mxu0 %v63_v16  ;;  %8383 = vmatpush3.bf16.msra.mxu1 %v63_v16  ;;  %v8843_v4 = vld [vmem:[#allocation2 + $0x148] sm:$0xff]   ;;  %v8845_v6 = vld [vmem:[#allocation2 + $0x140] sm:$0xff]  }
  0x32   :  { %8360 = vmatprep.subr.bf16.mxu0 %v62_v19  ;;  %8384 = vmatprep.subr.bf16.mxu1 %v62_v19  ;;  %v8846_v7 = vld [vmem:[#allocation2 + $0x100] sm:$0xff]  }
  0x35   :  { %8361 = vmatpush3.bf16.msra.mxu0 %v62_v19  ;;  %8385 = vmatpush3.bf16.msra.mxu1 %v62_v19 }
  0x36   :  { %8362 = vmatprep.subr.bf16.mxu0 %v61_v22  ;;  %8386 = vmatprep.subr.bf16.mxu1 %v61_v22 }
  0x39   :  { %8363 = vmatpush3.bf16.msra.mxu0 %v61_v22  ;;  %8387 = vmatpush3.bf16.msra.mxu1 %v61_v22 }
  0x3a   :  { %8364 = vmatprep.subr.bf16.mxu0 %v60_v25  ;;  %8388 = vmatprep.subr.bf16.mxu1 %v60_v25 }
  0x3d   :  { %8365 = vmatpush3.bf16.msra.mxu0 %v60_v25  ;;  %8389 = vmatpush3.bf16.msra.mxu1 %v60_v25 }
  0x3e   :  { %8398 = vmatprep.subr.bf16.mxu0 %v9352_v3  ;;  %8422 = vmatprep.subr.bf16.mxu1 %v9352_v3 }
  0x40   :  { %8367 = vmatmul.mubr.bf16.vlgmr.msra.gmra.mxu0 %v8801_v26  ;;  %8391 = vmatmul.mubr.bf16.vlgmr.msra.gmra.mxu1 %v8802_v27 }
  0x41   :  { %8399 = vmatpush3.bf16.msra.mxu0 %v9352_v3  ;;  %8423 = vmatpush3.bf16.msra.mxu1 %v9352_v3  ;;  %v8842_v3 = vld [vmem:[#allocation2 + $0x110] sm:$0xff]  }
  0x42   :  { %8400 = vmatprep.subr.bf16.mxu0 %v9357_v5  ;;  %8424 = vmatprep.subr.bf16.mxu1 %v9357_v5 }
  0x43   :  { %8394 = vmatprep.mubr.bf16.mxu1 %v8803_v28  ;;  %8370 = vmatprep.mubr.bf16.mxu0 %v8804_v29 }
  0x45   :  { %8401 = vmatpush3.bf16.msra.mxu0 %v9357_v5  ;;  %8425 = vmatpush3.bf16.msra.mxu1 %v9357_v5  ;;  %v8844_v5 = vld [vmem:[#allocation2 + $0x108] sm:$0xff]  }
  0x46   :  { %8402 = vmatprep.subr.bf16.mxu0 %v9374_v9  ;;  %8426 = vmatprep.subr.bf16.mxu1 %v9374_v9 }
  0x48   :  { %8395 = vmatmul.mubr.bf16.gmra.mxu1 %v8805_v30  ;;  %8371 = vmatmul.mubr.bf16.gmra.mxu0 %v8806_v31 }
  0x49   :  { %8403 = vmatpush3.bf16.msra.mxu0 %v9374_v9  ;;  %8427 = vmatpush3.bf16.msra.mxu1 %v9374_v9 }
  0x4a   :  { %8404 = vmatprep.subr.bf16.mxu0 %v9383_v13  ;;  %8428 = vmatprep.subr.bf16.mxu1 %v9383_v13 }
  0x4b   :  { %8414 = vmatprep.mubr.bf16.mxu0 %v8807_v32  ;;  %8438 = vmatprep.mubr.bf16.mxu1 %v8808_v33 }
  0x4d   :  { %8405 = vmatpush3.bf16.msra.mxu0 %v9383_v13  ;;  %8429 = vmatpush3.bf16.msra.mxu1 %v9383_v13 }
  0x4e   :  { %8406 = vmatprep.subr.bf16.mxu0 %v63_v16  ;;  %8430 = vmatprep.subr.bf16.mxu1 %v63_v16 }
  0x51   :  { %8407 = vmatpush3.bf16.msra.mxu0 %v63_v16  ;;  %8431 = vmatpush3.bf16.msra.mxu1 %v63_v16 }
  0x52   :  { %8408 = vmatprep.subr.bf16.mxu0 %v62_v19  ;;  %8432 = vmatprep.subr.bf16.mxu1 %v62_v19 }
  0x55   :  { %8409 = vmatpush3.bf16.msra.mxu0 %v62_v19  ;;  %8433 = vmatpush3.bf16.msra.mxu1 %v62_v19 }
  0x56   :  { %8410 = vmatprep.subr.bf16.mxu0 %v61_v22  ;;  %8434 = vmatprep.subr.bf16.mxu1 %v61_v22 }
  0x59   :  { %8411 = vmatpush3.bf16.msra.mxu0 %v61_v22  ;;  %8435 = vmatpush3.bf16.msra.mxu1 %v61_v22 }
  0x5a   :  { %8412 = vmatprep.subr.bf16.mxu0 %v60_v25  ;;  %8436 = vmatprep.subr.bf16.mxu1 %v60_v25 }
  0x5d   :  { %8413 = vmatpush3.bf16.msra.mxu0 %v60_v25  ;;  %8437 = vmatpush3.bf16.msra.mxu1 %v60_v25 }
  0x5e   :  { %7578 = vmatprep.subr.bf16.mxu0 %v8815_v34  ;;  %7618 = vmatprep.subr.bf16.mxu1 %v8831_v56  ;;  %v8847_v56 = vld [vmem:[#allocation2 + $0x180] sm:$0xff]  }
  0x60   :  { %8415 = vmatmul.mubr.bf16.vlgmr.msra.gmra.mxu0 %v8809_v35  ;;  %8439 = vmatmul.mubr.bf16.vlgmr.msra.gmra.mxu1 %v8810_v36 }
  0x61   :  { %8442 = vmatprep.mubr.bf16.mxu1 %v8811_v37  ;;  %8418 = vmatprep.mubr.bf16.mxu0 %v8812_v38 }
  0x62   :  { %7579 = vmatpush3.bf16.msra.mxu0 %v8816_v39  ;;  %7619 = vmatpush3.bf16.msra.mxu1 %v8832_v57  ;;  %v8848_v57 = vld [vmem:[#allocation2 + $0x190] sm:$0xff]  }
  0x63   :  { %7580 = vmatprep.subr.bf16.mxu0 %v8817_v40  ;;  %7620 = vmatprep.subr.bf16.mxu1 %v8833_v58 }
  0x66   :  { %7581 = vmatpush3.bf16.msra.mxu0 %v8818_v41  ;;  %7621 = vmatpush3.bf16.msra.mxu1 %v8834_v59 }
  0x67   :  { %7582 = vmatprep.subr.bf16.mxu0 %v8819_v42  ;;  %7622 = vmatprep.subr.bf16.mxu1 %v8835_v60 }
  0x68   :  { %8443 = vmatmul.mubr.bf16.gmra.mxu1 %v8813_v43  ;;  %8419 = vmatmul.mubr.bf16.gmra.mxu0 %v8814_v44 }
  0x6a   :  { %7583 = vmatpush3.bf16.msra.mxu0 %v8820_v45  ;;  %7623 = vmatpush3.bf16.msra.mxu1 %v8836_v61 }
  0x6b   :  { %7584 = vmatprep.subr.bf16.mxu0 %v8821_v46  ;;  %7624 = vmatprep.subr.bf16.mxu1 %v8837_v62 }
  0x6e   :  { %7585 = vmatpush3.bf16.msra.mxu0 %v8822_v47  ;;  %7625 = vmatpush3.bf16.msra.mxu1 %v8838_v63 }
  0x6f   :  { %7586 = vmatprep.subr.bf16.mxu0 %v8823_v48  ;;  %7626 = vmatprep.subr.bf16.mxu1 %v8839_v0 }
  0x72   :  { %7587 = vmatpush3.bf16.msra.mxu0 %v8824_v49  ;;  %7627 = vmatpush3.bf16.msra.mxu1 %v8840_v1 }
  0x73   :  { %7588 = vmatprep.subr.bf16.mxu0 %v8825_v50  ;;  %7628 = vmatprep.subr.bf16.mxu1 %v8841_v2 }
  0x76   :  { %7589 = vmatpush3.bf16.msra.mxu0 %v8826_v51  ;;  %7629 = vmatpush3.bf16.msra.mxu1 %v8842_v3 }
  0x77   :  { %7590 = vmatprep.subr.bf16.mxu0 %v8827_v52  ;;  %7630 = vmatprep.subr.bf16.mxu1 %v8843_v4 }
  0x7a   :  { %7591 = vmatpush3.bf16.msra.mxu0 %v8828_v53  ;;  %7631 = vmatpush3.bf16.msra.mxu1 %v8844_v5 }
  0x7b   :  { %7592 = vmatprep.subr.bf16.mxu0 %v8829_v54  ;;  %7632 = vmatprep.subr.bf16.mxu1 %v8845_v6 }
  0x7e   :  { %7593 = vmatpush3.bf16.msra.mxu0 %v8830_v55  ;;  %7633 = vmatpush3.bf16.msra.mxu1 %v8846_v7 }
 0x100   :  { %v8368_v8 = vpop.f32.mrf.mxu0  ;;  %v8392_v9 = vpop.f32.mrf.mxu1 }
 0x102   :  { %v134_v10 = vpop.f32.mrf.mxu0  ;;  %v235_v11 = vpop.f32.mrf.mxu1 }
 0x104   :  { %v8369_v12 = vpop.f32.mrf.mxu0  ;;  %v8393_v13 = vpop.f32.mrf.mxu1 }
 0x105   :  { %v267_v20 = vpack.c.bf16 %v8393_v13, %v8392_v9  ;;  %v166_v27 = vpack.c.bf16 %v8369_v12, %v8368_v8 }
 0x106   :  { %v137_v14 = vpop.f32.mrf.mxu0  ;;  %v238_v15 = vpop.f32.mrf.mxu1 }
 0x107   :  { %v165_v16 = vpack.c.bf16 %v137_v14, %v134_v10  ;;  %v266_v17 = vpack.c.bf16 %v238_v15, %v235_v11 }
 0x108   :  { %v8396_v18 = vpop.f32.mrf.mxu1  ;;  %v8372_v19 = vpop.f32.mrf.mxu0 }
 0x109   :  { %761 = vmatprep.mubr.bf16.mxu0 %v266_v17 }
 0x10a   :  { %762 = vmatmul.mubr.bf16.vlgmr.msra.gmra.mxu0 %v165_v16  ;;  %v251_v21 = vpop.f32.mrf.mxu1  ;;  %v150_v22 = vpop.f32.mrf.mxu0 }
 0x10b   :  { %769 = vmatprep.mubr.bf16.mxu0 %v267_v20 }
 0x10c   :  { %v8397_v23 = vpop.f32.mrf.mxu1  ;;  %v8373_v25 = vpop.f32.mrf.mxu0 }
 0x10d   :  { %v269_v30 = vpack.c.bf16 %v8397_v23, %v8396_v18  ;;  %v168_v31 = vpack.c.bf16 %v8373_v25, %v8372_v19 }
 0x10e   :  { %v254_v24 = vpop.f32.mrf.mxu1  ;;  %v153_v28 = vpop.f32.mrf.mxu0 }
 0x10f   :  { %v268_v26 = vpack.c.bf16 %v254_v24, %v251_v21  ;;  %v167_v29 = vpack.c.bf16 %v153_v28, %v150_v22 }
 0x112   :  { %770 = vmatmul.mubr.bf16.gmra.mxu0 %v166_v27 }
 0x113   :  { %777 = vmatprep.mubr.bf16.mxu0 %v268_v26 }
 0x11a   :  { %778 = vmatmul.mubr.bf16.gmra.mxu0 %v167_v29 }
 0x11b   :  { %785 = vmatprep.mubr.bf16.mxu0 %v269_v30 }
 0x120   :  { %v8416_v32 = vpop.f32.mrf.mxu0  ;;  %v8440_v33 = vpop.f32.mrf.mxu1 }
 0x122   :  { %v336_v34 = vpop.f32.mrf.mxu0  ;;  %v437_v35 = vpop.f32.mrf.mxu1  ;;  %786 = vmatmul.mubr.bf16.gmra.mxu0 %v168_v31 }
 0x123   :  { %8454 = vmatprep.mubr.msk.bf16.mxu0 %vm905_vm0, %v8847_v56 }
 0x124   :  { %v8417_v36 = vpop.f32.mrf.mxu0  ;;  %v8441_v37 = vpop.f32.mrf.mxu1 }
 0x125   :  { %v469_v43 = vpack.c.bf16 %v8441_v37, %v8440_v33  ;;  %v368_v50 = vpack.c.bf16 %v8417_v36, %v8416_v32 }
 0x126   :  { %v339_v38 = vpop.f32.mrf.mxu0  ;;  %v440_v39 = vpop.f32.mrf.mxu1 }
 0x127   :  { %v367_v40 = vpack.c.bf16 %v339_v38, %v336_v34  ;;  %v468_v41 = vpack.c.bf16 %v440_v39, %v437_v35  ;;  %v7076_v39 = vld [vmem:[#allocation5] ss:$0 sm:$0xff] }
 0x128   :  { %v8444_v42 = vpop.f32.mrf.mxu1  ;;  %v8420_v44 = vpop.f32.mrf.mxu0 }
 0x129   :  { %826 = vmatprep.mubr.bf16.mxu1 %v468_v41 }
 0x12a   :  { %827 = vmatmul.mubr.bf16.vlgmr.msra.gmra.mxu1 %v367_v40  ;;  %v453_v45 = vpop.f32.mrf.mxu1  ;;  %v352_v47 = vpop.f32.mrf.mxu0 }
 0x12b   :  { %834 = vmatprep.mubr.bf16.mxu1 %v469_v43 }
 0x12c   :  { %v8445_v46 = vpop.f32.mrf.mxu1  ;;  %v8421_v51 = vpop.f32.mrf.mxu0 }
 0x12d   :  { %v471_v54 = vpack.c.bf16 %v8445_v46, %v8444_v42  ;;  %v370_v55 = vpack.c.bf16 %v8421_v51, %v8420_v44 }
 0x12e   :  { %v456_v48 = vpop.f32.mrf.mxu1  ;;  %v355_v52 = vpop.f32.mrf.mxu0 }
 0x12f   :  { %v470_v49 = vpack.c.bf16 %v456_v48, %v453_v45  ;;  %v369_v53 = vpack.c.bf16 %v355_v52, %v352_v47 }
 0x132   :  { %835 = vmatmul.mubr.bf16.gmra.mxu1 %v368_v50 }
 0x133   :  { %842 = vmatprep.mubr.bf16.mxu1 %v470_v49 }
 0x13a   :  { %843 = vmatmul.mubr.bf16.gmra.mxu1 %v369_v53 }
 0x13b   :  { %850 = vmatprep.mubr.bf16.mxu1 %v471_v54 }
 0x142   :  { %851 = vmatmul.mubr.bf16.gmra.mxu1 %v370_v55 }
 0x143   :  { %8466 = vmatprep.mubr.msk.bf16.mxu1 %vm905_vm0, %v8848_v57 }
 0x1ca   :  { %v7594_v58 = vpop.f32.mrf.mxu0 }
 0x1cc   :  { %v7595_v59 = vpop.f32.mrf.mxu0 }
 0x1cd   :  { %v7596_v51 = vadd.f32 %v7595_v59, %v7594_v58 }
 0x1ce   :  { %v7597_v60 = vpop.f32.mrf.mxu0 }
 0x1d0   :  { %v7598_v61 = vpop.f32.mrf.mxu0 }
 0x1d1   :  { %v7599_v46 = vadd.f32 %v7598_v61, %v7597_v60 }
 0x1d2   :  { %v7600_v62 = vpop.f32.mrf.mxu0 }
 0x1d4   :  { %v7601_v63 = vpop.f32.mrf.mxu0 }
 0x1d5   :  { %v7602_v37 = vadd.f32 %v7601_v63, %v7600_v62 }
 0x1d6   :  { %v7603_v0 = vpop.f32.mrf.mxu0 }
 0x1d8   :  { %v7604_v1 = vpop.f32.mrf.mxu0 }
 0x1d9   :  { %v7605_v33 = vadd.f32 %v7604_v1, %v7603_v0 }
 0x1da   :  { %v7606_v2 = vpop.f32.mrf.mxu0 }
 0x1dc   :  { %v7607_v5 = vpop.f32.mrf.mxu0 }
 0x1dd   :  { %v7608_v25 = vadd.f32 %v7607_v5, %v7606_v2 }
 0x1de   :  { %v7609_v8 = vpop.f32.mrf.mxu0 }
 0x1e0   :  { %v7610_v11 = vpop.f32.mrf.mxu0 }
 0x1e1   :  { %v7611_v23 = vadd.f32 %v7610_v11, %v7609_v8 }
 0x1e2   :  { %v7612_v14 = vpop.f32.mrf.mxu0 }
 0x1e4   :  { %v7613_v17 = vpop.f32.mrf.mxu0 }
 0x1e5   :  { %v7614_v27 = vadd.f32 %v7613_v17, %v7612_v14  ;;  %v8851_v17 = vld [vmem:[#allocation2 + $0x1a0] sm:$0xff]  }
 0x1e6   :  { %v7615_v20 = vpop.f32.mrf.mxu0 }
 0x1e8   :  { %v7616_v28 = vpop.f32.mrf.mxu0 }
 0x1e9   :  { %v7617_v38 = vadd.f32 %v7616_v28, %v7615_v20  ;;  %v8864_v20 = vld [vmem:[#allocation2 + $0x2b8] sm:$0xff]   ;;  %v8870_v28 = vld [vmem:[#allocation2 + $0x270] sm:$0xff]  }
 0x1ea   :  { %v7634_v3 = vpop.f32.mrf.mxu1 }
 0x1ec   :  { %v7635_v4 = vpop.f32.mrf.mxu1 }
 0x1ed   :  { %v7636_v47 = vadd.f32 %v7635_v4, %v7634_v3 }
 0x1ee   :  { %v7637_v6 = vpop.f32.mrf.mxu1 }
 0x1ef   :  { %v829_v57 = vadd.f32 %v7636_v47, %v7596_v51  ;;  %v8881_v47 = vld [vmem:[#allocation2 + $0x290] sm:$0xff]   ;;  %v8885_v51 = vld [vmem:[#allocation2 + $0x280] sm:$0xff]  }
 0x1f0   :  { %v7638_v7 = vpop.f32.mrf.mxu1 }
 0x1f1   :  { %v7639_v40 = vadd.f32 %v7638_v7, %v7637_v6  ;;  %v863_v60 = vadd.f32 %v7076_v39, %v829_v57 }
 0x1f2   :  { %v7640_v9 = vpop.f32.mrf.mxu1 }
 0x1f3   :  { %v832_v52 = vadd.f32 %v7639_v40, %v7599_v46  ;;  %v8874_v40 = vld [vmem:[#allocation2 + $0x268] sm:$0xff]   ;;  %v8880_v46 = vld [vmem:[#allocation2 + $0x258] sm:$0xff]  }
 0x1f4   :  { %v7641_v10 = vpop.f32.mrf.mxu1 }
 0x1f5   :  { %v7642_v34 = vadd.f32 %v7641_v10, %v7640_v9  ;;  %v864_v1 = vadd.f32 %v7076_v39, %v832_v52  ;;  %v871_v9 = vmul.f32 0.2, %v863_v60  ;;  %v8886_v52 = vld [vmem:[#allocation2 + $0x240] sm:$0xff]  }
 0x1f6   :  { %v7643_v12 = vpop.f32.mrf.mxu1 }
 0x1f7   :  { %v837_v48 = vadd.f32 %v7642_v34, %v7602_v37  ;;  %v872_v8 = vmul.f32 0.2, %v864_v1  ;;  %v8865_v34 = vld [vmem:[#allocation2 + $0x1d8] sm:$0xff]   ;;  %v8871_v37 = vld [vmem:[#allocation2 + $0x208] sm:$0xff]  }
 0x1f8   :  { %v7644_v13 = vpop.f32.mrf.mxu1 }
 0x1f9   :  { %v7645_v29 = vadd.f32 %v7644_v13, %v7643_v12  ;;  %v865_v62 = vadd.f32 %v7076_v39, %v837_v48  ;;  %v880_v11 = vmax.f32 %v864_v1, %v872_v8  ;;  %v879_v13 = vmax.f32 %v863_v60, %v871_v9  ;;  %v8882_v48 = vld [vmem:[#allocation2 + $0x250] sm:$0xff]  }
 0x1fa   :  { %v7646_v15 = vpop.f32.mrf.mxu1 }
 0x1fb   :  { %v840_v42 = vadd.f32 %v7645_v29, %v7605_v33  ;;  %v873_v61 = vmul.f32 0.2, %v865_v62  ;;  %v887_v14 = vpack.c.bf16 %v880_v11, %v879_v13  ;;  %v8859_v29 = vld [vmem:[#allocation2 + $0x228] sm:$0xff]   ;;  %v8863_v33 = vld [vmem:[#allocation2 + $0x218] sm:$0xff]   ;;  %v9311_v13 = vmov 0.0  }
 0x1fc   :  { %v7647_v16 = vpop.f32.mrf.mxu1 }
 0x1fd   :  { %v7648_v24 = vadd.f32 %v7647_v16, %v7646_v15  ;;  %v866_v53 = vadd.f32 %v7076_v39, %v840_v42  ;;  %v881_v10 = vmax.f32 %v865_v62, %v873_v61  ;;  %v8849_v15 = vld [vmem:[#allocation2 + $0x188] sm:$0xff]   ;;  %v8850_v16 = vld [vmem:[#allocation2 + $0x198] sm:$0xff]   ;;  %v8876_v42 = vld [vmem:[#allocation2 + $0x2a0] sm:$0xff]  }
 0x1fe   :  { %v7649_v18 = vpop.f32.mrf.mxu1 }
 0x1ff   :  { %v845_v35 = vadd.f32 %v7648_v24, %v7608_v25  ;;  %v874_v2 = vmul.f32 0.2, %v866_v53  ;;  %v8866_v24 = vld [vmem:[#allocation2 + $0x278] sm:$0xff]   ;;  %v8857_v25 = vld [vmem:[#allocation2 + $0x230] sm:$0xff]  }
 0x200   :  { %v7650_v19 = vpop.f32.mrf.mxu1 }
 0x201   :  { %v7651_v21 = vadd.f32 %v7650_v19, %v7649_v18  ;;  %v867_v49 = vadd.f32 %v7076_v39, %v845_v35  ;;  %v882_v58 = vmax.f32 %v866_v53, %v874_v2  ;;  %v8852_v18 = vld [vmem:[#allocation2 + $0x1b0] sm:$0xff]   ;;  %v8855_v19 = vld [vmem:[#allocation2 + $0x238] sm:$0xff]  }
 0x202   :  { %v7652_v22 = vpop.f32.mrf.mxu1  ;;  %v8867_v35 = vld [vmem:[#allocation2 + $0x210] sm:$0xff]  }
 0x203   :  { %v848_v30 = vadd.f32 %v7651_v21, %v7611_v23  ;;  %v875_v63 = vmul.f32 0.2, %v867_v49  ;;  %v888_v12 = vpack.c.bf16 %v882_v58, %v881_v10  ;;  %v8853_v21 = vld [vmem:[#allocation2 + $0x1a8] sm:$0xff]   ;;  %v8856_v23 = vld [vmem:[#allocation2 + $0x1f8] sm:$0xff]  }
 0x204   :  { %v7653_v26 = vpop.f32.mrf.mxu1 }
 0x205   :  { %v7654_v31 = vadd.f32 %v7653_v26, %v7652_v22  ;;  %v868_v43 = vadd.f32 %v7076_v39, %v848_v30  ;;  %v883_v3 = vmax.f32 %v867_v49, %v875_v63  ;;  %v8854_v22 = vld [vmem:[#allocation2 + $0x1b8] sm:$0xff]   ;;  %v8868_v26 = vld [vmem:[#allocation2 + $0x2b0] sm:$0xff]   ;;  %v8860_v30 = vld [vmem:[#allocation2 + $0x1e8] sm:$0xff]  }
 0x206   :  { %v7655_v32 = vpop.f32.mrf.mxu1  ;;  %v8883_v49 = vld [vmem:[#allocation2 + $0x288] sm:$0xff]  }
 0x207   :  { %v853_v36 = vadd.f32 %v7654_v31, %v7614_v27  ;;  %v876_v54 = vmul.f32 0.2, %v868_v43  ;;  %v8858_v27 = vld [vmem:[#allocation2 + $0x1f0] sm:$0xff]   ;;  %v8861_v31 = vld [vmem:[#allocation2 + $0x220] sm:$0xff]  }
 0x208   :  { %v7656_v41 = vpop.f32.mrf.mxu1 }
 0x209   :  { %v869_v44 = vadd.f32 %v7076_v39, %v853_v36  ;;  %v7657_v45 = vadd.f32 %v7656_v41, %v7655_v32  ;;  %v884_v5 = vmax.f32 %v868_v43, %v876_v54  ;;  %v8862_v32 = vld [vmem:[#allocation2 + $0x1e0] sm:$0xff]   ;;  %v8869_v36 = vld [vmem:[#allocation2 + $0x1d0] sm:$0xff]  }
 0x20a   :  { %v8875_v41 = vld [vmem:[#allocation2 + $0x200] sm:$0xff]  }
 0x20b   :  { %v856_v50 = vadd.f32 %v7657_v45, %v7617_v38  ;;  %v877_v55 = vmul.f32 0.2, %v869_v44  ;;  %v889_v59 = vpack.c.bf16 %v884_v5, %v883_v3  ;;  %v8872_v38 = vld [vmem:[#allocation2 + $0x2a8] sm:$0xff]   ;;  %v8877_v43 = vld [vmem:[#allocation2 + $0x1c0] sm:$0xff]   ;;  %v8879_v45 = vld [vmem:[#allocation2 + $0x298] sm:$0xff]  }
 0x20d   :  { %v870_v56 = vadd.f32 %v7076_v39, %v856_v50  ;;  %v885_v6 = vmax.f32 %v869_v44, %v877_v55  ;;  %v8873_v39 = vld [vmem:[#allocation2 + $0x1c8] sm:$0xff]   ;;  %v8878_v44 = vld [vmem:[#allocation2 + $0x260] sm:$0xff]  }
 0x20e   :  { %v8884_v50 = vld [vmem:[#allocation2 + $0x248] sm:$0xff]  }
 0x20f   :  { %v878_v0 = vmul.f32 0.2, %v870_v56 }
 0x211   :  { %v886_v7 = vmax.f32 %v870_v56, %v878_v0 }
 0x213   :  { %v890_v4 = vpack.c.bf16 %v886_v7, %v885_v6 }
 0x215   :  { %8446 = vmatprep.subr.bf16.mxu0 %v890_v4  ;;  %8458 = vmatprep.subr.bf16.mxu1 %v890_v4 }
 0x216   :  { %8447 = vmatpush3.bf16.msra.mxu0 %v890_v4  ;;  %8459 = vmatpush3.bf16.msra.mxu1 %v890_v4 }
 0x217   :  { %8448 = vmatprep.subr.bf16.mxu0 %v889_v59  ;;  %8460 = vmatprep.subr.bf16.mxu1 %v889_v59 }
 0x21a   :  { %8449 = vmatpush3.bf16.msra.mxu0 %v889_v59  ;;  %8461 = vmatpush3.bf16.msra.mxu1 %v889_v59 }
 0x21b   :  { %8450 = vmatprep.subr.bf16.mxu0 %v888_v12  ;;  %8462 = vmatprep.subr.bf16.mxu1 %v888_v12 }
 0x21e   :  { %8451 = vmatpush3.bf16.msra.mxu0 %v888_v12  ;;  %8463 = vmatpush3.bf16.msra.mxu1 %v888_v12 }
 0x21f   :  { %8452 = vmatprep.subr.bf16.mxu0 %v887_v14  ;;  %8464 = vmatprep.subr.bf16.mxu1 %v887_v14 }
 0x222   :  { %8453 = vmatpush3.bf16.msra.mxu0 %v887_v14  ;;  %8465 = vmatpush3.bf16.msra.mxu1 %v887_v14 }
 0x223   :  { %8470 = vmatprep.subr.bf16.mxu0 %v890_v4  ;;  %8482 = vmatprep.subr.bf16.mxu1 %v890_v4 }
 0x225   :  { %8455 = vmatmul.mubr.msk.bf16.vlgmr.msra.gmra.mxu0 %vm905_vm0, %v8849_v15  ;;  %8467 = vmatmul.mubr.msk.bf16.vlgmr.msra.gmra.mxu1 %vm905_vm0, %v8850_v16 }
 0x226   :  { %8471 = vmatpush3.bf16.msra.mxu0 %v890_v4  ;;  %8483 = vmatpush3.bf16.msra.mxu1 %v890_v4 }
 0x227   :  { %8472 = vmatprep.subr.bf16.mxu0 %v889_v59  ;;  %8484 = vmatprep.subr.bf16.mxu1 %v889_v59 }
 0x228   :  { %8478 = vmatprep.mubr.msk.bf16.mxu0 %vm905_vm0, %v8851_v17  ;;  %8490 = vmatprep.mubr.msk.bf16.mxu1 %vm905_vm0, %v8852_v18 }
 0x22a   :  { %8473 = vmatpush3.bf16.msra.mxu0 %v889_v59  ;;  %8485 = vmatpush3.bf16.msra.mxu1 %v889_v59 }
 0x22b   :  { %8474 = vmatprep.subr.bf16.mxu0 %v888_v12  ;;  %8486 = vmatprep.subr.bf16.mxu1 %v888_v12 }
 0x22e   :  { %8475 = vmatpush3.bf16.msra.mxu0 %v888_v12  ;;  %8487 = vmatpush3.bf16.msra.mxu1 %v888_v12 }
 0x22f   :  { %8476 = vmatprep.subr.bf16.mxu0 %v887_v14  ;;  %8488 = vmatprep.subr.bf16.mxu1 %v887_v14 }
 0x232   :  { %8477 = vmatpush3.bf16.msra.mxu0 %v887_v14  ;;  %8489 = vmatpush3.bf16.msra.mxu1 %v887_v14 }
 0x233   :  { %7682 = vmatprep.subr.bf16.mxu0 %v8855_v19  ;;  %7710 = vmatprep.subr.bf16.mxu1 %v8864_v20 }
 0x235   :  { %8479 = vmatmul.mubr.msk.bf16.vlgmr.msra.gmra.mxu0 %vm905_vm0, %v8853_v21  ;;  %8491 = vmatmul.mubr.msk.bf16.vlgmr.msra.gmra.mxu1 %vm905_vm0, %v8854_v22 }
 0x236   :  { %7683 = vmatpush3.bf16.msra.mxu0 %v8856_v23  ;;  %7711 = vmatpush3.bf16.msra.mxu1 %v8866_v24 }
 0x237   :  { %7684 = vmatprep.subr.bf16.mxu0 %v8857_v25  ;;  %7712 = vmatprep.subr.bf16.mxu1 %v8868_v26 }
 0x23a   :  { %7685 = vmatpush3.bf16.msra.mxu0 %v8858_v27  ;;  %7713 = vmatpush3.bf16.msra.mxu1 %v8870_v28 }
 0x23b   :  { %7686 = vmatprep.subr.bf16.mxu0 %v8859_v29  ;;  %7714 = vmatprep.subr.bf16.mxu1 %v8872_v38 }
 0x23e   :  { %7687 = vmatpush3.bf16.msra.mxu0 %v8860_v30  ;;  %7715 = vmatpush3.bf16.msra.mxu1 %v8874_v40 }
 0x23f   :  { %7688 = vmatprep.subr.bf16.mxu0 %v8861_v31  ;;  %7716 = vmatprep.subr.bf16.mxu1 %v8876_v42 }
 0x242   :  { %7689 = vmatpush3.bf16.msra.mxu0 %v8862_v32  ;;  %7717 = vmatpush3.bf16.msra.mxu1 %v8878_v44 }
 0x243   :  { %7690 = vmatprep.subr.bf16.mxu0 %v8863_v33  ;;  %7718 = vmatprep.subr.bf16.mxu1 %v8879_v45 }
 0x246   :  { %7691 = vmatpush3.bf16.msra.mxu0 %v8865_v34  ;;  %7719 = vmatpush3.bf16.msra.mxu1 %v8880_v46 }
 0x247   :  { %7692 = vmatprep.subr.bf16.mxu0 %v8867_v35  ;;  %7720 = vmatprep.subr.bf16.mxu1 %v8881_v47 }
 0x24a   :  { %7693 = vmatpush3.bf16.msra.mxu0 %v8869_v36  ;;  %7721 = vmatpush3.bf16.msra.mxu1 %v8882_v48 }
 0x24b   :  { %7694 = vmatprep.subr.bf16.mxu0 %v8871_v37  ;;  %7722 = vmatprep.subr.bf16.mxu1 %v8883_v49  ;;  %v7125_v37 = vld [vmem:[#allocation5 + $0x8] ss:$0 sm:$0xff] }
 0x24e   :  { %7695 = vmatpush3.bf16.msra.mxu0 %v8873_v39  ;;  %7723 = vmatpush3.bf16.msra.mxu1 %v8884_v50 }
 0x24f   :  { %7696 = vmatprep.subr.bf16.mxu0 %v8875_v41  ;;  %7724 = vmatprep.subr.bf16.mxu1 %v8885_v51 }
 0x252   :  { %7697 = vmatpush3.bf16.msra.mxu0 %v8877_v43  ;;  %7725 = vmatpush3.bf16.msra.mxu1 %v8886_v52 }
 0x253   :  { %8494 = vmatprep.subr.bf16.mxu0 %v9311_v13  ;;  %8502 = vmatprep.subr.bf16.mxu1 %v9311_v13 }
 0x2e5   :  { %v8456_v53 = vpop.f32.mrf.mxu0  ;;  %v8468_v54 = vpop.f32.mrf.mxu1 }
 0x2e7   :  { %v946_v55 = vpop.f32.mrf.mxu0  ;;  %v1017_v56 = vpop.f32.mrf.mxu1 }
 0x2e9   :  { %v8457_v57 = vpop.f32.mrf.mxu0  ;;  %v8469_v62 = vpop.f32.mrf.mxu1 }
 0x2ea   :  { %v1033_v5 = vpack.c.bf16 %v8469_v62, %v8468_v54  ;;  %v962_v6 = vpack.c.bf16 %v8457_v57, %v8456_v53  ;;  %v8887_v57 = vld [vmem:[#allocation2 + $0x2c0] sm:$0xff]   ;;  %v8888_v62 = vld [vmem:[#allocation2 + $0x2c8] sm:$0xff]  }
 0x2eb   :  { %v949_v63 = vpop.f32.mrf.mxu0  ;;  %v1020_v0 = vpop.f32.mrf.mxu1 }
 0x2ec   :  { %v961_v1 = vpack.c.bf16 %v949_v63, %v946_v55  ;;  %v1032_v2 = vpack.c.bf16 %v1020_v0, %v1017_v56  ;;  %v8891_v63 = vld [vmem:[#allocation2 + $0x358] sm:$0xff]  }
 0x2ed   :  { %v8896_v0 = vld [vmem:[#allocation2 + $0x3d8] sm:$0xff]  }
 0x2ee   :  { %1465 = vmatprep.mubr.bf16.mxu0 %v1032_v2  ;;  %v8890_v2 = vld [vmem:[#allocation2 + $0x2d8] sm:$0xff]  }
 0x2ef   :  { %1466 = vmatmul.mubr.bf16.vlgmr.msra.gmra.mxu0 %v961_v1  ;;  %v8889_v1 = vld [vmem:[#allocation2 + $0x2d0] sm:$0xff]  }
 0x2f0   :  { %1473 = vmatprep.mubr.bf16.mxu0 %v1033_v5  ;;  %v8892_v5 = vld [vmem:[#allocation2 + $0x318] sm:$0xff]  }
 0x2f5   :  { %v8480_v7 = vpop.f32.mrf.mxu0  ;;  %v8492_v60 = vpop.f32.mrf.mxu1 }
 0x2f7   :  { %v1088_v61 = vpop.f32.mrf.mxu0  ;;  %v1159_v3 = vpop.f32.mrf.mxu1  ;;  %1474 = vmatmul.mubr.bf16.gmra.mxu0 %v962_v6  ;;  %v8898_v6 = vld [vmem:[#allocation2 + $0x398] sm:$0xff]  }
 0x2f8   :  { %8498 = vmatprep.mubr.msk.bf16.mxu0 %vm9312_vm1, %v9311_v13 }
 0x2f9   :  { %v8481_v4 = vpop.f32.mrf.mxu0  ;;  %v8493_v8 = vpop.f32.mrf.mxu1 }
 0x2fa   :  { %v1175_v11 = vpack.c.bf16 %v8493_v8, %v8492_v60  ;;  %v1104_v12 = vpack.c.bf16 %v8481_v4, %v8480_v7  ;;  %v8893_v7 = vld [vmem:[#allocation2 + $0x350] sm:$0xff]   ;;  %v8895_v4 = vld [vmem:[#allocation2 + $0x348] sm:$0xff]  }
 0x2fb   :  { %v1091_v58 = vpop.f32.mrf.mxu0  ;;  %v1162_v59 = vpop.f32.mrf.mxu1  ;;  %v8900_v60 = vld [vmem:[#allocation2 + $0x3d0] sm:$0xff]   ;;  %v8904_v8 = vld [vmem:[#allocation2 + $0x3c8] sm:$0xff]  }
 0x2fc   :  { %v1103_v9 = vpack.c.bf16 %v1091_v58, %v1088_v61  ;;  %v1174_v10 = vpack.c.bf16 %v1162_v59, %v1159_v3  ;;  %v8894_v61 = vld [vmem:[#allocation2 + $0x310] sm:$0xff]   ;;  %v8897_v58 = vld [vmem:[#allocation2 + $0x308] sm:$0xff]  }
 0x2fd   :  { %v8902_v3 = vld [vmem:[#allocation2 + $0x390] sm:$0xff]   ;;  %v8906_v59 = vld [vmem:[#allocation2 + $0x388] sm:$0xff]  }
 0x2fe   :  { %1514 = vmatprep.mubr.bf16.mxu1 %v1174_v10  ;;  %v8908_v10 = vld [vmem:[#allocation2 + $0x3c0] sm:$0xff]  }
 0x2ff   :  { %1515 = vmatmul.mubr.bf16.vlgmr.msra.gmra.mxu1 %v1103_v9  ;;  %v8899_v9 = vld [vmem:[#allocation2 + $0x340] sm:$0xff]  }
 0x300   :  { %1522 = vmatprep.mubr.bf16.mxu1 %v1175_v11  ;;  %v8901_v11 = vld [vmem:[#allocation2 + $0x300] sm:$0xff]  }
 0x307   :  { %1523 = vmatmul.mubr.bf16.gmra.mxu1 %v1104_v12  ;;  %v8910_v12 = vld [vmem:[#allocation2 + $0x380] sm:$0xff]  }
 0x308   :  { %8506 = vmatprep.mubr.msk.bf16.mxu1 %vm9312_vm1, %v9311_v13 }
 0x3af   :  { %v7698_v14 = vpop.f32.mrf.mxu0 }
 0x3b1   :  { %v7699_v15 = vpop.f32.mrf.mxu0 }
 0x3b2   :  { %v7700_v34 = vadd.f32 %v7699_v15, %v7698_v14  ;;  %v8903_v14 = vld [vmem:[#allocation2 + $0x338] sm:$0xff]  }
 0x3b3   :  { %v7701_v16 = vpop.f32.mrf.mxu0  ;;  %v8905_v15 = vld [vmem:[#allocation2 + $0x2f8] sm:$0xff]  }
 0x3b5   :  { %v7702_v17 = vpop.f32.mrf.mxu0 }
 0x3b6   :  { %v7703_v28 = vadd.f32 %v7702_v17, %v7701_v16  ;;  %v8907_v16 = vld [vmem:[#allocation2 + $0x330] sm:$0xff]  }
 0x3b7   :  { %v7704_v18 = vpop.f32.mrf.mxu0  ;;  %v8909_v17 = vld [vmem:[#allocation2 + $0x2f0] sm:$0xff]  }
 0x3b9   :  { %v7705_v21 = vpop.f32.mrf.mxu0 }
 0x3ba   :  { %v7706_v29 = vadd.f32 %v7705_v21, %v7704_v18  ;;  %v8911_v18 = vld [vmem:[#allocation2 + $0x328] sm:$0xff]   ;;  %v8914_v21 = vld [vmem:[#allocation2 + $0x378] sm:$0xff]  }
 0x3bb   :  { %v7707_v24 = vpop.f32.mrf.mxu0 }
 0x3bd   :  { %v7708_v32 = vpop.f32.mrf.mxu0 }
 0x3be   :  { %v7709_v39 = vadd.f32 %v7708_v32, %v7707_v24  ;;  %v8917_v24 = vld [vmem:[#allocation2 + $0x2e0] sm:$0xff]  }
 0x3bf   :  { %v7726_v19 = vpop.f32.mrf.mxu1 }
 0x3c1   :  { %v7727_v20 = vpop.f32.mrf.mxu1 }
 0x3c2   :  { %v7728_v30 = vadd.f32 %v7727_v20, %v7726_v19  ;;  %v8912_v19 = vld [vmem:[#allocation2 + $0x3b8] sm:$0xff]   ;;  %v8913_v20 = vld [vmem:[#allocation2 + $0x2e8] sm:$0xff]  }
 0x3c3   :  { %v7729_v22 = vpop.f32.mrf.mxu1 }
 0x3c4   :  { %v1517_v40 = vadd.f32 %v7728_v30, %v7700_v34 }
 0x3c5   :  { %v7730_v23 = vpop.f32.mrf.mxu1 }
 0x3c6   :  { %v7731_v26 = vadd.f32 %v7730_v23, %v7729_v22  ;;  %v1535_v45 = vadd.f32 %v7125_v37, %v1517_v40  ;;  %v8915_v22 = vld [vmem:[#allocation2 + $0x320] sm:$0xff]   ;;  %v8916_v23 = vld [vmem:[#allocation2 + $0x3b0] sm:$0xff]  }
 0x3c7   :  { %v7732_v25 = vpop.f32.mrf.mxu1 }
 0x3c8   :  { %v1520_v35 = vadd.f32 %v7731_v26, %v7703_v28  ;;  %v1539_v50 = vmul.f32 0.2, %v1535_v45  ;;  %v8919_v26 = vld [vmem:[#allocation2 + $0x3a8] sm:$0xff]   ;;  %v8921_v28 = vld [vmem:[#allocation2 + $0x3a0] sm:$0xff]  }
 0x3c9   :  { %v7733_v27 = vpop.f32.mrf.mxu1 }
 0x3ca   :  { %v7734_v31 = vadd.f32 %v7733_v27, %v7732_v25  ;;  %v1536_v43 = vadd.f32 %v7125_v37, %v1520_v35  ;;  %v1543_v55 = vmax.f32 %v1535_v45, %v1539_v50  ;;  %v8918_v25 = vld [vmem:[#allocation2 + $0x370] sm:$0xff]   ;;  %v8920_v27 = vld [vmem:[#allocation2 + $0x368] sm:$0xff]  }
 0x3cb   :  { %v7735_v33 = vpop.f32.mrf.mxu1 }
 0x3cc   :  { %v1525_v36 = vadd.f32 %v7734_v31, %v7706_v29  ;;  %v1540_v48 = vmul.f32 0.2, %v1536_v43  ;;  %v8922_v29 = vld [vmem:[#allocation2 + $0x360] sm:$0xff]  }
 0x3cd   :  { %v7736_v38 = vpop.f32.mrf.mxu1 }
 0x3ce   :  { %v1537_v41 = vadd.f32 %v7125_v37, %v1525_v36  ;;  %v7737_v42 = vadd.f32 %v7736_v38, %v7735_v33  ;;  %v1544_v53 = vmax.f32 %v1536_v43, %v1540_v48 }
 0x3d0   :  { %v1528_v44 = vadd.f32 %v7737_v42, %v7709_v39  ;;  %v1541_v46 = vmul.f32 0.2, %v1537_v41  ;;  %v1547_v56 = vpack.c.bf16 %v1544_v53, %v1543_v55 }
 0x3d2   :  { %v1538_v47 = vadd.f32 %v7125_v37, %v1528_v44  ;;  %v1545_v51 = vmax.f32 %v1537_v41, %v1541_v46 }
 0x3d4   :  { %v1542_v49 = vmul.f32 0.2, %v1538_v47 }
 0x3d6   :  { %v1546_v52 = vmax.f32 %v1538_v47, %v1542_v49 }
 0x3d8   :  { %v1548_v54 = vpack.c.bf16 %v1546_v52, %v1545_v51 }
 0x3da   :  { %8495 = vmatpush3.bf16.msra.mxu0 %v1548_v54  ;;  %8503 = vmatpush3.bf16.msra.mxu1 %v1548_v54 }
 0x3db   :  { %8496 = vmatprep.subr.bf16.mxu0 %v9311_v13  ;;  %8504 = vmatprep.subr.bf16.mxu1 %v9311_v13 }
 0x3de   :  { %8497 = vmatpush3.bf16.msra.mxu0 %v1547_v56  ;;  %8505 = vmatpush3.bf16.msra.mxu1 %v1547_v56 }
 0x3df   :  { %8510 = vmatprep.subr.bf16.mxu0 %v9311_v13  ;;  %8518 = vmatprep.subr.bf16.mxu1 %v9311_v13 }
 0x3e1   :  { %8499 = vmatmul.mubr.msk.bf16.vlgmr.msra.gmra.mxu0 %vm1556_vm2, %v8887_v57  ;;  %8507 = vmatmul.mubr.msk.bf16.vlgmr.msra.gmra.mxu1 %vm1556_vm2, %v8888_v62  ;;  %v7166_v62 = vld [vmem:[#allocation5 + $0x10] ss:$0 sm:$0xff] }
 0x3e2   :  { %8511 = vmatpush3.bf16.msra.mxu0 %v1548_v54  ;;  %8519 = vmatpush3.bf16.msra.mxu1 %v1548_v54 }
 0x3e3   :  { %8512 = vmatprep.subr.bf16.mxu0 %v9311_v13  ;;  %8520 = vmatprep.subr.bf16.mxu1 %v9311_v13 }
 0x3e4   :  { %8514 = vmatprep.mubr.msk.bf16.mxu0 %vm9312_vm1, %v9311_v13  ;;  %8522 = vmatprep.mubr.msk.bf16.mxu1 %vm9312_vm1, %v9311_v13 }
 0x3e6   :  { %8513 = vmatpush3.bf16.msra.mxu0 %v1547_v56  ;;  %8521 = vmatpush3.bf16.msra.mxu1 %v1547_v56 }
 0x3e7   :  { %7750 = vmatprep.subr.bf16.mxu0 %v8891_v63  ;;  %7772 = vmatprep.subr.bf16.mxu1 %v8896_v0 }
 0x3e9   :  { %8515 = vmatmul.mubr.msk.bf16.vlgmr.msra.gmra.mxu0 %vm1556_vm2, %v8889_v1  ;;  %8523 = vmatmul.mubr.msk.bf16.vlgmr.msra.gmra.mxu1 %vm1556_vm2, %v8890_v2 }
 0x3ea   :  { %7751 = vmatpush3.bf16.msra.mxu0 %v8892_v5  ;;  %7773 = vmatpush3.bf16.msra.mxu1 %v8898_v6 }
 0x3eb   :  { %7752 = vmatprep.subr.bf16.mxu0 %v8893_v7  ;;  %7774 = vmatprep.subr.bf16.mxu1 %v8900_v60 }
 0x3ee   :  { %7753 = vmatpush3.bf16.msra.mxu0 %v8894_v61  ;;  %7775 = vmatpush3.bf16.msra.mxu1 %v8902_v3 }
 0x3ef   :  { %7754 = vmatprep.subr.bf16.mxu0 %v8895_v4  ;;  %7776 = vmatprep.subr.bf16.mxu1 %v8904_v8 }
 0x3f2   :  { %7755 = vmatpush3.bf16.msra.mxu0 %v8897_v58  ;;  %7777 = vmatpush3.bf16.msra.mxu1 %v8906_v59  ;;  %v2108_v59 = vld [vmem:[#allocation2 + $0x3e0] sm:$0xf] }
 0x3f3   :  { %7756 = vmatprep.subr.bf16.mxu0 %v8899_v9  ;;  %7778 = vmatprep.subr.bf16.mxu1 %v8908_v10  ;;  %v2154_v9 = vld [vmem:[#allocation2 + $0x3e8] sm:$0xf]  ;;  %v8923_v10 = vld [vmem:[#allocation2 + $0x478] sm:$0xff]  }
 0x3f6   :  { %7757 = vmatpush3.bf16.msra.mxu0 %v8901_v11  ;;  %7779 = vmatpush3.bf16.msra.mxu1 %v8910_v12  ;;  %v8928_v11 = vld [vmem:[#allocation2 + $0x4f8] sm:$0xff]   ;;  %v2199_v12 = vld [vmem:[#allocation2 + $0x3f0] sm:$0xf] }
 0x3f7   :  { %7758 = vmatprep.subr.bf16.mxu0 %v8903_v14  ;;  %7780 = vmatprep.subr.bf16.mxu1 %v8912_v19  ;;  %v2244_v14 = vld [vmem:[#allocation2 + $0x3f8] sm:$0xf]  ;;  %v8926_v19 = vld [vmem:[#allocation2 + $0x430] sm:$0xff]  }
 0x3fa   :  { %7759 = vmatpush3.bf16.msra.mxu0 %v8905_v15  ;;  %7781 = vmatpush3.bf16.msra.mxu1 %v8914_v21  ;;  %v8924_v15 = vld [vmem:[#allocation2 + $0x438] sm:$0xff]   ;;  %v8927_v21 = vld [vmem:[#allocation2 + $0x468] sm:$0xff]  }
 0x3fb   :  { %7760 = vmatprep.subr.bf16.mxu0 %v8907_v16  ;;  %7782 = vmatprep.subr.bf16.mxu1 %v8916_v23  ;;  %v8930_v16 = vld [vmem:[#allocation2 + $0x4b8] sm:$0xff]   ;;  %v8929_v23 = vld [vmem:[#allocation2 + $0x428] sm:$0xff]  }
 0x3fe   :  { %7761 = vmatpush3.bf16.msra.mxu0 %v8909_v17  ;;  %7783 = vmatpush3.bf16.msra.mxu1 %v8918_v25  ;;  %v8925_v17 = vld [vmem:[#allocation2 + $0x470] sm:$0xff]   ;;  %v8931_v25 = vld [vmem:[#allocation2 + $0x460] sm:$0xff]  }
 0x3ff   :  { %7762 = vmatprep.subr.bf16.mxu0 %v8911_v18  ;;  %7784 = vmatprep.subr.bf16.mxu1 %v8919_v26  ;;  %v8932_v18 = vld [vmem:[#allocation2 + $0x4f0] sm:$0xff]   ;;  %v8940_v26 = vld [vmem:[#allocation2 + $0x4e0] sm:$0xff]  }
 0x402   :  { %7763 = vmatpush3.bf16.msra.mxu0 %v8913_v20  ;;  %7785 = vmatpush3.bf16.msra.mxu1 %v8920_v27  ;;  %v8934_v20 = vld [vmem:[#allocation2 + $0x4b0] sm:$0xff]   ;;  %v8933_v27 = vld [vmem:[#allocation2 + $0x420] sm:$0xff]  }
 0x403   :  { %7764 = vmatprep.subr.bf16.mxu0 %v8915_v22  ;;  %7786 = vmatprep.subr.bf16.mxu1 %v8921_v28  ;;  %v8936_v22 = vld [vmem:[#allocation2 + $0x4e8] sm:$0xff]   ;;  %v8942_v28 = vld [vmem:[#allocation2 + $0x4a0] sm:$0xff]  }
 0x406   :  { %7765 = vmatpush3.bf16.msra.mxu0 %v8917_v24  ;;  %7787 = vmatpush3.bf16.msra.mxu1 %v8922_v29  ;;  %v8938_v24 = vld [vmem:[#allocation2 + $0x4a8] sm:$0xff]   ;;  %v8935_v29 = vld [vmem:[#allocation2 + $0x458] sm:$0xff]  }
 0x407   :  { %8526 = vmatprep.subr.bf16.mxu0 %v9311_v13  ;;  %8532 = vmatprep.subr.bf16.mxu1 %v9311_v13 }
 0x4a1   :  { %v1594_v30 = vpop.f32.mrf.mxu0  ;;  %v1646_v31 = vpop.f32.mrf.mxu1 }
 0x4a3   :  { %v8500_v32 = vpop.f32.mrf.mxu0  ;;  %v8508_v33 = vpop.f32.mrf.mxu1 }
 0x4a4   :  { %v8946_v32 = vld [vmem:[#allocation2 + $0x498] sm:$0xff]   ;;  %v8939_v33 = vld [vmem:[#allocation2 + $0x450] sm:$0xff]  }
 0x4a5   :  { %v1597_v34 = vpop.f32.mrf.mxu0  ;;  %v1649_v35 = vpop.f32.mrf.mxu1 }
 0x4a6   :  { %v1601_v36 = vpack.c.bf16 %v1597_v34, %v1594_v30  ;;  %v1653_v37 = vpack.c.bf16 %v1649_v35, %v1646_v31  ;;  %v8944_v30 = vld [vmem:[#allocation2 + $0x4d8] sm:$0xff]   ;;  %v8941_v34 = vld [vmem:[#allocation2 + $0x410] sm:$0xff]   ;;  %v8943_v35 = vld [vmem:[#allocation2 + $0x448] sm:$0xff]  }
 0x4a7   :  { %v8501_v38 = vpop.f32.mrf.mxu0  ;;  %v8509_v39 = vpop.f32.mrf.mxu1  ;;  %v8937_v31 = vld [vmem:[#allocation2 + $0x418] sm:$0xff]  }
 0x4a8   :  { %2047 = vmatprep.mubr.bf16.mxu0 %v1653_v37  ;;  %v8947_v37 = vld [vmem:[#allocation2 + $0x440] sm:$0xff]   ;;  %v8948_v38 = vld [vmem:[#allocation2 + $0x4d0] sm:$0xff]  }
 0x4a9   :  { %v1698_v40 = vpop.f32.mrf.mxu0  ;;  %v1750_v41 = vpop.f32.mrf.mxu1  ;;  %2048 = vmatmul.mubr.bf16.vlgmr.msra.gmra.mxu0 %v1601_v36  ;;  %v8945_v36 = vld [vmem:[#allocation2 + $0x408] sm:$0xff]   ;;  %v8949_v39 = vld [vmem:[#allocation2 + $0x400] sm:$0xff]  }
 0x4aa   :  { %8528 = vmatprep.mubr.msk.bf16.mxu0 %vm9312_vm1, %v9311_v13 }
 0x4ab   :  { %v8516_v42 = vpop.f32.mrf.mxu0  ;;  %v8524_v43 = vpop.f32.mrf.mxu1 }
 0x4ac   :  { %v8952_v42 = vld [vmem:[#allocation2 + $0x488] sm:$0xff]   ;;  %v8953_v43 = vld [vmem:[#allocation2 + $0x4c0] sm:$0xff]  }
 0x4ad   :  { %v1701_v44 = vpop.f32.mrf.mxu0  ;;  %v1753_v45 = vpop.f32.mrf.mxu1 }
 0x4ae   :  { %v1705_v46 = vpack.c.bf16 %v1701_v44, %v1698_v40  ;;  %v1757_v47 = vpack.c.bf16 %v1753_v45, %v1750_v41  ;;  %v8950_v40 = vld [vmem:[#allocation2 + $0x490] sm:$0xff]   ;;  %v8951_v41 = vld [vmem:[#allocation2 + $0x4c8] sm:$0xff]   ;;  %v8954_v44 = vld [vmem:[#allocation2 + $0x480] sm:$0xff]  }
 0x4af   :  { %v8517_v48 = vpop.f32.mrf.mxu0  ;;  %v8525_v49 = vpop.f32.mrf.mxu1 }
 0x4b0   :  { %2088 = vmatprep.mubr.bf16.mxu1 %v1757_v47 }
 0x4b1   :  { %2089 = vmatmul.mubr.bf16.vlgmr.msra.gmra.mxu1 %v1705_v46 }
 0x4b2   :  { %8534 = vmatprep.mubr.msk.bf16.mxu1 %vm9312_vm1, %v9311_v13 }
 0x569   :  { %v7766_v50 = vpop.f32.mrf.mxu0 }
 0x56b   :  { %v7767_v51 = vpop.f32.mrf.mxu0 }
 0x56c   :  { %v7768_v55 = vadd.f32 %v7767_v51, %v7766_v50 }
 0x56d   :  { %v7769_v52 = vpop.f32.mrf.mxu0 }
 0x56f   :  { %v7770_v57 = vpop.f32.mrf.mxu0 }
 0x570   :  { %v7771_v2 = vadd.f32 %v7770_v57, %v7769_v52 }
 0x571   :  { %v7788_v53 = vpop.f32.mrf.mxu1 }
 0x573   :  { %v7789_v54 = vpop.f32.mrf.mxu1 }
 0x574   :  { %v7790_v56 = vadd.f32 %v7789_v54, %v7788_v53 }
 0x575   :  { %v7791_v63 = vpop.f32.mrf.mxu1 }
 0x576   :  { %v2091_v0 = vadd.f32 %v7790_v56, %v7768_v55 }
 0x577   :  { %v7792_v1 = vpop.f32.mrf.mxu1 }
 0x578   :  { %v2101_v5 = vadd.f32 %v7166_v62, %v2091_v0  ;;  %v7793_v6 = vadd.f32 %v7792_v1, %v7791_v63 }
 0x57a   :  { %v2094_v7 = vadd.f32 %v7793_v6, %v7771_v2  ;;  %v2103_v60 = vmul.f32 0.2, %v2101_v5 }
 0x57c   :  { %v2102_v61 = vadd.f32 %v7166_v62, %v2094_v7  ;;  %v2105_v4 = vmax.f32 %v2101_v5, %v2103_v60 }
 0x57e   :  { %v2104_v3 = vmul.f32 0.2, %v2102_v61 }
 0x580   :  { %v2106_v8 = vmax.f32 %v2102_v61, %v2104_v3 }
 0x582   :  { %v2107_v58 = vpack.c.bf16 %v2106_v8, %v2105_v4 }
 0x584   :  { %8527 = vmatpush3.bf16.msra.mxu0 %v2107_v58  ;;  %8533 = vmatpush3.bf16.msra.mxu1 %v2107_v58 }
 0x585   :  { %8538 = vmatprep.subr.bf16.mxu0 %v9311_v13  ;;  %8544 = vmatprep.subr.bf16.mxu1 %v9311_v13 }
 0x587   :  { %8529 = vmatmul.mubr.msk.bf16.vlgmr.msra.gmra.mxu0 %vm2109_vm3, %v2108_v59  ;;  %8535 = vmatmul.mubr.msk.bf16.vlgmr.msra.gmra.mxu1 %vm2109_vm3, %v2154_v9  ;;  %v7203_v9 = vld [vmem:[#allocation5 + $0x18] ss:$0 sm:$0xff] }
 0x588   :  { %8539 = vmatpush3.bf16.msra.mxu0 %v2107_v58  ;;  %8545 = vmatpush3.bf16.msra.mxu1 %v2107_v58 }
 0x589   :  { %8540 = vmatprep.mubr.msk.bf16.mxu0 %vm9312_vm1, %v9311_v13  ;;  %8546 = vmatprep.mubr.msk.bf16.mxu1 %vm9312_vm1, %v9311_v13 }
 0x58a   :  { %7802 = vmatprep.subr.bf16.mxu0 %v8923_v10  ;;  %7824 = vmatprep.subr.bf16.mxu1 %v8928_v11 }
 0x58f   :  { %8541 = vmatmul.mubr.msk.bf16.vlgmr.msra.gmra.mxu0 %vm2109_vm3, %v2199_v12  ;;  %8547 = vmatmul.mubr.msk.bf16.vlgmr.msra.gmra.mxu1 %vm2109_vm3, %v2244_v14 }
 0x590   :  { %7803 = vmatpush3.bf16.msra.mxu0 %v8924_v15  ;;  %7825 = vmatpush3.bf16.msra.mxu1 %v8930_v16 }
 0x591   :  { %7804 = vmatprep.subr.bf16.mxu0 %v8925_v17  ;;  %7826 = vmatprep.subr.bf16.mxu1 %v8932_v18 }
 0x594   :  { %7805 = vmatpush3.bf16.msra.mxu0 %v8926_v19  ;;  %7827 = vmatpush3.bf16.msra.mxu1 %v8934_v20  ;;  %v2634_v19 = vld [vmem:[#allocation2 + $0x500] sm:$0x1]  ;;  %v2684_v20 = vld [vmem:[#allocation2 + $0x508] sm:$0x1] }
 0x595   :  { %7806 = vmatprep.subr.bf16.mxu0 %v8927_v21  ;;  %7828 = vmatprep.subr.bf16.mxu1 %v8936_v22  ;;  %v8955_v21 = vld [vmem:[#allocation2 + $0x598] sm:$0xff]  }
 0x596   :  { %v8960_v22 = vld [vmem:[#allocation2 + $0x618] sm:$0xff]  }
 0x598   :  { %7807 = vmatpush3.bf16.msra.mxu0 %v8929_v23  ;;  %7829 = vmatpush3.bf16.msra.mxu1 %v8938_v24  ;;  %v2729_v23 = vld [vmem:[#allocation2 + $0x510] sm:$0x1]  ;;  %v2774_v24 = vld [vmem:[#allocation2 + $0x518] sm:$0x1] }
 0x599   :  { %7808 = vmatprep.subr.bf16.mxu0 %v8931_v25  ;;  %7830 = vmatprep.subr.bf16.mxu1 %v8940_v26  ;;  %v8956_v25 = vld [vmem:[#allocation2 + $0x558] sm:$0xff]  }
 0x59a   :  { %v8962_v26 = vld [vmem:[#allocation2 + $0x5d8] sm:$0xff]  }
 0x59c   :  { %7809 = vmatpush3.bf16.msra.mxu0 %v8933_v27  ;;  %7831 = vmatpush3.bf16.msra.mxu1 %v8942_v28  ;;  %v8957_v27 = vld [vmem:[#allocation2 + $0x590] sm:$0xff]  }
 0x59d   :  { %7810 = vmatprep.subr.bf16.mxu0 %v8935_v29  ;;  %7832 = vmatprep.subr.bf16.mxu1 %v8944_v30  ;;  %v8964_v28 = vld [vmem:[#allocation2 + $0x610] sm:$0xff]  }
 0x59e   :  { %v8958_v29 = vld [vmem:[#allocation2 + $0x550] sm:$0xff]  }
 0x59f   :  { %v8966_v30 = vld [vmem:[#allocation2 + $0x5d0] sm:$0xff]  }
 0x5a0   :  { %7811 = vmatpush3.bf16.msra.mxu0 %v8937_v31  ;;  %7833 = vmatpush3.bf16.msra.mxu1 %v8946_v32  ;;  %v8959_v31 = vld [vmem:[#allocation2 + $0x588] sm:$0xff]  }
 0x5a1   :  { %7812 = vmatprep.subr.bf16.mxu0 %v8939_v33  ;;  %7834 = vmatprep.subr.bf16.mxu1 %v8948_v38  ;;  %v8968_v32 = vld [vmem:[#allocation2 + $0x608] sm:$0xff]   ;;  %v8974_v38 = vld [vmem:[#allocation2 + $0x5c0] sm:$0xff]  }
 0x5a2   :  { %v8961_v33 = vld [vmem:[#allocation2 + $0x548] sm:$0xff]  }
 0x5a4   :  { %7813 = vmatpush3.bf16.msra.mxu0 %v8941_v34  ;;  %7835 = vmatpush3.bf16.msra.mxu1 %v8950_v40  ;;  %v8970_v34 = vld [vmem:[#allocation2 + $0x5c8] sm:$0xff]   ;;  %v8976_v40 = vld [vmem:[#allocation2 + $0x5f8] sm:$0xff]  }
 0x5a5   :  { %7814 = vmatprep.subr.bf16.mxu0 %v8943_v35  ;;  %7836 = vmatprep.subr.bf16.mxu1 %v8951_v41  ;;  %v8963_v35 = vld [vmem:[#allocation2 + $0x580] sm:$0xff]   ;;  %v8969_v41 = vld [vmem:[#allocation2 + $0x538] sm:$0xff]  }
 0x5a8   :  { %7815 = vmatpush3.bf16.msra.mxu0 %v8945_v36  ;;  %7837 = vmatpush3.bf16.msra.mxu1 %v8952_v42  ;;  %v8972_v36 = vld [vmem:[#allocation2 + $0x600] sm:$0xff]   ;;  %v8978_v42 = vld [vmem:[#allocation2 + $0x5b8] sm:$0xff]  }
 0x5a9   :  { %7816 = vmatprep.subr.bf16.mxu0 %v8947_v37  ;;  %7838 = vmatprep.subr.bf16.mxu1 %v8953_v43  ;;  %v8965_v37 = vld [vmem:[#allocation2 + $0x540] sm:$0xff]   ;;  %v8971_v43 = vld [vmem:[#allocation2 + $0x570] sm:$0xff]  }
 0x5ac   :  { %7817 = vmatpush3.bf16.msra.mxu0 %v8949_v39  ;;  %7839 = vmatpush3.bf16.msra.mxu1 %v8954_v44  ;;  %v8967_v39 = vld [vmem:[#allocation2 + $0x578] sm:$0xff]   ;;  %v8973_v44 = vld [vmem:[#allocation2 + $0x530] sm:$0xff]  }
 0x5ad   :  { %8550 = vmatprep.subr.bf16.mxu0 %v9311_v13  ;;  %8556 = vmatprep.subr.bf16.mxu1 %v9311_v13 }
 0x647   :  { %v2147_v45 = vpop.f32.mrf.mxu0  ;;  %v2192_v46 = vpop.f32.mrf.mxu1 }
 0x648   :  { %v2153_v47 = vpack.c.bf16 %v2147_v45, %v2147_v45  ;;  %v2198_v48 = vpack.c.bf16 %v2192_v46, %v2192_v46  ;;  %v8975_v45 = vld [vmem:[#allocation2 + $0x568] sm:$0xff]  }
 0x649   :  { %v8530_v49 = vpop.f32.mrf.mxu0  ;;  %v8536_v50 = vpop.f32.mrf.mxu1  ;;  %v8977_v46 = vld [vmem:[#allocation2 + $0x528] sm:$0xff]  }
 0x64a   :  { %2578 = vmatprep.mubr.bf16.mxu0 %v2198_v48  ;;  %v8980_v48 = vld [vmem:[#allocation2 + $0x5f0] sm:$0xff]   ;;  %v8981_v49 = vld [vmem:[#allocation2 + $0x520] sm:$0xff]  }
 0x64b   :  { %v2150_v51 = vpop.f32.mrf.mxu0  ;;  %v2195_v52 = vpop.f32.mrf.mxu1  ;;  %2579 = vmatmul.mubr.bf16.vlgmr.msra.gmra.mxu0 %v2153_v47  ;;  %v8979_v47 = vld [vmem:[#allocation2 + $0x560] sm:$0xff]   ;;  %v8982_v50 = vld [vmem:[#allocation2 + $0x5b0] sm:$0xff]  }
 0x64c   :  { %8552 = vmatprep.mubr.msk.bf16.mxu0 %vm9312_vm1, %v9311_v13  ;;  %v8983_v51 = vld [vmem:[#allocation2 + $0x5e8] sm:$0xff]  }
 0x64d   :  { %v8531_v53 = vpop.f32.mrf.mxu0  ;;  %v8537_v54 = vpop.f32.mrf.mxu1  ;;  %v8984_v52 = vld [vmem:[#allocation2 + $0x5a8] sm:$0xff]  }
 0x64e   :  { %v8985_v53 = vld [vmem:[#allocation2 + $0x5e0] sm:$0xff]  }
 0x64f   :  { %v2237_v55 = vpop.f32.mrf.mxu0  ;;  %v2282_v56 = vpop.f32.mrf.mxu1  ;;  %v8986_v54 = vld [vmem:[#allocation2 + $0x5a0] sm:$0xff]  }
 0x650   :  { %v2243_v57 = vpack.c.bf16 %v2237_v55, %v2237_v55  ;;  %v2288_v62 = vpack.c.bf16 %v2282_v56, %v2282_v56 }
 0x651   :  { %v8542_v63 = vpop.f32.mrf.mxu0  ;;  %v8548_v0 = vpop.f32.mrf.mxu1 }
 0x652   :  { %2618 = vmatprep.mubr.bf16.mxu1 %v2288_v62 }
 0x653   :  { %v2240_v1 = vpop.f32.mrf.mxu0  ;;  %v2285_v2 = vpop.f32.mrf.mxu1  ;;  %2619 = vmatmul.mubr.bf16.vlgmr.msra.gmra.mxu1 %v2243_v57 }
 0x654   :  { %8558 = vmatprep.mubr.msk.bf16.mxu1 %vm9312_vm1, %v9311_v13 }
 0x655   :  { %v8543_v5 = vpop.f32.mrf.mxu0  ;;  %v8549_v6 = vpop.f32.mrf.mxu1 }
 0x70b   :  { %v7818_v7 = vpop.f32.mrf.mxu0 }
 0x70d   :  { %v7819_v60 = vpop.f32.mrf.mxu0 }
 0x70e   :  { %v7820_v58 = vadd.f32 %v7819_v60, %v7818_v7 }
 0x70f   :  { %v7821_v61 = vpop.f32.mrf.mxu0 }
 0x711   :  { %v7822_v3 = vpop.f32.mrf.mxu0 }
 0x713   :  { %v7840_v4 = vpop.f32.mrf.mxu1 }
 0x715   :  { %v7841_v8 = vpop.f32.mrf.mxu1 }
 0x716   :  { %v7842_v59 = vadd.f32 %v7841_v8, %v7840_v4 }
 0x717   :  { %v7843_v10 = vpop.f32.mrf.mxu1 }
 0x718   :  { %v2621_v11 = vadd.f32 %v7842_v59, %v7820_v58 }
 0x719   :  { %v7844_v12 = vpop.f32.mrf.mxu1 }
 0x71a   :  { %v2630_v14 = vadd.f32 %v7203_v9, %v2621_v11 }
 0x71c   :  { %v2631_v15 = vmul.f32 0.2, %v2630_v14 }
 0x71e   :  { %v2632_v16 = vmax.f32 %v2630_v14, %v2631_v15 }
 0x720   :  { %v2633_v17 = vpack.c.bf16 %v2632_v16, %v2632_v16 }
 0x722   :  { %v2641_v18 = vsel %vm2639_vm4, %v2633_v17, 0 }
 0x723   :  { %8551 = vmatpush3.bf16.msra.mxu0 %v2641_v18  ;;  %8557 = vmatpush3.bf16.msra.mxu1 %v2641_v18 }
 0x724   :  { %8562 = vmatprep.subr.bf16.mxu0 %v9311_v13  ;;  %8568 = vmatprep.subr.bf16.mxu1 %v9311_v13 }
 0x726   :  { %8553 = vmatmul.mubr.msk.bf16.vlgmr.msra.gmra.mxu0 %vm2635_vm5, %v2634_v19  ;;  %8559 = vmatmul.mubr.msk.bf16.vlgmr.msra.gmra.mxu1 %vm2635_vm5, %v2684_v20  ;;  %v7240_v20 = vld [vmem:[#allocation5 + $0x20] ss:$0 sm:$0xff] }
 0x727   :  { %8563 = vmatpush3.bf16.msra.mxu0 %v2641_v18  ;;  %8569 = vmatpush3.bf16.msra.mxu1 %v2641_v18 }
 0x728   :  { %8564 = vmatprep.mubr.msk.bf16.mxu0 %vm9312_vm1, %v9311_v13  ;;  %8570 = vmatprep.mubr.msk.bf16.mxu1 %vm9312_vm1, %v9311_v13 }
 0x729   :  { %7854 = vmatprep.subr.bf16.mxu0 %v8955_v21  ;;  %7876 = vmatprep.subr.bf16.mxu1 %v8960_v22 }
 0x72e   :  { %8565 = vmatmul.mubr.msk.bf16.vlgmr.msra.gmra.mxu0 %vm2635_vm5, %v2729_v23  ;;  %8571 = vmatmul.mubr.msk.bf16.vlgmr.msra.gmra.mxu1 %vm2635_vm5, %v2774_v24 }
 0x72f   :  { %7855 = vmatpush3.bf16.msra.mxu0 %v8956_v25  ;;  %7877 = vmatpush3.bf16.msra.mxu1 %v8962_v26 }
 0x730   :  { %7856 = vmatprep.subr.bf16.mxu0 %v8957_v27  ;;  %7878 = vmatprep.subr.bf16.mxu1 %v8964_v28 }
 0x733   :  { %7857 = vmatpush3.bf16.msra.mxu0 %v8958_v29  ;;  %7879 = vmatpush3.bf16.msra.mxu1 %v8966_v30  ;;  %v3164_v29 = vld [vmem:[#allocation2 + $0x620] sm:$0xf]  ;;  %v3214_v30 = vld [vmem:[#allocation2 + $0x628] sm:$0xf] }
 0x734   :  { %7858 = vmatprep.subr.bf16.mxu0 %v8959_v31  ;;  %7880 = vmatprep.subr.bf16.mxu1 %v8968_v32  ;;  %v8987_v31 = vld [vmem:[#allocation2 + $0x6b8] sm:$0xff]  }
 0x735   :  { %v8992_v32 = vld [vmem:[#allocation2 + $0x738] sm:$0xff]  }
 0x737   :  { %7859 = vmatpush3.bf16.msra.mxu0 %v8961_v33  ;;  %7881 = vmatpush3.bf16.msra.mxu1 %v8970_v34  ;;  %v3259_v33 = vld [vmem:[#allocation2 + $0x630] sm:$0xf]  ;;  %v3304_v34 = vld [vmem:[#allocation2 + $0x638] sm:$0xf] }
 0x738   :  { %7860 = vmatprep.subr.bf16.mxu0 %v8963_v35  ;;  %7882 = vmatprep.subr.bf16.mxu1 %v8972_v36  ;;  %v8988_v35 = vld [vmem:[#allocation2 + $0x678] sm:$0xff]  }
 0x739   :  { %v8994_v36 = vld [vmem:[#allocation2 + $0x6f8] sm:$0xff]  }
 0x73b   :  { %7861 = vmatpush3.bf16.msra.mxu0 %v8965_v37  ;;  %7883 = vmatpush3.bf16.msra.mxu1 %v8974_v38  ;;  %v8989_v37 = vld [vmem:[#allocation2 + $0x6b0] sm:$0xff]  }
 0x73c   :  { %7862 = vmatprep.subr.bf16.mxu0 %v8967_v39  ;;  %7884 = vmatprep.subr.bf16.mxu1 %v8976_v40  ;;  %v8996_v38 = vld [vmem:[#allocation2 + $0x730] sm:$0xff]  }
 0x73d   :  { %v8990_v39 = vld [vmem:[#allocation2 + $0x670] sm:$0xff]  }
 0x73e   :  { %v8998_v40 = vld [vmem:[#allocation2 + $0x6f0] sm:$0xff]  }
 0x73f   :  { %7863 = vmatpush3.bf16.msra.mxu0 %v8969_v41  ;;  %7885 = vmatpush3.bf16.msra.mxu1 %v8978_v42  ;;  %v8991_v41 = vld [vmem:[#allocation2 + $0x6a8] sm:$0xff]  }
 0x740   :  { %7864 = vmatprep.subr.bf16.mxu0 %v8971_v43  ;;  %7886 = vmatprep.subr.bf16.mxu1 %v8980_v48  ;;  %v9000_v42 = vld [vmem:[#allocation2 + $0x728] sm:$0xff]   ;;  %v9006_v48 = vld [vmem:[#allocation2 + $0x6e0] sm:$0xff]  }
 0x741   :  { %v8993_v43 = vld [vmem:[#allocation2 + $0x668] sm:$0xff]  }
 0x743   :  { %7865 = vmatpush3.bf16.msra.mxu0 %v8973_v44  ;;  %7887 = vmatpush3.bf16.msra.mxu1 %v8982_v50  ;;  %v9002_v44 = vld [vmem:[#allocation2 + $0x6e8] sm:$0xff]   ;;  %v9008_v50 = vld [vmem:[#allocation2 + $0x718] sm:$0xff]  }
 0x744   :  { %7866 = vmatprep.subr.bf16.mxu0 %v8975_v45  ;;  %7888 = vmatprep.subr.bf16.mxu1 %v8983_v51  ;;  %v8995_v45 = vld [vmem:[#allocation2 + $0x6a0] sm:$0xff]   ;;  %v9001_v51 = vld [vmem:[#allocation2 + $0x658] sm:$0xff]  }
 0x747   :  { %7867 = vmatpush3.bf16.msra.mxu0 %v8977_v46  ;;  %7889 = vmatpush3.bf16.msra.mxu1 %v8984_v52  ;;  %v9004_v46 = vld [vmem:[#allocation2 + $0x720] sm:$0xff]   ;;  %v9010_v52 = vld [vmem:[#allocation2 + $0x6d8] sm:$0xff]  }
 0x748   :  { %7868 = vmatprep.subr.bf16.mxu0 %v8979_v47  ;;  %7890 = vmatprep.subr.bf16.mxu1 %v8985_v53  ;;  %v8997_v47 = vld [vmem:[#allocation2 + $0x660] sm:$0xff]   ;;  %v9003_v53 = vld [vmem:[#allocation2 + $0x690] sm:$0xff]  }
 0x74b   :  { %7869 = vmatpush3.bf16.msra.mxu0 %v8981_v49  ;;  %7891 = vmatpush3.bf16.msra.mxu1 %v8986_v54  ;;  %v8999_v49 = vld [vmem:[#allocation2 + $0x698] sm:$0xff]   ;;  %v9005_v54 = vld [vmem:[#allocation2 + $0x650] sm:$0xff]  }
 0x74c   :  { %8574 = vmatprep.subr.bf16.mxu0 %v9311_v13  ;;  %8580 = vmatprep.subr.bf16.mxu1 %v9311_v13 }
 0x7e6   :  { %v2677_v55 = vpop.f32.mrf.mxu0  ;;  %v2722_v56 = vpop.f32.mrf.mxu1 }
 0x7e7   :  { %v2683_v57 = vpack.c.bf16 %v2677_v55, %v2677_v55  ;;  %v2728_v62 = vpack.c.bf16 %v2722_v56, %v2722_v56  ;;  %v9007_v55 = vld [vmem:[#allocation2 + $0x688] sm:$0xff]  }
 0x7e8   :  { %v8554_v63 = vpop.f32.mrf.mxu0  ;;  %v8560_v0 = vpop.f32.mrf.mxu1  ;;  %v9009_v56 = vld [vmem:[#allocation2 + $0x648] sm:$0xff]  }
 0x7e9   :  { %3108 = vmatprep.mubr.bf16.mxu0 %v2728_v62  ;;  %v9012_v62 = vld [vmem:[#allocation2 + $0x710] sm:$0xff]   ;;  %v9013_v63 = vld [vmem:[#allocation2 + $0x640] sm:$0xff]  }
 0x7ea   :  { %v2680_v1 = vpop.f32.mrf.mxu0  ;;  %v2725_v2 = vpop.f32.mrf.mxu1  ;;  %3109 = vmatmul.mubr.bf16.vlgmr.msra.gmra.mxu0 %v2683_v57  ;;  %v9011_v57 = vld [vmem:[#allocation2 + $0x680] sm:$0xff]   ;;  %v9014_v0 = vld [vmem:[#allocation2 + $0x6d0] sm:$0xff]  }
 0x7eb   :  { %8576 = vmatprep.mubr.msk.bf16.mxu0 %vm9312_vm1, %v9311_v13  ;;  %v9015_v1 = vld [vmem:[#allocation2 + $0x708] sm:$0xff]  }
 0x7ec   :  { %v8555_v5 = vpop.f32.mrf.mxu0  ;;  %v8561_v6 = vpop.f32.mrf.mxu1  ;;  %v9016_v2 = vld [vmem:[#allocation2 + $0x6c8] sm:$0xff]  }
 0x7ed   :  { %v9017_v5 = vld [vmem:[#allocation2 + $0x700] sm:$0xff]  }
 0x7ee   :  { %v2767_v7 = vpop.f32.mrf.mxu0  ;;  %v2812_v60 = vpop.f32.mrf.mxu1  ;;  %v9018_v6 = vld [vmem:[#allocation2 + $0x6c0] sm:$0xff]  }
 0x7ef   :  { %v2773_v61 = vpack.c.bf16 %v2767_v7, %v2767_v7  ;;  %v2818_v3 = vpack.c.bf16 %v2812_v60, %v2812_v60 }
 0x7f0   :  { %v8566_v4 = vpop.f32.mrf.mxu0  ;;  %v8572_v8 = vpop.f32.mrf.mxu1 }
 0x7f1   :  { %3148 = vmatprep.mubr.bf16.mxu1 %v2818_v3 }
 0x7f2   :  { %v2770_v58 = vpop.f32.mrf.mxu0  ;;  %v2815_v59 = vpop.f32.mrf.mxu1  ;;  %3149 = vmatmul.mubr.bf16.vlgmr.msra.gmra.mxu1 %v2773_v61 }
 0x7f3   :  { %8582 = vmatprep.mubr.msk.bf16.mxu1 %vm9312_vm1, %v9311_v13 }
 0x7f4   :  { %v8567_v9 = vpop.f32.mrf.mxu0  ;;  %v8573_v10 = vpop.f32.mrf.mxu1 }
 0x8aa   :  { %v7870_v11 = vpop.f32.mrf.mxu0 }
 0x8ac   :  { %v7871_v12 = vpop.f32.mrf.mxu0 }
 0x8ad   :  { %v7872_v18 = vadd.f32 %v7871_v12, %v7870_v11 }
 0x8ae   :  { %v7873_v14 = vpop.f32.mrf.mxu0 }
 0x8b0   :  { %v7874_v15 = vpop.f32.mrf.mxu0 }
 0x8b2   :  { %v7892_v16 = vpop.f32.mrf.mxu1 }
 0x8b4   :  { %v7893_v17 = vpop.f32.mrf.mxu1 }
 0x8b5   :  { %v7894_v19 = vadd.f32 %v7893_v17, %v7892_v16 }
 0x8b6   :  { %v7895_v21 = vpop.f32.mrf.mxu1 }
 0x8b7   :  { %v3151_v22 = vadd.f32 %v7894_v19, %v7872_v18 }
 0x8b8   :  { %v7896_v23 = vpop.f32.mrf.mxu1 }
 0x8b9   :  { %v3160_v24 = vadd.f32 %v7240_v20, %v3151_v22 }
 0x8bb   :  { %v3161_v25 = vmul.f32 0.2, %v3160_v24 }
 0x8bd   :  { %v3162_v26 = vmax.f32 %v3160_v24, %v3161_v25 }
 0x8bf   :  { %v3163_v27 = vpack.c.bf16 %v3162_v26, %v3162_v26 }
 0x8c1   :  { %v3171_v28 = vsel %vm3169_vm6, %v3163_v27, 0 }
 0x8c2   :  { %8575 = vmatpush3.bf16.msra.mxu0 %v3171_v28  ;;  %8581 = vmatpush3.bf16.msra.mxu1 %v3171_v28 }
 0x8c3   :  { %8586 = vmatprep.subr.bf16.mxu0 %v9311_v13  ;;  %8592 = vmatprep.subr.bf16.mxu1 %v9311_v13 }
 0x8c5   :  { %8577 = vmatmul.mubr.msk.bf16.vlgmr.msra.gmra.mxu0 %vm3165_vm7, %v3164_v29  ;;  %8583 = vmatmul.mubr.msk.bf16.vlgmr.msra.gmra.mxu1 %vm3165_vm7, %v3214_v30  ;;  %v7277_v30 = vld [vmem:[#allocation5 + $0x28] ss:$0 sm:$0xff] }
 0x8c6   :  { %8587 = vmatpush3.bf16.msra.mxu0 %v3171_v28  ;;  %8593 = vmatpush3.bf16.msra.mxu1 %v3171_v28 }
 0x8c7   :  { %8588 = vmatprep.mubr.msk.bf16.mxu0 %vm9312_vm1, %v9311_v13  ;;  %8594 = vmatprep.mubr.msk.bf16.mxu1 %vm9312_vm1, %v9311_v13 }
 0x8c8   :  { %7906 = vmatprep.subr.bf16.mxu0 %v8987_v31  ;;  %7928 = vmatprep.subr.bf16.mxu1 %v8992_v32 }
 0x8cd   :  { %8589 = vmatmul.mubr.msk.bf16.vlgmr.msra.gmra.mxu0 %vm3165_vm7, %v3259_v33  ;;  %8595 = vmatmul.mubr.msk.bf16.vlgmr.msra.gmra.mxu1 %vm3165_vm7, %v3304_v34 }
 0x8ce   :  { %7907 = vmatpush3.bf16.msra.mxu0 %v8988_v35  ;;  %7929 = vmatpush3.bf16.msra.mxu1 %v8994_v36 }
 0x8cf   :  { %7908 = vmatprep.subr.bf16.mxu0 %v8989_v37  ;;  %7930 = vmatprep.subr.bf16.mxu1 %v8996_v38 }
 0x8d2   :  { %7909 = vmatpush3.bf16.msra.mxu0 %v8990_v39  ;;  %7931 = vmatpush3.bf16.msra.mxu1 %v8998_v40  ;;  %v9019_v39 = vld [vmem:[#allocation2 + $0x740] sm:$0xff]   ;;  %v9020_v40 = vld [vmem:[#allocation2 + $0x748] sm:$0xff]  }
 0x8d3   :  { %7910 = vmatprep.subr.bf16.mxu0 %v8991_v41  ;;  %7932 = vmatprep.subr.bf16.mxu1 %v9000_v42  ;;  %v9023_v41 = vld [vmem:[#allocation2 + $0x7d8] sm:$0xff]  }
 0x8d4   :  { %v9028_v42 = vld [vmem:[#allocation2 + $0x858] sm:$0xff]  }
 0x8d6   :  { %7911 = vmatpush3.bf16.msra.mxu0 %v8993_v43  ;;  %7933 = vmatpush3.bf16.msra.mxu1 %v9002_v44  ;;  %v9021_v43 = vld [vmem:[#allocation2 + $0x750] sm:$0xff]   ;;  %v9022_v44 = vld [vmem:[#allocation2 + $0x758] sm:$0xff]  }
 0x8d7   :  { %7912 = vmatprep.subr.bf16.mxu0 %v8995_v45  ;;  %7934 = vmatprep.subr.bf16.mxu1 %v9004_v46  ;;  %v9024_v45 = vld [vmem:[#allocation2 + $0x798] sm:$0xff]  }
 0x8d8   :  { %v9030_v46 = vld [vmem:[#allocation2 + $0x818] sm:$0xff]  }
 0x8da   :  { %7913 = vmatpush3.bf16.msra.mxu0 %v8997_v47  ;;  %7935 = vmatpush3.bf16.msra.mxu1 %v9006_v48  ;;  %v9025_v47 = vld [vmem:[#allocation2 + $0x7d0] sm:$0xff]  }
 0x8db   :  { %7914 = vmatprep.subr.bf16.mxu0 %v8999_v49  ;;  %7936 = vmatprep.subr.bf16.mxu1 %v9008_v50  ;;  %v9032_v48 = vld [vmem:[#allocation2 + $0x850] sm:$0xff]  }
 0x8dc   :  { %v9026_v49 = vld [vmem:[#allocation2 + $0x790] sm:$0xff]  }
 0x8dd   :  { %v9034_v50 = vld [vmem:[#allocation2 + $0x810] sm:$0xff]  }
 0x8de   :  { %7915 = vmatpush3.bf16.msra.mxu0 %v9001_v51  ;;  %7937 = vmatpush3.bf16.msra.mxu1 %v9010_v52  ;;  %v9027_v51 = vld [vmem:[#allocation2 + $0x7c8] sm:$0xff]  }
 0x8df   :  { %7916 = vmatprep.subr.bf16.mxu0 %v9003_v53  ;;  %7938 = vmatprep.subr.bf16.mxu1 %v9012_v62  ;;  %v9029_v52 = vld [vmem:[#allocation2 + $0x788] sm:$0xff]   ;;  %v9035_v62 = vld [vmem:[#allocation2 + $0x7b8] sm:$0xff]  }
 0x8e0   :  { %v9038_v53 = vld [vmem:[#allocation2 + $0x808] sm:$0xff]  }
 0x8e2   :  { %7917 = vmatpush3.bf16.msra.mxu0 %v9005_v54  ;;  %7939 = vmatpush3.bf16.msra.mxu1 %v9014_v0  ;;  %v9031_v54 = vld [vmem:[#allocation2 + $0x7c0] sm:$0xff]   ;;  %v9039_v0 = vld [vmem:[#allocation2 + $0x7b0] sm:$0xff]  }
 0x8e3   :  { %7918 = vmatprep.subr.bf16.mxu0 %v9007_v55  ;;  %7940 = vmatprep.subr.bf16.mxu1 %v9015_v1  ;;  %v9040_v55 = vld [vmem:[#allocation2 + $0x840] sm:$0xff]   ;;  %v9041_v1 = vld [vmem:[#allocation2 + $0x770] sm:$0xff]  }
 0x8e6   :  { %7919 = vmatpush3.bf16.msra.mxu0 %v9009_v56  ;;  %7941 = vmatpush3.bf16.msra.mxu1 %v9016_v2  ;;  %v9033_v56 = vld [vmem:[#allocation2 + $0x780] sm:$0xff]   ;;  %v9043_v2 = vld [vmem:[#allocation2 + $0x7a8] sm:$0xff]  }
 0x8e7   :  { %7920 = vmatprep.subr.bf16.mxu0 %v9011_v57  ;;  %7942 = vmatprep.subr.bf16.mxu1 %v9017_v5  ;;  %v9042_v57 = vld [vmem:[#allocation2 + $0x800] sm:$0xff]   ;;  %v9044_v5 = vld [vmem:[#allocation2 + $0x838] sm:$0xff]  }
 0x8ea   :  { %7921 = vmatpush3.bf16.msra.mxu0 %v9013_v63  ;;  %7943 = vmatpush3.bf16.msra.mxu1 %v9018_v6  ;;  %v9037_v63 = vld [vmem:[#allocation2 + $0x778] sm:$0xff]   ;;  %v9045_v6 = vld [vmem:[#allocation2 + $0x768] sm:$0xff]  }
 0x8eb   :  { %8598 = vmatprep.subr.bf16.mxu0 %v9311_v13  ;;  %8604 = vmatprep.subr.bf16.mxu1 %v9311_v13 }
 0x985   :  { %v3207_v7 = vpop.f32.mrf.mxu0  ;;  %v3252_v60 = vpop.f32.mrf.mxu1 }
 0x986   :  { %v3213_v61 = vpack.c.bf16 %v3207_v7, %v3207_v7  ;;  %v3258_v3 = vpack.c.bf16 %v3252_v60, %v3252_v60  ;;  %v9046_v7 = vld [vmem:[#allocation2 + $0x7f8] sm:$0xff]   ;;  %v9047_v60 = vld [vmem:[#allocation2 + $0x7a0] sm:$0xff]  }
 0x987   :  { %v8578_v4 = vpop.f32.mrf.mxu0  ;;  %v8584_v8 = vpop.f32.mrf.mxu1 }
 0x988   :  { %3638 = vmatprep.mubr.bf16.mxu0 %v3258_v3  ;;  %v9049_v3 = vld [vmem:[#allocation2 + $0x760] sm:$0xff]   ;;  %v9050_v4 = vld [vmem:[#allocation2 + $0x7f0] sm:$0xff]   ;;  %v9051_v8 = vld [vmem:[#allocation2 + $0x828] sm:$0xff]  }
 0x989   :  { %v3210_v58 = vpop.f32.mrf.mxu0  ;;  %v3255_v59 = vpop.f32.mrf.mxu1  ;;  %3639 = vmatmul.mubr.bf16.vlgmr.msra.gmra.mxu0 %v3213_v61  ;;  %v9048_v61 = vld [vmem:[#allocation2 + $0x830] sm:$0xff]  }
 0x98a   :  { %8600 = vmatprep.mubr.msk.bf16.mxu0 %vm9312_vm1, %v9311_v13  ;;  %v9052_v58 = vld [vmem:[#allocation2 + $0x7e8] sm:$0xff]   ;;  %v9053_v59 = vld [vmem:[#allocation2 + $0x820] sm:$0xff]  }
 0x98b   :  { %v8579_v9 = vpop.f32.mrf.mxu0  ;;  %v8585_v10 = vpop.f32.mrf.mxu1 }
 0x98c   :  { %v9054_v9 = vld [vmem:[#allocation2 + $0x7e0] sm:$0xff]  }
 0x98d   :  { %v3297_v11 = vpop.f32.mrf.mxu0  ;;  %v3342_v12 = vpop.f32.mrf.mxu1 }
 0x98e   :  { %v3303_v14 = vpack.c.bf16 %v3297_v11, %v3297_v11  ;;  %v3348_v15 = vpack.c.bf16 %v3342_v12, %v3342_v12 }
 0x98f   :  { %v8590_v16 = vpop.f32.mrf.mxu0  ;;  %v8596_v17 = vpop.f32.mrf.mxu1 }
 0x990   :  { %3678 = vmatprep.mubr.bf16.mxu1 %v3348_v15 }
 0x991   :  { %v3300_v18 = vpop.f32.mrf.mxu0  ;;  %v3345_v19 = vpop.f32.mrf.mxu1  ;;  %3679 = vmatmul.mubr.bf16.vlgmr.msra.gmra.mxu1 %v3303_v14 }
 0x992   :  { %8606 = vmatprep.mubr.msk.bf16.mxu1 %vm9312_vm1, %v9311_v13 }
 0x993   :  { %v8591_v20 = vpop.f32.mrf.mxu0  ;;  %v8597_v21 = vpop.f32.mrf.mxu1 }
 0xa49   :  { %v7922_v22 = vpop.f32.mrf.mxu0 }
 0xa4b   :  { %v7923_v23 = vpop.f32.mrf.mxu0 }
 0xa4c   :  { %v7924_v28 = vadd.f32 %v7923_v23, %v7922_v22 }
 0xa4d   :  { %v7925_v24 = vpop.f32.mrf.mxu0 }
 0xa4f   :  { %v7926_v25 = vpop.f32.mrf.mxu0 }
 0xa51   :  { %v7944_v26 = vpop.f32.mrf.mxu1 }
 0xa53   :  { %v7945_v27 = vpop.f32.mrf.mxu1 }
 0xa54   :  { %v7946_v29 = vadd.f32 %v7945_v27, %v7944_v26 }
 0xa55   :  { %v7947_v31 = vpop.f32.mrf.mxu1 }
 0xa56   :  { %v3681_v32 = vadd.f32 %v7946_v29, %v7924_v28  ;;  %v9055_v31 = vld [vmem:[#allocation2 + $0x860] sm:$0xff]  }
 0xa57   :  { %v7948_v33 = vpop.f32.mrf.mxu1 }
 0xa58   :  { %v3690_v34 = vadd.f32 %v7277_v30, %v3681_v32  ;;  %v9056_v32 = vld [vmem:[#allocation2 + $0x870] sm:$0xff]  }
 0xa5a   :  { %v3691_v35 = vmul.f32 0.2, %v3690_v34 }
 0xa5c   :  { %v3692_v36 = vmax.f32 %v3690_v34, %v3691_v35 }
 0xa5e   :  { %v3693_v37 = vpack.c.bf16 %v3692_v36, %v3692_v36 }
 0xa60   :  { %v3705_v38 = vsel %vm2639_vm4, %v3693_v37, 0 }
 0xa61   :  { %8599 = vmatpush3.bf16.msra.mxu0 %v3705_v38  ;;  %8605 = vmatpush3.bf16.msra.mxu1 %v3705_v38 }
 0xa62   :  { %8610 = vmatprep.subr.bf16.mxu0 %v9311_v13  ;;  %8616 = vmatprep.subr.bf16.mxu1 %v9311_v13 }
 0xa64   :  { %8601 = vmatmul.mubr.msk.bf16.vlgmr.msra.gmra.mxu0 %vm2635_vm5, %v9019_v39  ;;  %8607 = vmatmul.mubr.msk.bf16.vlgmr.msra.gmra.mxu1 %vm2635_vm5, %v9020_v40 }
 0xa65   :  { %8611 = vmatpush3.bf16.msra.mxu0 %v3705_v38  ;;  %8617 = vmatpush3.bf16.msra.mxu1 %v3705_v38 }
 0xa66   :  { %8612 = vmatprep.mubr.msk.bf16.mxu0 %vm9312_vm1, %v9311_v13  ;;  %8618 = vmatprep.mubr.msk.bf16.mxu1 %vm9312_vm1, %v9311_v13  ;;  %v9036_v13 = vld [vmem:[#allocation2 + $0x848] sm:$0xff]  }
 0xa67   :  { %7958 = vmatprep.subr.bf16.mxu0 %v9023_v41  ;;  %7980 = vmatprep.subr.bf16.mxu1 %v9028_v42  ;;  %v7318_v41 = vld [vmem:[#allocation5 + $0x30] ss:$0 sm:$0xff] }
 0xa6c   :  { %8613 = vmatmul.mubr.msk.bf16.vlgmr.msra.gmra.mxu0 %vm2635_vm5, %v9021_v43  ;;  %8619 = vmatmul.mubr.msk.bf16.vlgmr.msra.gmra.mxu1 %vm2635_vm5, %v9022_v44 }
 0xa6d   :  { %7959 = vmatpush3.bf16.msra.mxu0 %v9024_v45  ;;  %7981 = vmatpush3.bf16.msra.mxu1 %v9030_v46 }
 0xa6e   :  { %7960 = vmatprep.subr.bf16.mxu0 %v9025_v47  ;;  %7982 = vmatprep.subr.bf16.mxu1 %v9032_v48 }
 0xa71   :  { %7961 = vmatpush3.bf16.msra.mxu0 %v9026_v49  ;;  %7983 = vmatpush3.bf16.msra.mxu1 %v9034_v50 }
 0xa72   :  { %7962 = vmatprep.subr.bf16.mxu0 %v9027_v51  ;;  %7984 = vmatprep.subr.bf16.mxu1 %v9036_v13 }
 0xa75   :  { %7963 = vmatpush3.bf16.msra.mxu0 %v9029_v52  ;;  %7985 = vmatpush3.bf16.msra.mxu1 %v9038_v53 }
 0xa76   :  { %7964 = vmatprep.subr.bf16.mxu0 %v9031_v54  ;;  %7986 = vmatprep.subr.bf16.mxu1 %v9040_v55  ;;  %v9057_v54 = vld [vmem:[#allocation2 + $0x868] sm:$0xff]   ;;  %v9058_v55 = vld [vmem:[#allocation2 + $0x878] sm:$0xff]  }
 0xa79   :  { %7965 = vmatpush3.bf16.msra.mxu0 %v9033_v56  ;;  %7987 = vmatpush3.bf16.msra.mxu1 %v9042_v57  ;;  %v9059_v56 = vld [vmem:[#allocation2 + $0x880] sm:$0xff]   ;;  %v9060_v57 = vld [vmem:[#allocation2 + $0x890] sm:$0xff]  }
 0xa7a   :  { %7966 = vmatprep.subr.bf16.mxu0 %v9035_v62  ;;  %7988 = vmatprep.subr.bf16.mxu1 %v9044_v5  ;;  %v9063_v62 = vld [vmem:[#allocation2 + $0x918] sm:$0xff]  }
 0xa7b   :  { %v9070_v5 = vld [vmem:[#allocation2 + $0x958] sm:$0xff]  }
 0xa7d   :  { %7967 = vmatpush3.bf16.msra.mxu0 %v9037_v63  ;;  %7989 = vmatpush3.bf16.msra.mxu1 %v9046_v7  ;;  %v9068_v63 = vld [vmem:[#allocation2 + $0x998] sm:$0xff]   ;;  %v9072_v7 = vld [vmem:[#allocation2 + $0x990] sm:$0xff]  }
 0xa7e   :  { %7968 = vmatprep.subr.bf16.mxu0 %v9039_v0  ;;  %7990 = vmatprep.subr.bf16.mxu1 %v9048_v61  ;;  %v9061_v0 = vld [vmem:[#allocation2 + $0x888] sm:$0xff]   ;;  %v9074_v61 = vld [vmem:[#allocation2 + $0x950] sm:$0xff]  }
 0xa81   :  { %7969 = vmatpush3.bf16.msra.mxu0 %v9041_v1  ;;  %7991 = vmatpush3.bf16.msra.mxu1 %v9050_v4  ;;  %v9062_v1 = vld [vmem:[#allocation2 + $0x898] sm:$0xff]   ;;  %v9076_v4 = vld [vmem:[#allocation2 + $0x988] sm:$0xff]  }
 0xa82   :  { %7970 = vmatprep.subr.bf16.mxu0 %v9043_v2  ;;  %7992 = vmatprep.subr.bf16.mxu1 %v9051_v8  ;;  %v9064_v2 = vld [vmem:[#allocation2 + $0x8d8] sm:$0xff]   ;;  %v9069_v8 = vld [vmem:[#allocation2 + $0x8c8] sm:$0xff]  }
 0xa85   :  { %7971 = vmatpush3.bf16.msra.mxu0 %v9045_v6  ;;  %7993 = vmatpush3.bf16.msra.mxu1 %v9052_v58  ;;  %v9065_v6 = vld [vmem:[#allocation2 + $0x910] sm:$0xff]   ;;  %v9078_v58 = vld [vmem:[#allocation2 + $0x948] sm:$0xff]  }
 0xa86   :  { %7972 = vmatprep.subr.bf16.mxu0 %v9047_v60  ;;  %7994 = vmatprep.subr.bf16.mxu1 %v9053_v59  ;;  %v9066_v60 = vld [vmem:[#allocation2 + $0x8d0] sm:$0xff]   ;;  %v9071_v59 = vld [vmem:[#allocation2 + $0x900] sm:$0xff]  }
 0xa89   :  { %7973 = vmatpush3.bf16.msra.mxu0 %v9049_v3  ;;  %7995 = vmatpush3.bf16.msra.mxu1 %v9054_v9  ;;  %v9067_v3 = vld [vmem:[#allocation2 + $0x908] sm:$0xff]   ;;  %v9080_v9 = vld [vmem:[#allocation2 + $0x980] sm:$0xff]  }
 0xb24   :  { %v3741_v10 = vpop.f32.mrf.mxu0  ;;  %v3793_v11 = vpop.f32.mrf.mxu1 }
 0xb26   :  { %v8602_v12 = vpop.f32.mrf.mxu0  ;;  %v8608_v14 = vpop.f32.mrf.mxu1 }
 0xb27   :  { %v9075_v12 = vld [vmem:[#allocation2 + $0x8f8] sm:$0xff]  }
 0xb28   :  { %v3744_v15 = vpop.f32.mrf.mxu0  ;;  %v3796_v16 = vpop.f32.mrf.mxu1  ;;  %v9077_v14 = vld [vmem:[#allocation2 + $0x8b8] sm:$0xff]  }
 0xb29   :  { %v3748_v17 = vpack.c.bf16 %v3744_v15, %v3741_v10  ;;  %v3800_v18 = vpack.c.bf16 %v3796_v16, %v3793_v11  ;;  %v9073_v10 = vld [vmem:[#allocation2 + $0x8c0] sm:$0xff]   ;;  %v9079_v15 = vld [vmem:[#allocation2 + $0x8f0] sm:$0xff]  }
 0xb2a   :  { %v8603_v19 = vpop.f32.mrf.mxu0  ;;  %v8609_v20 = vpop.f32.mrf.mxu1  ;;  %v9082_v11 = vld [vmem:[#allocation2 + $0x940] sm:$0xff]   ;;  %v9081_v16 = vld [vmem:[#allocation2 + $0x8b0] sm:$0xff]  }
 0xb2b   :  { %4194 = vmatprep.mubr.bf16.mxu0 %v3800_v18  ;;  %v9084_v18 = vld [vmem:[#allocation2 + $0x978] sm:$0xff]   ;;  %v9085_v19 = vld [vmem:[#allocation2 + $0x8a8] sm:$0xff]  }
 0xb2c   :  { %v3845_v21 = vpop.f32.mrf.mxu0  ;;  %v3897_v22 = vpop.f32.mrf.mxu1  ;;  %4195 = vmatmul.mubr.bf16.vlgmr.msra.gmra.mxu0 %v3748_v17  ;;  %v9083_v17 = vld [vmem:[#allocation2 + $0x8e8] sm:$0xff]   ;;  %v9086_v20 = vld [vmem:[#allocation2 + $0x938] sm:$0xff]  }
 0xb2d   :  { %8624 = vmatprep.mubr.msk.bf16.mxu0 %vm2109_vm3, %v9055_v31 }
 0xb2e   :  { %v8614_v23 = vpop.f32.mrf.mxu0  ;;  %v8620_v24 = vpop.f32.mrf.mxu1 }
 0xb2f   :  { %v9089_v23 = vld [vmem:[#allocation2 + $0x8a0] sm:$0xff]   ;;  %v9090_v24 = vld [vmem:[#allocation2 + $0x930] sm:$0xff]  }
 0xb30   :  { %v3848_v25 = vpop.f32.mrf.mxu0  ;;  %v3900_v26 = vpop.f32.mrf.mxu1 }
 0xb31   :  { %v3852_v27 = vpack.c.bf16 %v3848_v25, %v3845_v21  ;;  %v3904_v28 = vpack.c.bf16 %v3900_v26, %v3897_v22  ;;  %v9087_v21 = vld [vmem:[#allocation2 + $0x8e0] sm:$0xff]   ;;  %v9088_v22 = vld [vmem:[#allocation2 + $0x970] sm:$0xff]   ;;  %v9091_v25 = vld [vmem:[#allocation2 + $0x968] sm:$0xff]  }
 0xb32   :  { %v8615_v29 = vpop.f32.mrf.mxu0  ;;  %v8621_v30 = vpop.f32.mrf.mxu1  ;;  %v9092_v26 = vld [vmem:[#allocation2 + $0x928] sm:$0xff]  }
 0xb33   :  { %4235 = vmatprep.mubr.bf16.mxu1 %v3904_v28  ;;  %v9094_v28 = vld [vmem:[#allocation2 + $0x920] sm:$0xff]  }
 0xb34   :  { %4236 = vmatmul.mubr.bf16.vlgmr.msra.gmra.mxu1 %v3852_v27  ;;  %v9093_v27 = vld [vmem:[#allocation2 + $0x960] sm:$0xff]  }
 0xb35   :  { %8630 = vmatprep.mubr.msk.bf16.mxu1 %vm2109_vm3, %v9056_v32 }
 0xbec   :  { %v7974_v33 = vpop.f32.mrf.mxu0 }
 0xbee   :  { %v7975_v34 = vpop.f32.mrf.mxu0 }
 0xbef   :  { %v7976_v38 = vadd.f32 %v7975_v34, %v7974_v33 }
 0xbf0   :  { %v7977_v35 = vpop.f32.mrf.mxu0 }
 0xbf2   :  { %v7978_v40 = vpop.f32.mrf.mxu0 }
 0xbf3   :  { %v7979_v45 = vadd.f32 %v7978_v40, %v7977_v35 }
 0xbf4   :  { %v7996_v36 = vpop.f32.mrf.mxu1 }
 0xbf6   :  { %v7997_v37 = vpop.f32.mrf.mxu1 }
 0xbf7   :  { %v7998_v39 = vadd.f32 %v7997_v37, %v7996_v36 }
 0xbf8   :  { %v7999_v42 = vpop.f32.mrf.mxu1 }
 0xbf9   :  { %v4238_v43 = vadd.f32 %v7998_v39, %v7976_v38 }
 0xbfa   :  { %v8000_v44 = vpop.f32.mrf.mxu1 }
 0xbfb   :  { %v4248_v46 = vadd.f32 %v7318_v41, %v4238_v43  ;;  %v8001_v47 = vadd.f32 %v8000_v44, %v7999_v42 }
 0xbfd   :  { %v4241_v48 = vadd.f32 %v8001_v47, %v7979_v45  ;;  %v4250_v49 = vmul.f32 0.2, %v4248_v46 }
 0xbff   :  { %v4249_v50 = vadd.f32 %v7318_v41, %v4241_v48  ;;  %v4252_v13 = vmax.f32 %v4248_v46, %v4250_v49 }
 0xc01   :  { %v4251_v51 = vmul.f32 0.2, %v4249_v50 }
 0xc03   :  { %v4253_v52 = vmax.f32 %v4249_v50, %v4251_v51 }
 0xc05   :  { %v4254_v53 = vpack.c.bf16 %v4253_v52, %v4252_v13  ;;  %v9095_v52 = vld [vmem:[#allocation2 + $0x9a0] sm:$0xff]  }
 0xc07   :  { %8622 = vmatprep.subr.bf16.mxu0 %v4254_v53  ;;  %8628 = vmatprep.subr.bf16.mxu1 %v4254_v53 }
 0xc08   :  { %8623 = vmatpush3.bf16.msra.mxu0 %v4254_v53  ;;  %8629 = vmatpush3.bf16.msra.mxu1 %v4254_v53 }
 0xc09   :  { %8634 = vmatprep.subr.bf16.mxu0 %v4254_v53  ;;  %8640 = vmatprep.subr.bf16.mxu1 %v4254_v53 }
 0xc0b   :  { %8625 = vmatmul.mubr.msk.bf16.vlgmr.msra.gmra.mxu0 %vm2109_vm3, %v9057_v54  ;;  %8631 = vmatmul.mubr.msk.bf16.vlgmr.msra.gmra.mxu1 %vm2109_vm3, %v9058_v55 }
 0xc0c   :  { %8635 = vmatpush3.bf16.msra.mxu0 %v4254_v53  ;;  %8641 = vmatpush3.bf16.msra.mxu1 %v4254_v53  ;;  %v9096_v53 = vld [vmem:[#allocation2 + $0x9c0] sm:$0xff]  }
 0xc0d   :  { %8636 = vmatprep.mubr.msk.bf16.mxu0 %vm2109_vm3, %v9059_v56  ;;  %8642 = vmatprep.mubr.msk.bf16.mxu1 %vm2109_vm3, %v9060_v57 }
 0xc0e   :  { %8014 = vmatprep.subr.bf16.mxu0 %v9063_v62  ;;  %8042 = vmatprep.subr.bf16.mxu1 %v9068_v63 }
 0xc13   :  { %8637 = vmatmul.mubr.msk.bf16.vlgmr.msra.gmra.mxu0 %vm2109_vm3, %v9061_v0  ;;  %8643 = vmatmul.mubr.msk.bf16.vlgmr.msra.gmra.mxu1 %vm2109_vm3, %v9062_v1 }
 0xc14   :  { %8015 = vmatpush3.bf16.msra.mxu0 %v9064_v2  ;;  %8043 = vmatpush3.bf16.msra.mxu1 %v9070_v5 }
 0xc15   :  { %8016 = vmatprep.subr.bf16.mxu0 %v9065_v6  ;;  %8044 = vmatprep.subr.bf16.mxu1 %v9072_v7 }
 0xc18   :  { %8017 = vmatpush3.bf16.msra.mxu0 %v9066_v60  ;;  %8045 = vmatpush3.bf16.msra.mxu1 %v9074_v61 }
 0xc19   :  { %8018 = vmatprep.subr.bf16.mxu0 %v9067_v3  ;;  %8046 = vmatprep.subr.bf16.mxu1 %v9076_v4 }
 0xc1c   :  { %8019 = vmatpush3.bf16.msra.mxu0 %v9069_v8  ;;  %8047 = vmatpush3.bf16.msra.mxu1 %v9078_v58 }
 0xc1d   :  { %8020 = vmatprep.subr.bf16.mxu0 %v9071_v59  ;;  %8048 = vmatprep.subr.bf16.mxu1 %v9080_v9 }
 0xc20   :  { %8021 = vmatpush3.bf16.msra.mxu0 %v9073_v10  ;;  %8049 = vmatpush3.bf16.msra.mxu1 %v9082_v11 }
 0xc21   :  { %8022 = vmatprep.subr.bf16.mxu0 %v9075_v12  ;;  %8050 = vmatprep.subr.bf16.mxu1 %v9084_v18 }
 0xc24   :  { %8023 = vmatpush3.bf16.msra.mxu0 %v9077_v14  ;;  %8051 = vmatpush3.bf16.msra.mxu1 %v9086_v20 }
 0xc25   :  { %8024 = vmatprep.subr.bf16.mxu0 %v9079_v15  ;;  %8052 = vmatprep.subr.bf16.mxu1 %v9088_v22  ;;  %v7367_v15 = vld [vmem:[#allocation5 + $0x38] ss:$0 sm:$0xff] }
 0xc28   :  { %8025 = vmatpush3.bf16.msra.mxu0 %v9081_v16  ;;  %8053 = vmatpush3.bf16.msra.mxu1 %v9090_v24 }
 0xc29   :  { %8026 = vmatprep.subr.bf16.mxu0 %v9083_v17  ;;  %8054 = vmatprep.subr.bf16.mxu1 %v9091_v25 }
 0xc2c   :  { %8027 = vmatpush3.bf16.msra.mxu0 %v9085_v19  ;;  %8055 = vmatpush3.bf16.msra.mxu1 %v9092_v26 }
 0xc2d   :  { %8028 = vmatprep.subr.bf16.mxu0 %v9087_v21  ;;  %8056 = vmatprep.subr.bf16.mxu1 %v9093_v27 }
 0xc30   :  { %8029 = vmatpush3.bf16.msra.mxu0 %v9089_v23  ;;  %8057 = vmatpush3.bf16.msra.mxu1 %v9094_v28 }
 0xccb   :  { %v8626_v29 = vpop.f32.mrf.mxu0  ;;  %v8632_v30 = vpop.f32.mrf.mxu1 }
 0xccd   :  { %v4309_v31 = vpop.f32.mrf.mxu0  ;;  %v4380_v32 = vpop.f32.mrf.mxu1 }
 0xccf   :  { %v8627_v33 = vpop.f32.mrf.mxu0  ;;  %v8633_v34 = vpop.f32.mrf.mxu1 }
 0xcd0   :  { %v4396_v41 = vpack.c.bf16 %v8633_v34, %v8632_v30  ;;  %v4325_v50 = vpack.c.bf16 %v8627_v33, %v8626_v29  ;;  %v9097_v34 = vld [vmem:[#allocation2 + $0x9a8] sm:$0xff]  }
 0xcd1   :  { %v4312_v35 = vpop.f32.mrf.mxu0  ;;  %v4383_v36 = vpop.f32.mrf.mxu1 }
 0xcd2   :  { %v4324_v37 = vpack.c.bf16 %v4312_v35, %v4309_v31  ;;  %v4395_v38 = vpack.c.bf16 %v4383_v36, %v4380_v32  ;;  %v9098_v35 = vld [vmem:[#allocation2 + $0x9c8] sm:$0xff]   ;;  %v9099_v36 = vld [vmem:[#allocation2 + $0x9b0] sm:$0xff]  }
 0xcd3   :  { %v8638_v39 = vpop.f32.mrf.mxu0  ;;  %v8644_v40 = vpop.f32.mrf.mxu1 }
 0xcd4   :  { %4828 = vmatprep.mubr.bf16.mxu0 %v4395_v38  ;;  %v9111_v38 = vld [vmem:[#allocation2 + $0xa98] sm:$0xff]  }
 0xcd5   :  { %v4451_v42 = vpop.f32.mrf.mxu0  ;;  %v4522_v43 = vpop.f32.mrf.mxu1  ;;  %4829 = vmatmul.mubr.bf16.vlgmr.msra.gmra.mxu0 %v4324_v37  ;;  %v9100_v37 = vld [vmem:[#allocation2 + $0x9d0] sm:$0xff]  }
 0xcd6   :  { %4836 = vmatprep.mubr.bf16.mxu0 %v4396_v41  ;;  %v9102_v41 = vld [vmem:[#allocation2 + $0x9d8] sm:$0xff]  }
 0xcd7   :  { %v8639_v44 = vpop.f32.mrf.mxu0  ;;  %v8645_v45 = vpop.f32.mrf.mxu1 }
 0xcd8   :  { %v4538_v51 = vpack.c.bf16 %v8645_v45, %v8644_v40  ;;  %v4467_v13 = vpack.c.bf16 %v8639_v44, %v8638_v39  ;;  %v9120_v39 = vld [vmem:[#allocation2 + $0xb18] sm:$0xff]   ;;  %v9105_v44 = vld [vmem:[#allocation2 + $0x9e8] sm:$0xff]  }
 0xcd9   :  { %v4454_v46 = vpop.f32.mrf.mxu0  ;;  %v4525_v47 = vpop.f32.mrf.mxu1  ;;  %v9101_v40 = vld [vmem:[#allocation2 + $0x9b8] sm:$0xff]   ;;  %v9106_v45 = vld [vmem:[#allocation2 + $0xa08] sm:$0xff]  }
 0xcda   :  { %v4466_v48 = vpack.c.bf16 %v4454_v46, %v4451_v42  ;;  %v4537_v49 = vpack.c.bf16 %v4525_v47, %v4522_v43  ;;  %v9103_v42 = vld [vmem:[#allocation2 + $0x9e0] sm:$0xff]   ;;  %v9107_v46 = vld [vmem:[#allocation2 + $0xa10] sm:$0xff]  }
 0xcdb   :  { %v9104_v43 = vld [vmem:[#allocation2 + $0xa00] sm:$0xff]   ;;  %v9108_v47 = vld [vmem:[#allocation2 + $0x9f0] sm:$0xff]  }
 0xcdc   :  { %4877 = vmatprep.mubr.bf16.mxu1 %v4537_v49  ;;  %v9122_v49 = vld [vmem:[#allocation2 + $0xad8] sm:$0xff]  }
 0xcdd   :  { %4837 = vmatmul.mubr.bf16.gmra.mxu0 %v4325_v50  ;;  %4878 = vmatmul.mubr.bf16.vlgmr.msra.gmra.mxu1 %v4466_v48  ;;  %v9112_v48 = vld [vmem:[#allocation2 + $0xa58] sm:$0xff]   ;;  %v9113_v50 = vld [vmem:[#allocation2 + $0xa90] sm:$0xff]  }
 0xcde   :  { %4885 = vmatprep.mubr.bf16.mxu1 %v4538_v51  ;;  %8650 = vmatprep.mubr.msk.bf16.mxu0 %vm1556_vm2, %v9095_v52  ;;  %v9124_v51 = vld [vmem:[#allocation2 + $0xb10] sm:$0xff]  }
 0xcdf   :  { %v9126_v52 = vld [vmem:[#allocation2 + $0xad0] sm:$0xff]  }
 0xce5   :  { %4886 = vmatmul.mubr.bf16.gmra.mxu1 %v4467_v13  ;;  %v9114_v13 = vld [vmem:[#allocation2 + $0xa50] sm:$0xff]  }
 0xce6   :  { %8662 = vmatprep.mubr.msk.bf16.mxu1 %vm1556_vm2, %v9096_v53  ;;  %v9115_v53 = vld [vmem:[#allocation2 + $0xa88] sm:$0xff]  }
 0xd95   :  { %v8030_v54 = vpop.f32.mrf.mxu0 }
 0xd97   :  { %v8031_v55 = vpop.f32.mrf.mxu0 }
 0xd98   :  { %v8032_v8 = vadd.f32 %v8031_v55, %v8030_v54  ;;  %v9109_v54 = vld [vmem:[#allocation2 + $0xa18] sm:$0xff]  }
 0xd99   :  { %v8033_v56 = vpop.f32.mrf.mxu0  ;;  %v9110_v55 = vld [vmem:[#allocation2 + $0x9f8] sm:$0xff]  }
 0xd9b   :  { %v8034_v57 = vpop.f32.mrf.mxu0 }
 0xd9c   :  { %v8035_v61 = vadd.f32 %v8034_v57, %v8033_v56  ;;  %v9116_v56 = vld [vmem:[#allocation2 + $0xa48] sm:$0xff]   ;;  %v9117_v57 = vld [vmem:[#allocation2 + $0xa80] sm:$0xff]  }
 0xd9d   :  { %v8036_v62 = vpop.f32.mrf.mxu0  ;;  %v8058_v63 = vpop.f32.mrf.mxu1 }
 0xd9f   :  { %v8059_v0 = vpop.f32.mrf.mxu1  ;;  %v8037_v1 = vpop.f32.mrf.mxu0 }
 0xda0   :  { %v8060_v3 = vadd.f32 %v8059_v0, %v8058_v63  ;;  %v8038_v58 = vadd.f32 %v8037_v1, %v8036_v62  ;;  %v9118_v62 = vld [vmem:[#allocation2 + $0xa40] sm:$0xff]   ;;  %v9119_v63 = vld [vmem:[#allocation2 + $0xa78] sm:$0xff]   ;;  %v9123_v1 = vld [vmem:[#allocation2 + $0xa70] sm:$0xff]  }
 0xda1   :  { %v8061_v2 = vpop.f32.mrf.mxu1  ;;  %v8039_v7 = vpop.f32.mrf.mxu0  ;;  %v9121_v0 = vld [vmem:[#allocation2 + $0xa38] sm:$0xff]  }
 0xda2   :  { %v4880_v12 = vadd.f32 %v8060_v3, %v8032_v8  ;;  %v9132_v3 = vld [vmem:[#allocation2 + $0xb00] sm:$0xff]  }
 0xda3   :  { %v8062_v5 = vpop.f32.mrf.mxu1  ;;  %v8040_v10 = vpop.f32.mrf.mxu0  ;;  %v9134_v8 = vld [vmem:[#allocation2 + $0xac0] sm:$0xff]  }
 0xda4   :  { %v8063_v6 = vadd.f32 %v8062_v5, %v8061_v2  ;;  %v8041_v17 = vadd.f32 %v8040_v10, %v8039_v7  ;;  %v4898_v21 = vadd.f32 %v7367_v15, %v4880_v12  ;;  %v9125_v2 = vld [vmem:[#allocation2 + $0xa30] sm:$0xff]   ;;  %v9127_v5 = vld [vmem:[#allocation2 + $0xa68] sm:$0xff]  }
 0xda5   :  { %v8064_v60 = vpop.f32.mrf.mxu1  ;;  %v9129_v7 = vld [vmem:[#allocation2 + $0xa28] sm:$0xff]   ;;  %v9138_v10 = vld [vmem:[#allocation2 + $0xab0] sm:$0xff]  }
 0xda6   :  { %v4883_v59 = vadd.f32 %v8063_v6, %v8035_v61  ;;  %v4902_v26 = vmul.f32 0.2, %v4898_v21  ;;  %v9128_v6 = vld [vmem:[#allocation2 + $0xb08] sm:$0xff]   ;;  %v9131_v61 = vld [vmem:[#allocation2 + $0xa60] sm:$0xff]  }
 0xda7   :  { %v8065_v4 = vpop.f32.mrf.mxu1  ;;  %v9140_v12 = vld [vmem:[#allocation2 + $0xaa8] sm:$0xff]  }
 0xda8   :  { %v8066_v9 = vadd.f32 %v8065_v4, %v8064_v60  ;;  %v4899_v18 = vadd.f32 %v7367_v15, %v4883_v59  ;;  %v4906_v31 = vmax.f32 %v4898_v21, %v4902_v26  ;;  %v9130_v60 = vld [vmem:[#allocation2 + $0xac8] sm:$0xff]   ;;  %v9133_v4 = vld [vmem:[#allocation2 + $0xa20] sm:$0xff]   ;;  %v9136_v59 = vld [vmem:[#allocation2 + $0xab8] sm:$0xff]  }
 0xda9   :  { %v8067_v11 = vpop.f32.mrf.mxu1 }
 0xdaa   :  { %v4888_v14 = vadd.f32 %v8066_v9, %v8038_v58  ;;  %v4903_v23 = vmul.f32 0.2, %v4899_v18  ;;  %v9135_v58 = vld [vmem:[#allocation2 + $0xaf8] sm:$0xff]   ;;  %v9137_v9 = vld [vmem:[#allocation2 + $0xaf0] sm:$0xff]  }
 0xdab   :  { %v8068_v16 = vpop.f32.mrf.mxu1 }
 0xdac   :  { %v4900_v19 = vadd.f32 %v7367_v15, %v4888_v14  ;;  %v8069_v20 = vadd.f32 %v8068_v16, %v8067_v11  ;;  %v4907_v28 = vmax.f32 %v4899_v18, %v4903_v23  ;;  %v9139_v11 = vld [vmem:[#allocation2 + $0xae8] sm:$0xff]   ;;  %v9141_v14 = vld [vmem:[#allocation2 + $0xae0] sm:$0xff]  }
 0xdae   :  { %v4891_v22 = vadd.f32 %v8069_v20, %v8041_v17  ;;  %v4904_v24 = vmul.f32 0.2, %v4900_v19  ;;  %v4910_v33 = vpack.c.bf16 %v4907_v28, %v4906_v31 }
 0xdb0   :  { %v4901_v25 = vadd.f32 %v7367_v15, %v4891_v22  ;;  %v4908_v29 = vmax.f32 %v4900_v19, %v4904_v24  ;;  %v9142_v15 = vld [vmem:[#allocation2 + $0xaa0] sm:$0xff]  }
 0xdb2   :  { %v4905_v27 = vmul.f32 0.2, %v4901_v25 }
 0xdb4   :  { %v4909_v30 = vmax.f32 %v4901_v25, %v4905_v27 }
 0xdb6   :  { %v4911_v32 = vpack.c.bf16 %v4909_v30, %v4908_v29 }
 0xdb8   :  { %8646 = vmatprep.subr.bf16.mxu0 %v4911_v32  ;;  %8658 = vmatprep.subr.bf16.mxu1 %v4911_v32 }
 0xdb9   :  { %8647 = vmatpush3.bf16.msra.mxu0 %v4911_v32  ;;  %8659 = vmatpush3.bf16.msra.mxu1 %v4911_v32 }
 0xdba   :  { %8648 = vmatprep.subr.bf16.mxu0 %v4910_v33  ;;  %8660 = vmatprep.subr.bf16.mxu1 %v4910_v33 }
 0xdbd   :  { %8649 = vmatpush3.bf16.msra.mxu0 %v4910_v33  ;;  %8661 = vmatpush3.bf16.msra.mxu1 %v4910_v33 }
 0xdbe   :  { %8670 = vmatprep.subr.bf16.mxu0 %v4911_v32  ;;  %8682 = vmatprep.subr.bf16.mxu1 %v4911_v32 }
 0xdc0   :  { %8651 = vmatmul.mubr.msk.bf16.vlgmr.msra.gmra.mxu0 %vm1556_vm2, %v9097_v34  ;;  %8663 = vmatmul.mubr.msk.bf16.vlgmr.msra.gmra.mxu1 %vm1556_vm2, %v9098_v35 }
 0xdc1   :  { %8671 = vmatpush3.bf16.msra.mxu0 %v4911_v32  ;;  %8683 = vmatpush3.bf16.msra.mxu1 %v4911_v32 }
 0xdc2   :  { %8672 = vmatprep.subr.bf16.mxu0 %v4910_v33  ;;  %8684 = vmatprep.subr.bf16.mxu1 %v4910_v33 }
 0xdc3   :  { %8654 = vmatprep.mubr.msk.bf16.mxu0 %vm1556_vm2, %v9099_v36  ;;  %8666 = vmatprep.mubr.msk.bf16.mxu1 %vm1556_vm2, %v9100_v37 }
 0xdc5   :  { %8673 = vmatpush3.bf16.msra.mxu0 %v4910_v33  ;;  %8685 = vmatpush3.bf16.msra.mxu1 %v4910_v33 }
 0xdc6   :  { %8094 = vmatprep.subr.bf16.mxu0 %v9111_v38  ;;  %8134 = vmatprep.subr.bf16.mxu1 %v9120_v39 }
 0xdc8   :  { %8655 = vmatmul.mubr.msk.bf16.gmra.mxu0 %vm1556_vm2, %v9101_v40  ;;  %8667 = vmatmul.mubr.msk.bf16.gmra.mxu1 %vm1556_vm2, %v9102_v41 }
 0xdc9   :  { %8674 = vmatprep.mubr.msk.bf16.mxu0 %vm1556_vm2, %v9103_v42  ;;  %8686 = vmatprep.mubr.msk.bf16.mxu1 %vm1556_vm2, %v9104_v43 }
 0xdd0   :  { %8675 = vmatmul.mubr.msk.bf16.vlgmr.msra.gmra.mxu0 %vm1556_vm2, %v9105_v44  ;;  %8687 = vmatmul.mubr.msk.bf16.vlgmr.msra.gmra.mxu1 %vm1556_vm2, %v9106_v45 }
 0xdd1   :  { %8690 = vmatprep.mubr.msk.bf16.mxu1 %vm1556_vm2, %v9107_v46  ;;  %8678 = vmatprep.mubr.msk.bf16.mxu0 %vm1556_vm2, %v9108_v47 }
 0xdd2   :  { %8095 = vmatpush3.bf16.msra.mxu0 %v9112_v48  ;;  %8135 = vmatpush3.bf16.msra.mxu1 %v9122_v49 }
 0xdd3   :  { %8096 = vmatprep.subr.bf16.mxu0 %v9113_v50  ;;  %8136 = vmatprep.subr.bf16.mxu1 %v9124_v51 }
 0xdd6   :  { %8097 = vmatpush3.bf16.msra.mxu0 %v9114_v13  ;;  %8137 = vmatpush3.bf16.msra.mxu1 %v9126_v52 }
 0xdd7   :  { %8098 = vmatprep.subr.bf16.mxu0 %v9115_v53  ;;  %8138 = vmatprep.subr.bf16.mxu1 %v9128_v6  ;;  %v9144_v6 = vld [vmem:[#allocation2 + $0xb20] sm:$0xff]  }
 0xdd8   :  { %8691 = vmatmul.mubr.msk.bf16.gmra.mxu1 %vm1556_vm2, %v9109_v54  ;;  %8679 = vmatmul.mubr.msk.bf16.gmra.mxu0 %vm1556_vm2, %v9110_v55 }
 0xdda   :  { %8099 = vmatpush3.bf16.msra.mxu0 %v9116_v56  ;;  %8139 = vmatpush3.bf16.msra.mxu1 %v9130_v60 }
 0xddb   :  { %8100 = vmatprep.subr.bf16.mxu0 %v9117_v57  ;;  %8140 = vmatprep.subr.bf16.mxu1 %v9132_v3 }
 0xdde   :  { %8101 = vmatpush3.bf16.msra.mxu0 %v9118_v62  ;;  %8141 = vmatpush3.bf16.msra.mxu1 %v9134_v8 }
 0xddf   :  { %8102 = vmatprep.subr.bf16.mxu0 %v9119_v63  ;;  %8142 = vmatprep.subr.bf16.mxu1 %v9135_v58 }
 0xde2   :  { %8103 = vmatpush3.bf16.msra.mxu0 %v9121_v0  ;;  %8143 = vmatpush3.bf16.msra.mxu1 %v9136_v59 }
 0xde3   :  { %8104 = vmatprep.subr.bf16.mxu0 %v9123_v1  ;;  %8144 = vmatprep.subr.bf16.mxu1 %v9137_v9 }
 0xde6   :  { %8105 = vmatpush3.bf16.msra.mxu0 %v9125_v2  ;;  %8145 = vmatpush3.bf16.msra.mxu1 %v9138_v10 }
 0xde7   :  { %8106 = vmatprep.subr.bf16.mxu0 %v9127_v5  ;;  %8146 = vmatprep.subr.bf16.mxu1 %v9139_v11  ;;  %v9143_v5 = vld [vmem:[#allocation2 + $0xb60] sm:$0xff]  }
 0xdea   :  { %8107 = vmatpush3.bf16.msra.mxu0 %v9129_v7  ;;  %8147 = vmatpush3.bf16.msra.mxu1 %v9140_v12 }
 0xdeb   :  { %8108 = vmatprep.subr.bf16.mxu0 %v9131_v61  ;;  %8148 = vmatprep.subr.bf16.mxu1 %v9141_v14 }
 0xdee   :  { %8109 = vmatpush3.bf16.msra.mxu0 %v9133_v4  ;;  %8149 = vmatpush3.bf16.msra.mxu1 %v9142_v15 }
 0xe80   :  { %v8652_v16 = vpop.f32.mrf.mxu0  ;;  %v8664_v17 = vpop.f32.mrf.mxu1 }
 0xe82   :  { %v4986_v18 = vpop.f32.mrf.mxu0  ;;  %v5095_v19 = vpop.f32.mrf.mxu1 }
 0xe84   :  { %v8653_v20 = vpop.f32.mrf.mxu0  ;;  %v8665_v21 = vpop.f32.mrf.mxu1 }
 0xe85   :  { %v5127_v28 = vpack.c.bf16 %v8665_v21, %v8664_v17  ;;  %v5018_v35 = vpack.c.bf16 %v8653_v20, %v8652_v16 }
 0xe86   :  { %v4989_v22 = vpop.f32.mrf.mxu0  ;;  %v5098_v23 = vpop.f32.mrf.mxu1 }
 0xe87   :  { %v5017_v24 = vpack.c.bf16 %v4989_v22, %v4986_v18  ;;  %v5126_v25 = vpack.c.bf16 %v5098_v23, %v5095_v19 }
 0xe88   :  { %v8656_v26 = vpop.f32.mrf.mxu0  ;;  %v8668_v27 = vpop.f32.mrf.mxu1 }
 0xe89   :  { %5637 = vmatprep.mubr.bf16.mxu0 %v5126_v25 }
 0xe8a   :  { %v5002_v29 = vpop.f32.mrf.mxu0  ;;  %v5111_v30 = vpop.f32.mrf.mxu1  ;;  %5638 = vmatmul.mubr.bf16.vlgmr.msra.gmra.mxu0 %v5017_v24 }
 0xe8b   :  { %5645 = vmatprep.mubr.bf16.mxu0 %v5127_v28 }
 0xe8c   :  { %v8657_v31 = vpop.f32.mrf.mxu0  ;;  %v8669_v32 = vpop.f32.mrf.mxu1 }
 0xe8d   :  { %v5129_v49 = vpack.c.bf16 %v8669_v32, %v8668_v27  ;;  %v5020_v56 = vpack.c.bf16 %v8657_v31, %v8656_v26 }
 0xe8e   :  { %v5005_v33 = vpop.f32.mrf.mxu0  ;;  %v5114_v34 = vpop.f32.mrf.mxu1 }
 0xe8f   :  { %v5128_v38 = vpack.c.bf16 %v5114_v34, %v5111_v30  ;;  %v5019_v47 = vpack.c.bf16 %v5005_v33, %v5002_v29 }
 0xe90   :  { %v8676_v36 = vpop.f32.mrf.mxu0  ;;  %v8688_v37 = vpop.f32.mrf.mxu1 }
 0xe92   :  { %v5204_v39 = vpop.f32.mrf.mxu0  ;;  %v5313_v40 = vpop.f32.mrf.mxu1  ;;  %5646 = vmatmul.mubr.bf16.gmra.mxu0 %v5018_v35 }
 0xe93   :  { %5653 = vmatprep.mubr.bf16.mxu0 %v5128_v38 }
 0xe94   :  { %v8677_v41 = vpop.f32.mrf.mxu0  ;;  %v8689_v42 = vpop.f32.mrf.mxu1 }
 0xe95   :  { %v5345_v50 = vpack.c.bf16 %v8689_v42, %v8688_v37  ;;  %v5236_v57 = vpack.c.bf16 %v8677_v41, %v8676_v36 }
 0xe96   :  { %v5207_v43 = vpop.f32.mrf.mxu0  ;;  %v5316_v44 = vpop.f32.mrf.mxu1 }
 0xe97   :  { %v5235_v45 = vpack.c.bf16 %v5207_v43, %v5204_v39  ;;  %v5344_v46 = vpack.c.bf16 %v5316_v44, %v5313_v40 }
 0xe98   :  { %v8692_v48 = vpop.f32.mrf.mxu1  ;;  %v8680_v51 = vpop.f32.mrf.mxu0 }
 0xe99   :  { %5702 = vmatprep.mubr.bf16.mxu1 %v5344_v46  ;;  %v7432_v46 = vld [vmem:[#allocation5 + $0x40] ss:$0 sm:$0xff] }
 0xe9a   :  { %5654 = vmatmul.mubr.bf16.gmra.mxu0 %v5019_v47  ;;  %5703 = vmatmul.mubr.bf16.vlgmr.msra.gmra.mxu1 %v5235_v45  ;;  %v5329_v13 = vpop.f32.mrf.mxu1  ;;  %v5220_v53 = vpop.f32.mrf.mxu0 }
 0xe9b   :  { %5661 = vmatprep.mubr.bf16.mxu0 %v5129_v49  ;;  %5710 = vmatprep.mubr.bf16.mxu1 %v5345_v50 }
 0xe9c   :  { %v8693_v52 = vpop.f32.mrf.mxu1  ;;  %v8681_v62 = vpop.f32.mrf.mxu0 }
 0xe9d   :  { %v5347_v1 = vpack.c.bf16 %v8693_v52, %v8692_v48  ;;  %v5238_v2 = vpack.c.bf16 %v8681_v62, %v8680_v51 }
 0xe9e   :  { %v5332_v54 = vpop.f32.mrf.mxu1  ;;  %v5223_v63 = vpop.f32.mrf.mxu0 }
 0xe9f   :  { %v5346_v55 = vpack.c.bf16 %v5332_v54, %v5329_v13  ;;  %v5237_v0 = vpack.c.bf16 %v5223_v63, %v5220_v53 }
 0xea2   :  { %5662 = vmatmul.mubr.bf16.gmra.mxu0 %v5020_v56  ;;  %5711 = vmatmul.mubr.bf16.gmra.mxu1 %v5236_v57 }
 0xea3   :  { %5718 = vmatprep.mubr.bf16.mxu1 %v5346_v55  ;;  %8702 = vmatprep.mubr.msk.bf16.mxu0 %vm905_vm0, %v9144_v6 }
 0xeaa   :  { %5719 = vmatmul.mubr.bf16.gmra.mxu1 %v5237_v0 }
 0xeab   :  { %5726 = vmatprep.mubr.bf16.mxu1 %v5347_v1 }
 0xeb2   :  { %5727 = vmatmul.mubr.bf16.gmra.mxu1 %v5238_v2 }
 0xeb3   :  { %8726 = vmatprep.mubr.msk.bf16.mxu1 %vm905_vm0, %v9143_v5 }
 0xf4a   :  { %v8110_v7 = vpop.f32.mrf.mxu0 }
 0xf4c   :  { %v8111_v60 = vpop.f32.mrf.mxu0 }
 0xf4d   :  { %v8112_v62 = vadd.f32 %v8111_v60, %v8110_v7 }
 0xf4e   :  { %v8113_v61 = vpop.f32.mrf.mxu0 }
 0xf50   :  { %v8114_v3 = vpop.f32.mrf.mxu0 }
 0xf51   :  { %v8115_v53 = vadd.f32 %v8114_v3, %v8113_v61 }
 0xf52   :  { %v8116_v4 = vpop.f32.mrf.mxu0 }
 0xf54   :  { %v8117_v8 = vpop.f32.mrf.mxu0 }
 0xf55   :  { %v8118_v45 = vadd.f32 %v8117_v8, %v8116_v4 }
 0xf56   :  { %v8119_v58 = vpop.f32.mrf.mxu0 }
 0xf58   :  { %v8120_v59 = vpop.f32.mrf.mxu0 }
 0xf59   :  { %v8121_v41 = vadd.f32 %v8120_v59, %v8119_v58 }
 0xf5a   :  { %v8122_v9 = vpop.f32.mrf.mxu0  ;;  %v8150_v10 = vpop.f32.mrf.mxu1 }
 0xf5c   :  { %v8151_v11 = vpop.f32.mrf.mxu1  ;;  %v8123_v12 = vpop.f32.mrf.mxu0 }
 0xf5d   :  { %v8124_v33 = vadd.f32 %v8123_v12, %v8122_v9  ;;  %v8152_v54 = vadd.f32 %v8151_v11, %v8150_v10 }
 0xf5e   :  { %v8153_v14 = vpop.f32.mrf.mxu1  ;;  %v8125_v16 = vpop.f32.mrf.mxu0 }
 0xf5f   :  { %v5705_v6 = vadd.f32 %v8152_v54, %v8112_v62  ;;  %v9183_v54 = vld [vmem:[#allocation2 + $0xc78] sm:$0xff]   ;;  %v9172_v62 = vld [vmem:[#allocation2 + $0xbd0] sm:$0xff]  }
 0xf60   :  { %v8154_v15 = vpop.f32.mrf.mxu1  ;;  %v8126_v19 = vpop.f32.mrf.mxu0 }
 0xf61   :  { %v8127_v31 = vadd.f32 %v8126_v19, %v8125_v16  ;;  %v8155_v47 = vadd.f32 %v8154_v15, %v8153_v14  ;;  %v5739_v61 = vadd.f32 %v7432_v46, %v5705_v6  ;;  %v9187_v6 = vld [vmem:[#allocation2 + $0xc68] sm:$0xff]  }
 0xf62   :  { %v8156_v17 = vpop.f32.mrf.mxu1  ;;  %v8128_v22 = vpop.f32.mrf.mxu0 }
 0xf63   :  { %v5708_v63 = vadd.f32 %v8155_v47, %v8115_v53  ;;  %v9179_v47 = vld [vmem:[#allocation2 + $0xc88] sm:$0xff]   ;;  %v9182_v53 = vld [vmem:[#allocation2 + $0xc40] sm:$0xff]  }
 0xf64   :  { %v8157_v18 = vpop.f32.mrf.mxu1  ;;  %v8129_v25 = vpop.f32.mrf.mxu0 }
 0xf65   :  { %v8130_v35 = vadd.f32 %v8129_v25, %v8128_v22  ;;  %v8158_v42 = vadd.f32 %v8157_v18, %v8156_v17  ;;  %v5740_v59 = vadd.f32 %v7432_v46, %v5708_v63  ;;  %v5747_v17 = vmul.f32 0.2, %v5739_v61  ;;  %v9147_v25 = vld [vmem:[#allocation2 + $0xb70] sm:$0xff]   ;;  %v9184_v63 = vld [vmem:[#allocation2 + $0xc38] sm:$0xff]  }
 0xf66   :  { %v8159_v20 = vpop.f32.mrf.mxu1  ;;  %v8131_v28 = vpop.f32.mrf.mxu0 }
 0xf67   :  { %v5713_v55 = vadd.f32 %v8158_v42, %v8118_v45  ;;  %v5748_v16 = vmul.f32 0.2, %v5740_v59  ;;  %v9163_v42 = vld [vmem:[#allocation2 + $0xbf0] sm:$0xff]  }
 0xf68   :  { %v8160_v21 = vpop.f32.mrf.mxu1  ;;  %v8132_v36 = vpop.f32.mrf.mxu0  ;;  %v9177_v45 = vld [vmem:[#allocation2 + $0xc90] sm:$0xff]  }
 0xf69   :  { %v8161_v37 = vadd.f32 %v8160_v21, %v8159_v20  ;;  %v8133_v48 = vadd.f32 %v8132_v36, %v8131_v28  ;;  %v5741_v4 = vadd.f32 %v7432_v46, %v5713_v55  ;;  %v5756_v19 = vmax.f32 %v5740_v59, %v5748_v16  ;;  %v9150_v28 = vld [vmem:[#allocation2 + $0xb38] sm:$0xff]   ;;  %v9169_v55 = vld [vmem:[#allocation2 + $0xc08] sm:$0xff]  }
 0xf6a   :  { %v8162_v23 = vpop.f32.mrf.mxu1  ;;  %v5755_v21 = vmax.f32 %v5739_v61, %v5747_v17  ;;  %v9157_v36 = vld [vmem:[#allocation2 + $0xb98] sm:$0xff]   ;;  %v9196_v61 = vld [vmem:[#allocation2 + $0xcc8] sm:$0xff]  }
 0xf6b   :  { %v5716_v50 = vadd.f32 %v8161_v37, %v8121_v41  ;;  %v5749_v3 = vmul.f32 0.2, %v5741_v4  ;;  %v9158_v37 = vld [vmem:[#allocation2 + $0xb58] sm:$0xff]   ;;  %v9162_v41 = vld [vmem:[#allocation2 + $0xba8] sm:$0xff]  }
 0xf6c   :  { %v8163_v24 = vpop.f32.mrf.mxu1  ;;  %v5763_v22 = vpack.c.bf16 %v5756_v19, %v5755_v21  ;;  %v9191_v59 = vld [vmem:[#allocation2 + $0xd18] sm:$0xff]   ;;  %v9203_v17 = vld [vmem:[#allocation2 + $0xce8] sm:$0xff]   ;;  %v9205_v19 = vld [vmem:[#allocation2 + $0xce0] sm:$0xff]  }
 0xf6d   :  { %v8164_v32 = vadd.f32 %v8163_v24, %v8162_v23  ;;  %v5742_v0 = vadd.f32 %v7432_v46, %v5716_v50  ;;  %v5757_v18 = vmax.f32 %v5741_v4, %v5749_v3  ;;  %v9145_v23 = vld [vmem:[#allocation2 + $0xb68] sm:$0xff]   ;;  %v9167_v50 = vld [vmem:[#allocation2 + $0xc00] sm:$0xff]   ;;  %v9200_v16 = vld [vmem:[#allocation2 + $0xcb8] sm:$0xff]  }
 0xf6e   :  { %v8165_v26 = vpop.f32.mrf.mxu1  ;;  %v9146_v24 = vld [vmem:[#allocation2 + $0xb28] sm:$0xff]   ;;  %v9197_v3 = vld [vmem:[#allocation2 + $0xd00] sm:$0xff]  }
 0xf6f   :  { %v5721_v43 = vadd.f32 %v8164_v32, %v8124_v33  ;;  %v5750_v9 = vmul.f32 0.2, %v5742_v0  ;;  %v9153_v32 = vld [vmem:[#allocation2 + $0xb88] sm:$0xff]  }
 0xf70   :  { %v8166_v27 = vpop.f32.mrf.mxu1  ;;  %v9154_v33 = vld [vmem:[#allocation2 + $0xb48] sm:$0xff]  }
 0xf71   :  { %v8167_v29 = vadd.f32 %v8166_v27, %v8165_v26  ;;  %v5743_v56 = vadd.f32 %v7432_v46, %v5721_v43  ;;  %v5758_v7 = vmax.f32 %v5742_v0, %v5750_v9  ;;  %v9148_v26 = vld [vmem:[#allocation2 + $0xb30] sm:$0xff]   ;;  %v9149_v27 = vld [vmem:[#allocation2 + $0xb78] sm:$0xff]   ;;  %v9188_v4 = vld [vmem:[#allocation2 + $0xc28] sm:$0xff]  }
 0xf72   :  { %v8168_v30 = vpop.f32.mrf.mxu1  ;;  %v9164_v43 = vld [vmem:[#allocation2 + $0xbb0] sm:$0xff]   ;;  %v9192_v9 = vld [vmem:[#allocation2 + $0xcd8] sm:$0xff]  }
 0xf73   :  { %v5724_v38 = vadd.f32 %v8167_v29, %v8127_v31  ;;  %v5751_v8 = vmul.f32 0.2, %v5743_v56  ;;  %v5764_v20 = vpack.c.bf16 %v5758_v7, %v5757_v18  ;;  %v9151_v29 = vld [vmem:[#allocation2 + $0xb80] sm:$0xff]   ;;  %v9175_v31 = vld [vmem:[#allocation2 + $0xc98] sm:$0xff]   ;;  %v9185_v0 = vld [vmem:[#allocation2 + $0xc70] sm:$0xff]  }
 0xf74   :  { %v8169_v34 = vpop.f32.mrf.mxu1  ;;  %v9201_v7 = vld [vmem:[#allocation2 + $0xcf0] sm:$0xff]   ;;  %v9204_v18 = vld [vmem:[#allocation2 + $0xca8] sm:$0xff]  }
 0xf75   :  { %v8170_v39 = vadd.f32 %v8169_v34, %v8168_v30  ;;  %v5744_v51 = vadd.f32 %v7432_v46, %v5724_v38  ;;  %v5759_v10 = vmax.f32 %v5743_v56, %v5751_v8  ;;  %v9152_v30 = vld [vmem:[#allocation2 + $0xb40] sm:$0xff]   ;;  %v9155_v34 = vld [vmem:[#allocation2 + $0xb90] sm:$0xff]   ;;  %v9170_v56 = vld [vmem:[#allocation2 + $0xbc8] sm:$0xff]  }
 0xf76   :  { %v8171_v40 = vpop.f32.mrf.mxu1  ;;  %v9159_v38 = vld [vmem:[#allocation2 + $0xbe0] sm:$0xff]  }
 0xf77   :  { %v5729_v44 = vadd.f32 %v8170_v39, %v8130_v35  ;;  %v5752_v1 = vmul.f32 0.2, %v5744_v51  ;;  %v9156_v35 = vld [vmem:[#allocation2 + $0xb50] sm:$0xff]   ;;  %v9160_v39 = vld [vmem:[#allocation2 + $0xba0] sm:$0xff]  }
 0xf78   :  { %v8172_v49 = vpop.f32.mrf.mxu1  ;;  %v9189_v8 = vld [vmem:[#allocation2 + $0xc60] sm:$0xff]  }
 0xf79   :  { %v5745_v13 = vadd.f32 %v7432_v46, %v5729_v44  ;;  %v8173_v52 = vadd.f32 %v8172_v49, %v8171_v40  ;;  %v5760_v12 = vmax.f32 %v5744_v51, %v5752_v1  ;;  %v9161_v40 = vld [vmem:[#allocation2 + $0xbe8] sm:$0xff]   ;;  %v9176_v44 = vld [vmem:[#allocation2 + $0xc58] sm:$0xff]   ;;  %v9168_v51 = vld [vmem:[#allocation2 + $0xbc0] sm:$0xff]  }
 0xf7a   :  { %v9166_v49 = vld [vmem:[#allocation2 + $0xbb8] sm:$0xff]   ;;  %v9186_v1 = vld [vmem:[#allocation2 + $0xc30] sm:$0xff]  }
 0xf7b   :  { %v5732_v57 = vadd.f32 %v8173_v52, %v8133_v48  ;;  %v5753_v2 = vmul.f32 0.2, %v5745_v13  ;;  %v5765_v60 = vpack.c.bf16 %v5760_v12, %v5759_v10  ;;  %v9165_v48 = vld [vmem:[#allocation2 + $0xbf8] sm:$0xff]   ;;  %v9181_v52 = vld [vmem:[#allocation2 + $0xc80] sm:$0xff]   ;;  %v9193_v12 = vld [vmem:[#allocation2 + $0xd10] sm:$0xff]  }
 0xf7c   :  { %v9198_v10 = vld [vmem:[#allocation2 + $0xcc0] sm:$0xff]  }
 0xf7d   :  { %v5746_v5 = vadd.f32 %v7432_v46, %v5732_v57  ;;  %v5761_v14 = vmax.f32 %v5745_v13, %v5753_v2  ;;  %v9178_v46 = vld [vmem:[#allocation2 + $0xc50] sm:$0xff]   ;;  %v9180_v13 = vld [vmem:[#allocation2 + $0xc48] sm:$0xff]   ;;  %v9173_v2 = vld [vmem:[#allocation2 + $0xc18] sm:$0xff]  }
 0xf7e   :  { %v9171_v57 = vld [vmem:[#allocation2 + $0xc10] sm:$0xff]  }
 0xf7f   :  { %v5754_v58 = vmul.f32 0.2, %v5746_v5 }
 0xf81   :  { %v5762_v15 = vmax.f32 %v5746_v5, %v5754_v58  ;;  %v9174_v5 = vld [vmem:[#allocation2 + $0xbd8] sm:$0xff]   ;;  %v9190_v58 = vld [vmem:[#allocation2 + $0xc20] sm:$0xff]  }
 0xf83   :  { %v5766_v11 = vpack.c.bf16 %v5762_v15, %v5761_v14  ;;  %v9194_v14 = vld [vmem:[#allocation2 + $0xcd0] sm:$0xff]   ;;  %v9195_v15 = vld [vmem:[#allocation2 + $0xd08] sm:$0xff]  }
 0xf85   :  { %8694 = vmatprep.subr.bf16.mxu0 %v5766_v11  ;;  %8718 = vmatprep.subr.bf16.mxu1 %v5766_v11 }
 0xf86   :  { %8695 = vmatpush3.bf16.msra.mxu0 %v5766_v11  ;;  %8719 = vmatpush3.bf16.msra.mxu1 %v5766_v11 }
 0xf87   :  { %8696 = vmatprep.subr.bf16.mxu0 %v5765_v60  ;;  %8720 = vmatprep.subr.bf16.mxu1 %v5765_v60 }
 0xf8a   :  { %8697 = vmatpush3.bf16.msra.mxu0 %v5765_v60  ;;  %8721 = vmatpush3.bf16.msra.mxu1 %v5765_v60 }
 0xf8b   :  { %8698 = vmatprep.subr.bf16.mxu0 %v5764_v20  ;;  %8722 = vmatprep.subr.bf16.mxu1 %v5764_v20 }
 0xf8e   :  { %8699 = vmatpush3.bf16.msra.mxu0 %v5764_v20  ;;  %8723 = vmatpush3.bf16.msra.mxu1 %v5764_v20 }
 0xf8f   :  { %8700 = vmatprep.subr.bf16.mxu0 %v5763_v22  ;;  %8724 = vmatprep.subr.bf16.mxu1 %v5763_v22 }
 0xf92   :  { %8701 = vmatpush3.bf16.msra.mxu0 %v5763_v22  ;;  %8725 = vmatpush3.bf16.msra.mxu1 %v5763_v22 }
 0xf93   :  { %8742 = vmatprep.subr.bf16.mxu0 %v5766_v11  ;;  %8766 = vmatprep.subr.bf16.mxu1 %v5766_v11 }
 0xf95   :  { %8727 = vmatmul.mubr.msk.bf16.vlgmr.msra.gmra.mxu1 %vm905_vm0, %v9145_v23  ;;  %8703 = vmatmul.mubr.msk.bf16.vlgmr.msra.gmra.mxu0 %vm905_vm0, %v9146_v24 }
 0xf96   :  { %8743 = vmatpush3.bf16.msra.mxu0 %v5766_v11  ;;  %8767 = vmatpush3.bf16.msra.mxu1 %v5766_v11  ;;  %v9199_v11 = vld [vmem:[#allocation2 + $0xcf8] sm:$0xff]  }
 0xf97   :  { %8744 = vmatprep.subr.bf16.mxu0 %v5765_v60  ;;  %8768 = vmatprep.subr.bf16.mxu1 %v5765_v60 }
 0xf98   :  { %8730 = vmatprep.mubr.msk.bf16.mxu1 %vm905_vm0, %v9147_v25  ;;  %8706 = vmatprep.mubr.msk.bf16.mxu0 %vm905_vm0, %v9148_v26 }
 0xf9a   :  { %8745 = vmatpush3.bf16.msra.mxu0 %v5765_v60  ;;  %8769 = vmatpush3.bf16.msra.mxu1 %v5765_v60  ;;  %v9202_v60 = vld [vmem:[#allocation2 + $0xcb0] sm:$0xff]  }
 0xf9b   :  { %8746 = vmatprep.subr.bf16.mxu0 %v5764_v20  ;;  %8770 = vmatprep.subr.bf16.mxu1 %v5764_v20 }
 0xf9d   :  { %8731 = vmatmul.mubr.msk.bf16.gmra.mxu1 %vm905_vm0, %v9149_v27  ;;  %8707 = vmatmul.mubr.msk.bf16.gmra.mxu0 %vm905_vm0, %v9150_v28 }
 0xf9e   :  { %8747 = vmatpush3.bf16.msra.mxu0 %v5764_v20  ;;  %8771 = vmatpush3.bf16.msra.mxu1 %v5764_v20  ;;  %v9206_v20 = vld [vmem:[#allocation2 + $0xca0] sm:$0xff]  }
 0xf9f   :  { %8748 = vmatprep.subr.bf16.mxu0 %v5763_v22  ;;  %8772 = vmatprep.subr.bf16.mxu1 %v5763_v22 }
 0xfa0   :  { %8734 = vmatprep.mubr.msk.bf16.mxu1 %vm905_vm0, %v9151_v29  ;;  %8710 = vmatprep.mubr.msk.bf16.mxu0 %vm905_vm0, %v9152_v30 }
 0xfa2   :  { %8749 = vmatpush3.bf16.msra.mxu0 %v5763_v22  ;;  %8773 = vmatpush3.bf16.msra.mxu1 %v5763_v22 }
 0xfa3   :  { %8222 = vmatprep.subr.bf16.mxu0 %v9175_v31  ;;  %8286 = vmatprep.subr.bf16.mxu1 %v9191_v59 }
 0xfa5   :  { %8735 = vmatmul.mubr.msk.bf16.gmra.mxu1 %vm905_vm0, %v9153_v32  ;;  %8711 = vmatmul.mubr.msk.bf16.gmra.mxu0 %vm905_vm0, %v9154_v33 }
 0xfa6   :  { %8738 = vmatprep.mubr.msk.bf16.mxu1 %vm905_vm0, %v9155_v34  ;;  %8714 = vmatprep.mubr.msk.bf16.mxu0 %vm905_vm0, %v9156_v35 }
 0xfad   :  { %8739 = vmatmul.mubr.msk.bf16.gmra.mxu1 %vm905_vm0, %v9157_v36  ;;  %8715 = vmatmul.mubr.msk.bf16.gmra.mxu0 %vm905_vm0, %v9158_v37 }
 0xfae   :  { %8774 = vmatprep.mubr.msk.bf16.mxu1 %vm905_vm0, %v9159_v38  ;;  %8750 = vmatprep.mubr.msk.bf16.mxu0 %vm905_vm0, %v9160_v39 }
 0xfb5   :  { %8775 = vmatmul.mubr.msk.bf16.vlgmr.msra.gmra.mxu1 %vm905_vm0, %v9161_v40  ;;  %8751 = vmatmul.mubr.msk.bf16.vlgmr.msra.gmra.mxu0 %vm905_vm0, %v9162_v41 }
 0xfb6   :  { %8778 = vmatprep.mubr.msk.bf16.mxu1 %vm905_vm0, %v9163_v42  ;;  %8754 = vmatprep.mubr.msk.bf16.mxu0 %vm905_vm0, %v9164_v43 }
 0xfb7   :  { %8223 = vmatpush3.bf16.msra.mxu0 %v9176_v44  ;;  %8287 = vmatpush3.bf16.msra.mxu1 %v9192_v9 }
 0xfb8   :  { %8224 = vmatprep.subr.bf16.mxu0 %v9177_v45  ;;  %8288 = vmatprep.subr.bf16.mxu1 %v9193_v12 }
 0xfbb   :  { %8225 = vmatpush3.bf16.msra.mxu0 %v9178_v46  ;;  %8289 = vmatpush3.bf16.msra.mxu1 %v9194_v14 }
 0xfbc   :  { %8226 = vmatprep.subr.bf16.mxu0 %v9179_v47  ;;  %8290 = vmatprep.subr.bf16.mxu1 %v9195_v15 }
 0xfbd   :  { %8779 = vmatmul.mubr.msk.bf16.gmra.mxu1 %vm905_vm0, %v9165_v48  ;;  %8755 = vmatmul.mubr.msk.bf16.gmra.mxu0 %vm905_vm0, %v9166_v49 }
 0xfbe   :  { %8782 = vmatprep.mubr.msk.bf16.mxu1 %vm905_vm0, %v9167_v50  ;;  %8758 = vmatprep.mubr.msk.bf16.mxu0 %vm905_vm0, %v9168_v51 }
 0xfbf   :  { %8227 = vmatpush3.bf16.msra.mxu0 %v9180_v13  ;;  %8291 = vmatpush3.bf16.msra.mxu1 %v9196_v61 }
 0xfc0   :  { %8228 = vmatprep.subr.bf16.mxu0 %v9181_v52  ;;  %8292 = vmatprep.subr.bf16.mxu1 %v9197_v3 }
 0xfc3   :  { %8229 = vmatpush3.bf16.msra.mxu0 %v9182_v53  ;;  %8293 = vmatpush3.bf16.msra.mxu1 %v9198_v10 }
 0xfc4   :  { %8230 = vmatprep.subr.bf16.mxu0 %v9183_v54  ;;  %8294 = vmatprep.subr.bf16.mxu1 %v9199_v11 }
 0xfc5   :  { %8783 = vmatmul.mubr.msk.bf16.gmra.mxu1 %vm905_vm0, %v9169_v55  ;;  %8759 = vmatmul.mubr.msk.bf16.gmra.mxu0 %vm905_vm0, %v9170_v56 }
 0xfc6   :  { %8786 = vmatprep.mubr.msk.bf16.mxu1 %vm905_vm0, %v9171_v57  ;;  %8762 = vmatprep.mubr.msk.bf16.mxu0 %vm905_vm0, %v9172_v62 }
 0xfc7   :  { %8231 = vmatpush3.bf16.msra.mxu0 %v9184_v63  ;;  %8295 = vmatpush3.bf16.msra.mxu1 %v9200_v16 }
 0xfc8   :  { %8232 = vmatprep.subr.bf16.mxu0 %v9185_v0  ;;  %8296 = vmatprep.subr.bf16.mxu1 %v9201_v7 }
 0xfcb   :  { %8233 = vmatpush3.bf16.msra.mxu0 %v9186_v1  ;;  %8297 = vmatpush3.bf16.msra.mxu1 %v9202_v60 }
 0xfcc   :  { %8234 = vmatprep.subr.bf16.mxu0 %v9187_v6  ;;  %8298 = vmatprep.subr.bf16.mxu1 %v9203_v17 }
 0xfcd   :  { %8787 = vmatmul.mubr.msk.bf16.gmra.mxu1 %vm905_vm0, %v9173_v2  ;;  %8763 = vmatmul.mubr.msk.bf16.gmra.mxu0 %vm905_vm0, %v9174_v5 }
 0xfcf   :  { %8235 = vmatpush3.bf16.msra.mxu0 %v9188_v4  ;;  %8299 = vmatpush3.bf16.msra.mxu1 %v9204_v18 }
 0xfd0   :  { %8236 = vmatprep.subr.bf16.mxu0 %v9189_v8  ;;  %8300 = vmatprep.subr.bf16.mxu1 %v9205_v19 }
 0xfd3   :  { %8237 = vmatpush3.bf16.msra.mxu0 %v9190_v58  ;;  %8301 = vmatpush3.bf16.msra.mxu1 %v9206_v20 }
0x1055   :  { %v8728_v21 = vpop.f32.mrf.mxu1  ;;  %v8704_v22 = vpop.f32.mrf.mxu0 }
0x1057   :  { %v6066_v23 = vpop.f32.mrf.mxu1  ;;  %v5881_v24 = vpop.f32.mrf.mxu0 }
0x1059   :  { %v8729_v25 = vpop.f32.mrf.mxu1  ;;  %v8705_v26 = vpop.f32.mrf.mxu0 }
0x105a   :  { %v6130_v33 = vpack.c.bf16 %v8729_v25, %v8728_v21  ;;  %v5945_v40 = vpack.c.bf16 %v8705_v26, %v8704_v22 }
0x105b   :  { %v6069_v27 = vpop.f32.mrf.mxu1  ;;  %v5884_v28 = vpop.f32.mrf.mxu0 }
0x105c   :  { %v6129_v29 = vpack.c.bf16 %v6069_v27, %v6066_v23  ;;  %v5944_v30 = vpack.c.bf16 %v5884_v28, %v5881_v24 }
0x105d   :  { %v8732_v31 = vpop.f32.mrf.mxu1  ;;  %v8708_v32 = vpop.f32.mrf.mxu0 }
0x105e   :  { %6796 = vmatprep.mubr.bf16.mxu0 %v6129_v29 }
0x105f   :  { %v6082_v34 = vpop.f32.mrf.mxu1  ;;  %6797 = vmatmul.mubr.bf16.vlgmr.msra.gmra.mxu0 %v5944_v30  ;;  %v5897_v35 = vpop.f32.mrf.mxu0 }
0x1060   :  { %6804 = vmatprep.mubr.bf16.mxu0 %v6130_v33 }
0x1061   :  { %v8733_v36 = vpop.f32.mrf.mxu1  ;;  %v8709_v37 = vpop.f32.mrf.mxu0 }
0x1062   :  { %v6132_v52 = vpack.c.bf16 %v8733_v36, %v8732_v31  ;;  %v5947_v63 = vpack.c.bf16 %v8709_v37, %v8708_v32 }
0x1063   :  { %v6085_v38 = vpop.f32.mrf.mxu1  ;;  %v5900_v39 = vpop.f32.mrf.mxu0 }
0x1064   :  { %v6131_v43 = vpack.c.bf16 %v6085_v38, %v6082_v34  ;;  %v5946_v50 = vpack.c.bf16 %v5900_v39, %v5897_v35 }
0x1065   :  { %v8736_v41 = vpop.f32.mrf.mxu1  ;;  %v8712_v42 = vpop.f32.mrf.mxu0 }
0x1067   :  { %v6098_v44 = vpop.f32.mrf.mxu1  ;;  %6805 = vmatmul.mubr.bf16.gmra.mxu0 %v5945_v40  ;;  %v5913_v45 = vpop.f32.mrf.mxu0 }
0x1068   :  { %6812 = vmatprep.mubr.bf16.mxu0 %v6131_v43 }
0x1069   :  { %v8737_v46 = vpop.f32.mrf.mxu1  ;;  %v8713_v47 = vpop.f32.mrf.mxu0 }
0x106a   :  { %v6134_v61 = vpack.c.bf16 %v8737_v46, %v8736_v41  ;;  %v5949_v18 = vpack.c.bf16 %v8713_v47, %v8712_v42 }
0x106b   :  { %v6101_v48 = vpop.f32.mrf.mxu1  ;;  %v5916_v49 = vpop.f32.mrf.mxu0 }
0x106c   :  { %v6133_v2 = vpack.c.bf16 %v6101_v48, %v6098_v44  ;;  %v5948_v14 = vpack.c.bf16 %v5916_v49, %v5913_v45 }
0x106d   :  { %v8740_v51 = vpop.f32.mrf.mxu1  ;;  %v9581_v13 = vpop.f32.mrf.mxu0 }
0x106f   :  { %v6114_v53 = vpop.f32.mrf.mxu1  ;;  %6813 = vmatmul.mubr.bf16.gmra.mxu0 %v5946_v50  ;;  %v5929_v54 = vpop.f32.mrf.mxu0 }
0x1070   :  { %6820 = vmatprep.mubr.bf16.mxu0 %v6132_v52 }
0x1071   :  { %v8741_v55 = vpop.f32.mrf.mxu1  ;;  %v8717_v56 = vpop.f32.mrf.mxu0 }
0x1072   :  { %v6136_v28 = vpack.c.bf16 %v8741_v55, %v8740_v51  ;;  %v5951_v34 = vpack.c.bf16 %v8717_v56, %v9581_v13 }
0x1073   :  { %v6117_v57 = vpop.f32.mrf.mxu1  ;;  %v5932_v62 = vpop.f32.mrf.mxu0 }
0x1074   :  { %v6135_v21 = vpack.c.bf16 %v6117_v57, %v6114_v53  ;;  %v5950_v25 = vpack.c.bf16 %v5932_v62, %v5929_v54 }
0x1075   :  { %v8776_v0 = vpop.f32.mrf.mxu1  ;;  %v8752_v1 = vpop.f32.mrf.mxu0 }
0x1077   :  { %v6436_v5 = vpop.f32.mrf.mxu1  ;;  %6821 = vmatmul.mubr.bf16.gmra.mxu0 %v5947_v63  ;;  %v6251_v6 = vpop.f32.mrf.mxu0 }
0x1078   :  { %6828 = vmatprep.mubr.bf16.mxu0 %v6133_v2 }
0x1079   :  { %v8777_v4 = vpop.f32.mrf.mxu1  ;;  %v8753_v8 = vpop.f32.mrf.mxu0 }
0x107a   :  { %v6500_v3 = vpack.c.bf16 %v8777_v4, %v8776_v0  ;;  %v6315_v19 = vpack.c.bf16 %v8753_v8, %v8752_v1 }
0x107b   :  { %v6439_v58 = vpop.f32.mrf.mxu1  ;;  %v6254_v59 = vpop.f32.mrf.mxu0 }
0x107c   :  { %v6499_v9 = vpack.c.bf16 %v6439_v58, %v6436_v5  ;;  %v6314_v12 = vpack.c.bf16 %v6254_v59, %v6251_v6 }
0x107d   :  { %v8780_v15 = vpop.f32.mrf.mxu1  ;;  %v8756_v10 = vpop.f32.mrf.mxu0 }
0x107e   :  { %6893 = vmatprep.mubr.bf16.mxu1 %v6499_v9 }
0x107f   :  { %6829 = vmatmul.mubr.bf16.gmra.mxu0 %v5948_v14  ;;  %6894 = vmatmul.mubr.bf16.vlgmr.msra.gmra.mxu1 %v6314_v12  ;;  %v6452_v11 = vpop.f32.mrf.mxu1  ;;  %v6267_v7 = vpop.f32.mrf.mxu0 }
0x1080   :  { %6836 = vmatprep.mubr.bf16.mxu0 %v6134_v61  ;;  %6901 = vmatprep.mubr.bf16.mxu1 %v6500_v3  ;;  %v9592_v3 = vld [vmem:[#allocation5 + $0x48] ss:$0 sm:$0xff] }
0x1081   :  { %v8781_v16 = vpop.f32.mrf.mxu1  ;;  %v8757_v22 = vpop.f32.mrf.mxu0 }
0x1082   :  { %v6502_v29 = vpack.c.bf16 %v8781_v16, %v8780_v15  ;;  %v6317_v35 = vpack.c.bf16 %v8757_v22, %v8756_v10 }
0x1083   :  { %v6455_v60 = vpop.f32.mrf.mxu1  ;;  %v6270_v24 = vpop.f32.mrf.mxu0 }
0x1084   :  { %v6501_v17 = vpack.c.bf16 %v6455_v60, %v6452_v11  ;;  %v6316_v26 = vpack.c.bf16 %v6270_v24, %v6267_v7 }
0x1085   :  { %v8784_v20 = vpop.f32.mrf.mxu1  ;;  %v8760_v30 = vpop.f32.mrf.mxu0 }
0x1087   :  { %6837 = vmatmul.mubr.bf16.gmra.mxu0 %v5949_v18  ;;  %6902 = vmatmul.mubr.bf16.gmra.mxu1 %v6315_v19  ;;  %v6468_v23 = vpop.f32.mrf.mxu1  ;;  %v6283_v32 = vpop.f32.mrf.mxu0 }
0x1088   :  { %6844 = vmatprep.mubr.bf16.mxu0 %v6135_v21  ;;  %6909 = vmatprep.mubr.bf16.mxu1 %v6501_v17 }
0x1089   :  { %v8785_v27 = vpop.f32.mrf.mxu1  ;;  %v8761_v37 = vpop.f32.mrf.mxu0 }
0x108a   :  { %v6504_v42 = vpack.c.bf16 %v8785_v27, %v8784_v20  ;;  %v6319_v47 = vpack.c.bf16 %v8761_v37, %v8760_v30 }
0x108b   :  { %v6471_v31 = vpop.f32.mrf.mxu1  ;;  %v6286_v39 = vpop.f32.mrf.mxu0 }
0x108c   :  { %v6503_v33 = vpack.c.bf16 %v6471_v31, %v6468_v23  ;;  %v6318_v40 = vpack.c.bf16 %v6286_v39, %v6283_v32 }
0x108d   :  { %v8788_v36 = vpop.f32.mrf.mxu1  ;;  %v8764_v43 = vpop.f32.mrf.mxu0 }
0x108f   :  { %6845 = vmatmul.mubr.bf16.gmra.mxu0 %v5950_v25  ;;  %6910 = vmatmul.mubr.bf16.gmra.mxu1 %v6316_v26  ;;  %v6484_v38 = vpop.f32.mrf.mxu1  ;;  %v6299_v45 = vpop.f32.mrf.mxu0 }
0x1090   :  { %6852 = vmatprep.mubr.bf16.mxu0 %v6136_v28  ;;  %6917 = vmatprep.mubr.bf16.mxu1 %v6502_v29 }
0x1091   :  { %v8789_v41 = vpop.f32.mrf.mxu1  ;;  %v8765_v48 = vpop.f32.mrf.mxu0 }
0x1092   :  { %v6506_v51 = vpack.c.bf16 %v8789_v41, %v8788_v36  ;;  %v6321_v13 = vpack.c.bf16 %v8765_v48, %v8764_v43 }
0x1093   :  { %v6487_v44 = vpop.f32.mrf.mxu1  ;;  %v6302_v49 = vpop.f32.mrf.mxu0 }
0x1094   :  { %v6505_v46 = vpack.c.bf16 %v6487_v44, %v6484_v38  ;;  %v6320_v50 = vpack.c.bf16 %v6302_v49, %v6299_v45 }
0x1097   :  { %6853 = vmatmul.mubr.bf16.gmra.mxu0 %v5951_v34  ;;  %6918 = vmatmul.mubr.bf16.gmra.mxu1 %v6317_v35 }
0x1098   :  { %6925 = vmatprep.mubr.bf16.mxu1 %v6503_v33 }
0x109f   :  { %6926 = vmatmul.mubr.bf16.gmra.mxu1 %v6318_v40 }
0x10a0   :  { %6933 = vmatprep.mubr.bf16.mxu1 %v6504_v42 }
0x10a7   :  { %6934 = vmatmul.mubr.bf16.gmra.mxu1 %v6319_v47 }
0x10a8   :  { %6941 = vmatprep.mubr.bf16.mxu1 %v6505_v46 }
0x10af   :  { %6942 = vmatmul.mubr.bf16.gmra.mxu1 %v6320_v50 }
0x10b0   :  { %6949 = vmatprep.mubr.bf16.mxu1 %v6506_v51 }
0x10b7   :  { %6950 = vmatmul.mubr.bf16.gmra.mxu1 %v6321_v13 }
0x111f   :  { %v8238_v52 = vpop.f32.mrf.mxu0 }
0x1121   :  { %v8239_v53 = vpop.f32.mrf.mxu0 }
0x1122   :  { %v8240_v14 = vadd.f32 %v8239_v53, %v8238_v52 }
0x1123   :  { %v8241_v54 = vpop.f32.mrf.mxu0 }
0x1125   :  { %v8242_v55 = vpop.f32.mrf.mxu0 }
0x1126   :  { %v8243_v7 = vadd.f32 %v8242_v55, %v8241_v54 }
0x1127   :  { %v8244_v56 = vpop.f32.mrf.mxu0 }
0x1129   :  { %v8245_v57 = vpop.f32.mrf.mxu0 }
0x112a   :  { %v8246_v22 = vadd.f32 %v8245_v57, %v8244_v56 }
0x112b   :  { %v8247_v62 = vpop.f32.mrf.mxu0 }
0x112d   :  { %v8248_v63 = vpop.f32.mrf.mxu0 }
0x112e   :  { %v8249_v29 = vadd.f32 %v8248_v63, %v8247_v62 }
0x112f   :  { %v8250_v0 = vpop.f32.mrf.mxu0 }
0x1131   :  { %v8251_v1 = vpop.f32.mrf.mxu0 }
0x1132   :  { %v8252_v36 = vadd.f32 %v8251_v1, %v8250_v0 }
0x1133   :  { %v8253_v2 = vpop.f32.mrf.mxu0 }
0x1135   :  { %v8254_v5 = vpop.f32.mrf.mxu0 }
0x1136   :  { %v8255_v44 = vadd.f32 %v8254_v5, %v8253_v2 }
0x1137   :  { %v8256_v6 = vpop.f32.mrf.mxu0 }
0x1139   :  { %v8257_v4 = vpop.f32.mrf.mxu0 }
0x113a   :  { %v8258_v13 = vadd.f32 %v8257_v4, %v8256_v6 }
0x113b   :  { %v9584_v8 = vpop.f32.mrf.mxu0 }
0x113d   :  { %v9586_v58 = vpop.f32.mrf.mxu0 }
0x113e   :  { %v8261_v63 = vadd.f32 %v9586_v58, %v9584_v8 }
0x113f   :  { %v9588_v59 = vpop.f32.mrf.mxu0  ;;  %v8302_v9 = vpop.f32.mrf.mxu1 }
0x1141   :  { %v8303_v12 = vpop.f32.mrf.mxu1  ;;  %v9590_v61 = vpop.f32.mrf.mxu0 }
0x1142   :  { %v8304_v15 = vadd.f32 %v8303_v12, %v8302_v9  ;;  %v8264_v12 = vadd.f32 %v9590_v61, %v9588_v59 }
0x1143   :  { %v8305_v10 = vpop.f32.mrf.mxu1  ;;  %v9595_v18 = vpop.f32.mrf.mxu0 }
0x1144   :  { %v6896_v11 = vadd.f32 %v8304_v15, %v8240_v14 }
0x1145   :  { %v8306_v16 = vpop.f32.mrf.mxu1  ;;  %v8266_v25 = vpop.f32.mrf.mxu0 }
0x1146   :  { %v6962_v60 = vadd.f32 %v9592_v3, %v6896_v11  ;;  %v8307_v17 = vadd.f32 %v8306_v16, %v8305_v10 }
0x1147   :  { %v8308_v19 = vpop.f32.mrf.mxu1  ;;  %v9599_v32 = vpop.f32.mrf.mxu0 }
0x1148   :  { %9207 = vtanh.f32 %v6962_v60  ;;  %v6899_v20 = vadd.f32 %v8307_v17, %v8243_v7  ;;  %v8267_v7 = vadd.f32 %v8266_v25, %v9595_v18 }
0x1149   :  { %v8309_v21 = vpop.f32.mrf.mxu1  ;;  %v8269_v39 = vpop.f32.mrf.mxu0 }
0x114a   :  { %v6963_v23 = vadd.f32 %v9592_v3, %v6899_v20  ;;  %v8310_v24 = vadd.f32 %v8309_v21, %v8308_v19 }
0x114b   :  { %v8311_v26 = vpop.f32.mrf.mxu1  ;;  %v8271_v47 = vpop.f32.mrf.mxu0 }
0x114c   :  { %9209 = vtanh.f32 %v6963_v23  ;;  %v6904_v27 = vadd.f32 %v8310_v24, %v8246_v22  ;;  %v8270_v22 = vadd.f32 %v8269_v39, %v9599_v32 }
0x114d   :  { %v8312_v28 = vpop.f32.mrf.mxu1  ;;  %v8272_v54 = vpop.f32.mrf.mxu0 }
0x114e   :  { %v6964_v30 = vadd.f32 %v9592_v3, %v6904_v27  ;;  %v8313_v31 = vadd.f32 %v8312_v28, %v8311_v26 }
0x114f   :  { %v8314_v33 = vpop.f32.mrf.mxu1  ;;  %v8274_v2 = vpop.f32.mrf.mxu0 }
0x1150   :  { %9211 = vtanh.f32 %v6964_v30  ;;  %v6907_v34 = vadd.f32 %v8313_v31, %v8249_v29  ;;  %v8273_v29 = vadd.f32 %v8272_v54, %v8271_v47 }
0x1151   :  { %v8315_v35 = vpop.f32.mrf.mxu1  ;;  %v8275_v8 = vpop.f32.mrf.mxu0 }
0x1152   :  { %v6965_v37 = vadd.f32 %v9592_v3, %v6907_v34  ;;  %v8316_v38 = vadd.f32 %v8315_v35, %v8314_v33 }
0x1153   :  { %v8317_v40 = vpop.f32.mrf.mxu1  ;;  %v8277_v19 = vpop.f32.mrf.mxu0 }
0x1154   :  { %9213 = vtanh.f32 %v6965_v37  ;;  %v6912_v41 = vadd.f32 %v8316_v38, %v8252_v36  ;;  %v8276_v37 = vadd.f32 %v8275_v8, %v8274_v2 }
0x1155   :  { %v9208_v42 = vpop.eup %9207  ;;  %v8318_v43 = vpop.f32.mrf.mxu1 }
0x1156   :  { %6994 = vst.msk [vmem:[#allocation7] sm:$0xff] %vm905_vm0, %v9208_v42  ;;  %v6966_v45 = vadd.f32 %v9592_v3, %v6912_v41  ;;  %v8319_v46 = vadd.f32 %v8318_v43, %v8317_v40  ;;  %v8278_v26 = vpop.f32.mrf.mxu0 }
0x1157   :  { %v8320_v48 = vpop.f32.mrf.mxu1 }
0x1158   :  { %9215 = vtanh.f32 %v6966_v45  ;;  %v6915_v49 = vadd.f32 %v8319_v46, %v8255_v44  ;;  %v8280_v33 = vpop.f32.mrf.mxu0  ;;  %v8279_v45 = vadd.f32 %v8278_v26, %v8277_v19 }
0x1159   :  { %v9210_v50 = vpop.eup %9209  ;;  %v8321_v51 = vpop.f32.mrf.mxu1 }
0x115a   :  { %6995 = vst.msk [vmem:[#allocation7 + $0x8] sm:$0xff] %vm905_vm0, %v9210_v50  ;;  %v6967_v52 = vadd.f32 %v9592_v3, %v6915_v49  ;;  %v8322_v53 = vadd.f32 %v8321_v51, %v8320_v48  ;;  %v8281_v40 = vpop.f32.mrf.mxu0 }
0x115b   :  { %v8323_v55 = vpop.f32.mrf.mxu1 }
0x115c   :  { %9217 = vtanh.f32 %v6967_v52  ;;  %v6920_v56 = vadd.f32 %v8322_v53, %v8258_v13  ;;  %v8283_v48 = vpop.f32.mrf.mxu0  ;;  %v8282_v52 = vadd.f32 %v8281_v40, %v8280_v33 }
0x115d   :  { %v9212_v57 = vpop.eup %9211  ;;  %v8324_v62 = vpop.f32.mrf.mxu1 }
0x115e   :  { %6996 = vst.msk [vmem:[#allocation7 + $0x10] sm:$0xff] %vm905_vm0, %v9212_v57  ;;  %v6968_v0 = vadd.f32 %v9592_v3, %v6920_v56  ;;  %v8325_v1 = vadd.f32 %v8324_v62, %v8323_v55  ;;  %v8284_v55 = vpop.f32.mrf.mxu0 }
0x115f   :  { %v8326_v5 = vpop.f32.mrf.mxu1 }
0x1160   :  { %9219 = vtanh.f32 %v6968_v0  ;;  %v6923_v6 = vadd.f32 %v8325_v1, %v8261_v63  ;;  %v8285_v0 = vadd.f32 %v8284_v55, %v8283_v48 }
0x1161   :  { %v9214_v4 = vpop.eup %9213  ;;  %v8327_v9 = vpop.f32.mrf.mxu1 }
0x1162   :  { %6997 = vst.msk [vmem:[#allocation7 + $0x18] sm:$0xff] %vm905_vm0, %v9214_v4  ;;  %v6969_v14 = vadd.f32 %v9592_v3, %v6923_v6  ;;  %v8328_v15 = vadd.f32 %v8327_v9, %v8326_v5 }
0x1163   :  { %v8329_v58 = vpop.f32.mrf.mxu1 }
0x1164   :  { %9221 = vtanh.f32 %v6969_v14  ;;  %v6928_v10 = vadd.f32 %v8328_v15, %v8264_v12 }
0x1165   :  { %v9216_v11 = vpop.eup %9215  ;;  %v8330_v16 = vpop.f32.mrf.mxu1 }
0x1166   :  { %6998 = vst.msk [vmem:[#allocation7 + $0x20] sm:$0xff] %vm905_vm0, %v9216_v11  ;;  %v6970_v60 = vadd.f32 %v9592_v3, %v6928_v10  ;;  %v8331_v17 = vadd.f32 %v8330_v16, %v8329_v58 }
0x1167   :  { %v8332_v59 = vpop.f32.mrf.mxu1 }
0x1168   :  { %9223 = vtanh.f32 %v6970_v60  ;;  %v6931_v61 = vadd.f32 %v8331_v17, %v8267_v7 }
0x1169   :  { %v9218_v20 = vpop.eup %9217  ;;  %v8333_v21 = vpop.f32.mrf.mxu1 }
0x116a   :  { %6999 = vst.msk [vmem:[#allocation7 + $0x28] sm:$0xff] %vm905_vm0, %v9218_v20  ;;  %v6971_v23 = vadd.f32 %v9592_v3, %v6931_v61  ;;  %v8334_v24 = vadd.f32 %v8333_v21, %v8332_v59 }
0x116b   :  { %v8335_v18 = vpop.f32.mrf.mxu1 }
0x116c   :  { %9225 = vtanh.f32 %v6971_v23  ;;  %v6936_v25 = vadd.f32 %v8334_v24, %v8270_v22 }
0x116d   :  { %v9220_v27 = vpop.eup %9219  ;;  %v8336_v28 = vpop.f32.mrf.mxu1 }
0x116e   :  { %7000 = vst.msk [vmem:[#allocation7 + $0x30] sm:$0xff] %vm905_vm0, %v9220_v27  ;;  %v6972_v30 = vadd.f32 %v9592_v3, %v6936_v25  ;;  %v8337_v31 = vadd.f32 %v8336_v28, %v8335_v18 }
0x116f   :  { %v8338_v34 = vpop.f32.mrf.mxu1 }
0x1170   :  { %9227 = vtanh.f32 %v6972_v30  ;;  %v6939_v32 = vadd.f32 %v8337_v31, %v8273_v29 }
0x1171   :  { %v9222_v35 = vpop.eup %9221  ;;  %v8339_v36 = vpop.f32.mrf.mxu1 }
0x1172   :  { %7001 = vst.msk [vmem:[#allocation7 + $0x38] sm:$0xff] %vm905_vm0, %v9222_v35  ;;  %v6973_v38 = vadd.f32 %v9592_v3, %v6939_v32  ;;  %v8340_v39 = vadd.f32 %v8339_v36, %v8338_v34 }
0x1173   :  { %v8341_v41 = vpop.f32.mrf.mxu1 }
0x1174   :  { %9229 = vtanh.f32 %v6973_v38  ;;  %v6944_v42 = vadd.f32 %v8340_v39, %v8276_v37 }
0x1175   :  { %v9224_v43 = vpop.eup %9223  ;;  %v8342_v44 = vpop.f32.mrf.mxu1 }
0x1176   :  { %7002 = vst.msk [vmem:[#allocation7 + $0x40] sm:$0xff] %vm905_vm0, %v9224_v43  ;;  %v6974_v46 = vadd.f32 %v9592_v3, %v6944_v42  ;;  %v8343_v47 = vadd.f32 %v8342_v44, %v8341_v41 }
0x1177   :  { %v8344_v49 = vpop.f32.mrf.mxu1 }
0x1178   :  { %9231 = vtanh.f32 %v6974_v46  ;;  %v6947_v50 = vadd.f32 %v8343_v47, %v8279_v45 }
0x1179   :  { %v9226_v51 = vpop.eup %9225  ;;  %v8345_v13 = vpop.f32.mrf.mxu1 }
0x117a   :  { %7003 = vst.msk [vmem:[#allocation7 + $0x48] sm:$0xff] %vm905_vm0, %v9226_v51  ;;  %v6975_v53 = vadd.f32 %v9592_v3, %v6947_v50  ;;  %v8346_v54 = vadd.f32 %v8345_v13, %v8344_v49 }
0x117b   :  { %v8347_v56 = vpop.f32.mrf.mxu1 }
0x117c   :  { %9233 = vtanh.f32 %v6975_v53  ;;  %v6952_v57 = vadd.f32 %v8346_v54, %v8282_v52 }
0x117d   :  { %v9228_v62 = vpop.eup %9227  ;;  %v8348_v63 = vpop.f32.mrf.mxu1 }
0x117e   :  { %7004 = vst.msk [vmem:[#allocation7 + $0x50] sm:$0xff] %vm905_vm0, %v9228_v62  ;;  %v6976_v1 = vadd.f32 %v9592_v3, %v6952_v57  ;;  %v8349_v2 = vadd.f32 %v8348_v63, %v8347_v56 }
0x1180   :  { %9235 = vtanh.f32 %v6976_v1  ;;  %v6955_v5 = vadd.f32 %v8349_v2, %v8285_v0 }
0x1181   :  { %v9230_v6 = vpop.eup %9229 }
0x1182   :  { %7005 = vst.msk [vmem:[#allocation7 + $0x58] sm:$0xff] %vm905_vm0, %v9230_v6  ;;  %v6977_v4 = vadd.f32 %v9592_v3, %v6955_v5 }
0x1184   :  { %9237 = vtanh.f32 %v6977_v4 }
0x1185   :  { %v9232_v9 = vpop.eup %9231 }
0x1186   :  { %7006 = vst.msk [vmem:[#allocation7 + $0x60] sm:$0xff] %vm905_vm0, %v9232_v9 }
0x1189   :  { %v9234_v12 = vpop.eup %9233 }
0x118a   :  { %7007 = vst.msk [vmem:[#allocation7 + $0x68] sm:$0xff] %vm905_vm0, %v9234_v12 }
0x118d   :  { %v9236_v14 = vpop.eup %9235 }
0x118e   :  { %7008 = vst.msk [vmem:[#allocation7 + $0x70] sm:$0xff] %vm905_vm0, %v9236_v14 }
0x1191   :  { %v9238_v15 = vpop.eup %9237 }
0x1192   :  { %7009 = vst.msk [vmem:[#allocation7 + $0x78] sm:$0xff] %vm905_vm0, %v9238_v15 }
0x1193   :  { %9290 = shalt.err (!%p9287_p0)
}
0x1194   :  { %7021 = dma.vmem_to_hbm [thread:$0]  %s7016_s30, 2048, %s9645_s3, [#allocation4], %s9309_s22, %s9309_s22, %s9310_s23  }
0x1195   :  { %9303 = dma.done.wait [#allocation4], 2048  }
0x1196   :  { %9304 = vsyncadd [#allocation4], 4294965248 }
0x1197   :  { %7025 = vsyncpa [#allocation3], 1 }
0x1198   :  { %7026 = vsyncpa [#allocation6], 1 }
0x1199   :  { %7027 = vsyncpa [#allocation4], 1 }

</bundles_post_ra>
